<compile_context>
chip_gen: v7x
topology: tpu7x:2x2x1
jax: 0.10.0
libtpu: 0.0.40
codegen_flags: <defaults>
</compile_context>

<pallas_src>
import functools

import jax
import jax.numpy as jnp
from jax.experimental import pallas as pl
from jax.experimental.pallas import tpu as pltpu


def _residual_block_kernel(x_ref, w1_ref, w2_ref, p_ref, o_ref, xp_ref, *, H, W, C, eps):
    # x_ref : (1, H, W, C)         one input sample, NHWC
    # w1/w2 : (3, 3*C, C)          conv weights, (kh, kw*Cin, Cout), MXU operand dtype
    # p_ref : (4, C)               [gamma1, beta1, gamma2, beta2]
    # o_ref : (1, H, W, C)
    # xp_ref: (H+2, W+16, C) f32   reused reflection-pad scratch; body lives at column 8
    f32 = jnp.float32
    x = x_ref[0].astype(f32)                                           # (H, W, C)

    def conv3x3(y, w_ref):
        mdt = w_ref.dtype                                              # MXU operand dtype
        cdt = xp_ref.dtype

        # --- reflection pad: write once into the shared scratch (body at col 8) ------
        xp_ref[1:H + 1, 8:8 + W, :] = y.astype(cdt)                    # body
        xp_ref[0:1, 8:8 + W, :] = y[1:2].astype(cdt)                   # top    = row 1
        xp_ref[H + 1:H + 2, 8:8 + W, :] = y[H - 2:H - 1].astype(cdt)   # bottom = row H-2
        xp_ref[:, 7:8, :] = xp_ref[:, 9:10, :]                         # left  col = col 1
        xp_ref[:, W + 8:W + 9, :] = xp_ref[:, W + 6:W + 7, :]          # right col = col W-2

        xp = xp_ref[...]                                               # (H+2, W+16, C)
        # +/-1 column shifts via XLU rotation -> all later W-slices are sublane aligned.
        xl = pltpu.roll(xp, shift=1, axis=1)        # xl[:, j] = xp[:, j-1]   (kw = 0 tap)
        xr = pltpu.roll(xp, shift=W + 15, axis=1)   # xr[:, j] = xp[:, j+1]   (kw = 2 tap)

        # im2col along the channel (lane) axis: one (H+2, W+16, 3C) slab, K = 3*C.
        x3 = jnp.concatenate([xl.astype(mdt), xp.astype(mdt), xr.astype(mdt)], axis=-1)

        acc = None
        for kh in range(3):                          # back-to-back MXU dots (MRB-friendly)
            patch = x3[kh:kh + H, 8:8 + W, :].reshape(H * W, 3 * C)
            part = jax.lax.dot_general(
                patch, w_ref[kh],                                      # (3C, C)
                dimension_numbers=(((1,), (0,)), ((), ())),
                preferred_element_type=f32)
            acc = part if acc is None else acc + part
        return acc.reshape(H, W, C)

    def instance_norm(y, gamma, beta):
        # Single-pass stats: sum & sum-of-squares, biased var = E[y^2] - m^2 (all f32).
        inv_hw = 1.0 / (H * W)
        s = jnp.sum(y, axis=(0, 1), keepdims=True)                     # (1, 1, C)
        s2 = jnp.sum(y * y, axis=(0, 1), keepdims=True)
        m = s * inv_hw
        v = s2 * inv_hw - m * m
        return (y - m) * jax.lax.rsqrt(v + eps) * gamma + beta

    p = p_ref[...].astype(f32)                                         # (4, C)
    g1 = p[0:1, :].reshape(1, 1, C)
    b1 = p[1:2, :].reshape(1, 1, C)
    g2 = p[2:3, :].reshape(1, 1, C)
    b2 = p[3:4, :].reshape(1, 1, C)

    h = conv3x3(x, w1_ref)
    h = jnp.maximum(instance_norm(h, g1, b1), 0.0)
    h = conv3x3(h, w2_ref)
    o_ref[0] = (instance_norm(h, g2, b2) + x).astype(o_ref.dtype)      # residual add


def _vmem_limit_bytes(H, W, C, mxu_itemsize):
    hw, padded = H * W, (H + 2) * (W + 16)
    est = (4 * hw * C * 4                        # double-buffered in/out blocks (f32)
           + 2 * 2 * 9 * C * C * mxu_itemsize    # both conv weights, double-buffered
           + 3 * padded * C * 4                  # pad scratch + two rolled copies (f32)
           + padded * 3 * C * mxu_itemsize       # im2col slab
           + 6 * hw * C * 4)                     # acc / activations / norm temps (f32)
    return int(min(max(2 * est, 32 * 1024 * 1024), 64 * 1024 * 1024))


def residual_block_nhwc(x_nhwc, conv1_w, in1_gamma, in1_beta,
                        conv2_w, in2_gamma, in2_beta,
                        *, eps=1e-5, mxu_dtype=jnp.bfloat16):
    """Fused ResidualBlock forward on NHWC activations (preferred network-internal entry)."""
    N, H, W, C = x_nhwc.shape
    assert conv1_w.shape == (C, C, 3, 3) and conv2_w.shape == (C, C, 3, 3)
    assert H >= 2 and W >= 2

    # OIHW -> (kh, kw*Cin, Cout); rows [kw*C : (kw+1)*C] match the lane-axis im2col order.
    def pack_w(w):
        return jnp.transpose(w, (2, 3, 1, 0)).reshape(3, 3 * C, C).astype(mxu_dtype)

    w1 = pack_w(conv1_w)
    w2 = pack_w(conv2_w)
    params = jnp.stack([in1_gamma, in1_beta, in2_gamma, in2_beta]).astype(jnp.float32)

    kernel = functools.partial(_residual_block_kernel, H=H, W=W, C=C, eps=eps)

    return pl.pallas_call(
        kernel,
        out_shape=jax.ShapeDtypeStruct((N, H, W, C), x_nhwc.dtype),
        grid_spec=pltpu.PrefetchScalarGridSpec(
            num_scalar_prefetch=0,
            grid=(N,),
            in_specs=[
                pl.BlockSpec((1, H, W, C), lambda n: (n, 0, 0, 0)),
                pl.BlockSpec((3, 3 * C, C), lambda n: (0, 0, 0)),
                pl.BlockSpec((3, 3 * C, C), lambda n: (0, 0, 0)),
                pl.BlockSpec((4, C), lambda n: (0, 0)),
            ],
            out_specs=pl.BlockSpec((1, H, W, C), lambda n: (n, 0, 0, 0)),
            scratch_shapes=[pltpu.VMEM((H + 2, W + 16, C), jnp.float32)],
        ),
        compiler_params=pltpu.CompilerParams(
            dimension_semantics=("parallel",),
            vmem_limit_bytes=_vmem_limit_bytes(H, W, C, jnp.dtype(mxu_dtype).itemsize),
        ),
    )(x_nhwc, w1, w2, params)


def residual_block(x_nchw, conv1_w, conv1_b, in1_gamma, in1_beta,
                   conv2_w, conv2_b, in2_gamma, in2_beta,
                   *, eps=1e-5, mxu_dtype=jnp.bfloat16):
    """PyTorch-layout (NCHW) compatibility wrapper.

    In a full network, keep activations NHWC and call residual_block_nhwc per block so the
    NCHW<->NHWC transposes are paid only once at network entry/exit.
    Conv biases are accepted for API parity but are exactly cancelled by InstanceNorm's
    mean subtraction, so they are not used.
    """
    del conv1_b, conv2_b
    x_nhwc = jnp.transpose(x_nchw, (0, 2, 3, 1))
    out = residual_block_nhwc(x_nhwc, conv1_w, in1_gamma, in1_beta,
                              conv2_w, in2_gamma, in2_beta,
                              eps=eps, mxu_dtype=mxu_dtype)
    return jnp.transpose(out, (0, 3, 1, 2))


def _reference(x, w1, b1, g1, be1, w2, b2, g2, be2, eps=1e-5):
    """Pure-JAX reference mirroring the PyTorch ResidualBlock forward (NCHW, f32)."""
    def conv(x, w, b):
        xp = jnp.pad(x, ((0, 0), (0, 0), (1, 1), (1, 1)), mode="reflect")
        y = jax.lax.conv_general_dilated(
            xp, w, window_strides=(1, 1), padding="VALID",
            dimension_numbers=("NCHW", "OIHW", "NCHW"),
            precision=jax.lax.Precision.HIGHEST)
        return y + b[None, :, None, None]

    def inorm(y, g, be):
        m = jnp.mean(y, axis=(2, 3), keepdims=True)
        v = jnp.mean((y - m) ** 2, axis=(2, 3), keepdims=True)
        return (y - m) * jax.lax.rsqrt(v + eps) * g[None, :, None, None] \
            + be[None, :, None, None]

    h = jnp.maximum(inorm(conv(x, w1, b1), g1, be1), 0.0)
    return inorm(conv(h, w2, b2), g2, be2) + x


if __name__ == "__main__":
    # Small stand-in for ResidualBlock(128) of transformer_net (production is C=128,
    # which is lane-dense; this toy C=32 shape is a correctness check, not a benchmark).
    N, C, H, W = 2, 32, 16, 16
    key = jax.random.PRNGKey(0)
    ks = jax.random.split(key, 9)
    x = jax.random.normal(ks[0], (N, C, H, W), dtype=jnp.float32)
    w1 = 0.1 * jax.random.normal(ks[1], (C, C, 3, 3), dtype=jnp.float32)
    b1 = 0.1 * jax.random.normal(ks[2], (C,), dtype=jnp.float32)
    g1 = 1.0 + 0.1 * jax.random.normal(ks[3], (C,), dtype=jnp.float32)
    be1 = 0.1 * jax.random.normal(ks[4], (C,), dtype=jnp.float32)
    w2 = 0.1 * jax.random.normal(ks[5], (C, C, 3, 3), dtype=jnp.float32)
    b2 = 0.1 * jax.random.normal(ks[6], (C,), dtype=jnp.float32)
    g2 = 1.0 + 0.1 * jax.random.normal(ks[7], (C,), dtype=jnp.float32)
    be2 = 0.1 * jax.random.normal(ks[8], (C,), dtype=jnp.float32)

    ref = _reference(x, w1, b1, g1, be1, w2, b2, g2, be2)

    # 1) f32 MXU operands: tight numerical check against the PyTorch-equivalent reference.
    out_f32 = jax.block_until_ready(
        residual_block(x, w1, b1, g1, be1, w2, b2, g2, be2, mxu_dtype=jnp.float32))
    assert out_f32.shape == (N, C, H, W), out_f32.shape
    err_f32 = float(jnp.max(jnp.abs(out_f32 - ref)))
    assert jnp.allclose(out_f32, ref, atol=2e-3, rtol=2e-3), err_f32

    # 2) bf16 MXU operands (recommended production path on v6e/v7x), f32 accumulation:
    #    looser tolerance accounts for bf16 operand rounding through two convs.
    out_bf16 = jax.block_until_ready(
        residual_block(x, w1, b1, g1, be1, w2, b2, g2, be2, mxu_dtype=jnp.bfloat16))
    assert out_bf16.shape == (N, C, H, W), out_bf16.shape
    err_bf16 = float(jnp.max(jnp.abs(out_bf16 - ref)))
    assert err_bf16 < 1e-1, err_bf16

    print("KERNEL_OK")
</pallas_src>

<mosaic_0001>
module attributes {stable_mosaic.version = 11 : i64} {
  func.func @_residual_block_kernel(%arg0: i32, %arg1: memref<1x16x16x32xf32, #tpu.memory_space<vmem>>, %arg2: memref<3x96x32xf32, #tpu.memory_space<vmem>>, %arg3: memref<3x96x32xf32, #tpu.memory_space<vmem>>, %arg4: memref<4x32xf32, #tpu.memory_space<vmem>>, %arg5: memref<1x16x16x32xf32, #tpu.memory_space<vmem>>, %arg6: memref<18x32x32xf32, #tpu.memory_space<vmem>>) attributes {dimension_semantics = [#tpu.dimension_semantics<parallel>], iteration_bounds = array<i64: 2>, scalar_prefetch = 0 : i64, scratch_operands = 1 : i64, tpu.core_type = #tpu.core_type<tc>, window_params = [{transform_indices = @transform_0, window_bounds = array<i64: 1, 16, 16, 32>}, {pipeline_mode = #tpu.pipeline_mode<synchronous>, transform_indices = @transform_1, window_bounds = array<i64: 3, 96, 32>}, {pipeline_mode = #tpu.pipeline_mode<synchronous>, transform_indices = @transform_2, window_bounds = array<i64: 3, 96, 32>}, {pipeline_mode = #tpu.pipeline_mode<synchronous>, transform_indices = @transform_3, window_bounds = array<i64: 4, 32>}, {transform_indices = @transform_4, window_bounds = array<i64: 1, 16, 16, 32>}]} {
    %c0 = arith.constant 0 : index
    %c0_0 = arith.constant 0 : index
    %c0_1 = arith.constant 0 : index
    %c0_2 = arith.constant 0 : index
    %0 = vector.load %arg1[%c0, %c0_0, %c0_1, %c0_2] : memref<1x16x16x32xf32, #tpu.memory_space<vmem>>, vector<1x16x16x32xf32>
    %1 = vector.shape_cast %0 : vector<1x16x16x32xf32> to vector<16x16x32xf32>
    %c0_3 = arith.constant 0 : index
    %c0_4 = arith.constant 0 : index
    %2 = vector.load %arg4[%c0_3, %c0_4] : memref<4x32xf32, #tpu.memory_space<vmem>>, vector<4x32xf32>
    %3 = vector.extract_strided_slice %2 {offsets = [0, 0], sizes = [1, 32], strides = [1, 1]} : vector<4x32xf32> to vector<1x32xf32>
    %4 = vector.shape_cast %3 : vector<1x32xf32> to vector<1x1x32xf32>
    %5 = vector.extract_strided_slice %2 {offsets = [1, 0], sizes = [1, 32], strides = [1, 1]} : vector<4x32xf32> to vector<1x32xf32>
    %6 = vector.shape_cast %5 : vector<1x32xf32> to vector<1x1x32xf32>
    %7 = vector.extract_strided_slice %2 {offsets = [2, 0], sizes = [1, 32], strides = [1, 1]} : vector<4x32xf32> to vector<1x32xf32>
    %8 = vector.shape_cast %7 : vector<1x32xf32> to vector<1x1x32xf32>
    %9 = vector.extract_strided_slice %2 {offsets = [3, 0], sizes = [1, 32], strides = [1, 1]} : vector<4x32xf32> to vector<1x32xf32>
    %10 = vector.shape_cast %9 : vector<1x32xf32> to vector<1x1x32xf32>
    %c1 = arith.constant 1 : index
    %c8 = arith.constant 8 : index
    %c0_5 = arith.constant 0 : index
    %11 = vector.load %arg6[%c1, %c8, %c0_5] : memref<18x32x32xf32, #tpu.memory_space<vmem>>, vector<16x16x32xf32>
    tpu.vector_store %arg6[%c1, %c8, %c0_5], %1 {strides = array<i32>} : memref<18x32x32xf32, #tpu.memory_space<vmem>>, vector<16x16x32xf32>,
    %12 = vector.extract_strided_slice %1 {offsets = [1, 0, 0], sizes = [1, 16, 32], strides = [1, 1, 1]} : vector<16x16x32xf32> to vector<1x16x32xf32>
    %c0_6 = arith.constant 0 : index
    %c8_7 = arith.constant 8 : index
    %c0_8 = arith.constant 0 : index
    %13 = vector.load %arg6[%c0_6, %c8_7, %c0_8] : memref<18x32x32xf32, #tpu.memory_space<vmem>>, vector<1x16x32xf32>
    tpu.vector_store %arg6[%c0_6, %c8_7, %c0_8], %12 {strides = array<i32>} : memref<18x32x32xf32, #tpu.memory_space<vmem>>, vector<1x16x32xf32>,
    %14 = vector.extract_strided_slice %1 {offsets = [14, 0, 0], sizes = [1, 16, 32], strides = [1, 1, 1]} : vector<16x16x32xf32> to vector<1x16x32xf32>
    %c17 = arith.constant 17 : index
    %c8_9 = arith.constant 8 : index
    %c0_10 = arith.constant 0 : index
    %15 = vector.load %arg6[%c17, %c8_9, %c0_10] : memref<18x32x32xf32, #tpu.memory_space<vmem>>, vector<1x16x32xf32>
    tpu.vector_store %arg6[%c17, %c8_9, %c0_10], %14 {strides = array<i32>} : memref<18x32x32xf32, #tpu.memory_space<vmem>>, vector<1x16x32xf32>,
    %c0_11 = arith.constant 0 : index
    %c9 = arith.constant 9 : index
    %c0_12 = arith.constant 0 : index
    %16 = vector.load %arg6[%c0_11, %c9, %c0_12] : memref<18x32x32xf32, #tpu.memory_space<vmem>>, vector<18x1x32xf32>
    %c0_13 = arith.constant 0 : index
    %c7 = arith.constant 7 : index
    %c0_14 = arith.constant 0 : index
    %17 = vector.load %arg6[%c0_13, %c7, %c0_14] : memref<18x32x32xf32, #tpu.memory_space<vmem>>, vector<18x1x32xf32>
    tpu.vector_store %arg6[%c0_13, %c7, %c0_14], %16 {strides = array<i32>} : memref<18x32x32xf32, #tpu.memory_space<vmem>>, vector<18x1x32xf32>,
    %c0_15 = arith.constant 0 : index
    %c22 = arith.constant 22 : index
    %c0_16 = arith.constant 0 : index
    %18 = vector.load %arg6[%c0_15, %c22, %c0_16] : memref<18x32x32xf32, #tpu.memory_space<vmem>>, vector<18x1x32xf32>
    %c0_17 = arith.constant 0 : index
    %c24 = arith.constant 24 : index
    %c0_18 = arith.constant 0 : index
    %19 = vector.load %arg6[%c0_17, %c24, %c0_18] : memref<18x32x32xf32, #tpu.memory_space<vmem>>, vector<18x1x32xf32>
    tpu.vector_store %arg6[%c0_17, %c24, %c0_18], %18 {strides = array<i32>} : memref<18x32x32xf32, #tpu.memory_space<vmem>>, vector<18x1x32xf32>,
    %c0_19 = arith.constant 0 : index
    %c0_20 = arith.constant 0 : index
    %c0_21 = arith.constant 0 : index
    %20 = vector.load %arg6[%c0_19, %c0_20, %c0_21] : memref<18x32x32xf32, #tpu.memory_space<vmem>>, vector<18x32x32xf32>
    %c1_i32 = arith.constant 1 : i32
    %21 = tpu.dynamic_rotate %20 by %c1_i32 dim 1 : vector<18x32x32xf32>, i32 -> vector<18x32x32xf32>
    %c31_i32 = arith.constant 31 : i32
    %22 = tpu.dynamic_rotate %20 by %c31_i32 dim 1 : vector<18x32x32xf32>, i32 -> vector<18x32x32xf32>
    %23 = tpu.concatenate %21, %20, %22 in 2 : vector<18x32x32xf32>, vector<18x32x32xf32>, vector<18x32x32xf32> -> vector<18x32x96xf32>
    %24 = vector.extract_strided_slice %23 {offsets = [0, 8, 0], sizes = [16, 16, 96], strides = [1, 1, 1]} : vector<18x32x96xf32> to vector<16x16x96xf32>
    %25 = vector.shape_cast %24 : vector<16x16x96xf32> to vector<256x96xf32>
    %c0_22 = arith.constant 0 : index
    %c0_23 = arith.constant 0 : index
    %c0_24 = arith.constant 0 : index
    %26 = vector.load %arg2[%c0_22, %c0_23, %c0_24] : memref<3x96x32xf32, #tpu.memory_space<vmem>>, vector<1x96x32xf32>
    %27 = vector.shape_cast %26 : vector<1x96x32xf32> to vector<96x32xf32>
    %cst = arith.constant dense<0.000000e+00> : vector<256x32xf32>
    %28 = tpu.matmul %25, %27, %cst {dimension_numbers = #tpu.dot_dimension_numbers<[1], [0], [0], [1], [0, 0, 1, 1], [], []>} : vector<256x96xf32>, vector<96x32xf32>, vector<256x32xf32> -> vector<256x32xf32>
    %29 = vector.extract_strided_slice %23 {offsets = [1, 8, 0], sizes = [16, 16, 96], strides = [1, 1, 1]} : vector<18x32x96xf32> to vector<16x16x96xf32>
    %30 = vector.shape_cast %29 : vector<16x16x96xf32> to vector<256x96xf32>
    %c1_25 = arith.constant 1 : index
    %c0_26 = arith.constant 0 : index
    %c0_27 = arith.constant 0 : index
    %31 = vector.load %arg2[%c1_25, %c0_26, %c0_27] : memref<3x96x32xf32, #tpu.memory_space<vmem>>, vector<1x96x32xf32>
    %32 = vector.shape_cast %31 : vector<1x96x32xf32> to vector<96x32xf32>
    %cst_28 = arith.constant dense<0.000000e+00> : vector<256x32xf32>
    %33 = tpu.matmul %30, %32, %cst_28 {dimension_numbers = #tpu.dot_dimension_numbers<[1], [0], [0], [1], [0, 0, 1, 1], [], []>} : vector<256x96xf32>, vector<96x32xf32>, vector<256x32xf32> -> vector<256x32xf32>
    %34 = arith.addf %28, %33 : vector<256x32xf32>
    %35 = vector.extract_strided_slice %23 {offsets = [2, 8, 0], sizes = [16, 16, 96], strides = [1, 1, 1]} : vector<18x32x96xf32> to vector<16x16x96xf32>
    %36 = vector.shape_cast %35 : vector<16x16x96xf32> to vector<256x96xf32>
    %c2 = arith.constant 2 : index
    %c0_29 = arith.constant 0 : index
    %c0_30 = arith.constant 0 : index
    %37 = vector.load %arg2[%c2, %c0_29, %c0_30] : memref<3x96x32xf32, #tpu.memory_space<vmem>>, vector<1x96x32xf32>
    %38 = vector.shape_cast %37 : vector<1x96x32xf32> to vector<96x32xf32>
    %cst_31 = arith.constant dense<0.000000e+00> : vector<256x32xf32>
    %39 = tpu.matmul %36, %38, %cst_31 {dimension_numbers = #tpu.dot_dimension_numbers<[1], [0], [0], [1], [0, 0, 1, 1], [], []>} : vector<256x96xf32>, vector<96x32xf32>, vector<256x32xf32> -> vector<256x32xf32>
    %40 = arith.addf %34, %39 : vector<256x32xf32>
    %41 = vector.shape_cast %40 : vector<256x32xf32> to vector<16x16x32xf32>
    %cst_32 = arith.constant dense<0.000000e+00> : vector<32xf32>
    %42 = vector.multi_reduction <add>, %41, %cst_32 [0, 1] : vector<16x16x32xf32> to vector<32xf32>
    %43 = vector.shape_cast %42 : vector<32xf32> to vector<1x1x32xf32>
    %44 = arith.mulf %41, %41 : vector<16x16x32xf32>
    %cst_33 = arith.constant dense<0.000000e+00> : vector<32xf32>
    %45 = vector.multi_reduction <add>, %44, %cst_33 [0, 1] : vector<16x16x32xf32> to vector<32xf32>
    %46 = vector.shape_cast %45 : vector<32xf32> to vector<1x1x32xf32>
    %cst_34 = arith.constant 3.906250e-03 : f32
    %47 = vector.broadcast %cst_34 : f32 to vector<1x1x32xf32>
    %48 = arith.mulf %43, %47 : vector<1x1x32xf32>
    %cst_35 = arith.constant 3.906250e-03 : f32
    %49 = vector.broadcast %cst_35 : f32 to vector<1x1x32xf32>
    %50 = arith.mulf %46, %49 : vector<1x1x32xf32>
    %51 = arith.mulf %48, %48 : vector<1x1x32xf32>
    %52 = arith.subf %50, %51 : vector<1x1x32xf32>
    %53 = vector.broadcast %48 : vector<1x1x32xf32> to vector<16x16x32xf32>
    %54 = arith.subf %41, %53 : vector<16x16x32xf32>
    %cst_36 = arith.constant 9.99999974E-6 : f32
    %55 = vector.broadcast %cst_36 : f32 to vector<1x1x32xf32>
    %56 = arith.addf %52, %55 : vector<1x1x32xf32>
    %57 = math.rsqrt %56 : vector<1x1x32xf32>
    %58 = vector.broadcast %57 : vector<1x1x32xf32> to vector<16x16x32xf32>
    %59 = arith.mulf %54, %58 : vector<16x16x32xf32>
    %60 = vector.broadcast %4 : vector<1x1x32xf32> to vector<16x16x32xf32>
    %61 = arith.mulf %59, %60 : vector<16x16x32xf32>
    %62 = vector.broadcast %6 : vector<1x1x32xf32> to vector<16x16x32xf32>
    %63 = arith.addf %61, %62 : vector<16x16x32xf32>
    %cst_37 = arith.constant 0.000000e+00 : f32
    %64 = vector.broadcast %cst_37 : f32 to vector<16x16x32xf32>
    %65 = arith.maximumf %63, %64 : vector<16x16x32xf32>
    %c1_38 = arith.constant 1 : index
    %c8_39 = arith.constant 8 : index
    %c0_40 = arith.constant 0 : index
    %66 = vector.load %arg6[%c1_38, %c8_39, %c0_40] : memref<18x32x32xf32, #tpu.memory_space<vmem>>, vector<16x16x32xf32>
    tpu.vector_store %arg6[%c1_38, %c8_39, %c0_40], %65 {strides = array<i32>} : memref<18x32x32xf32, #tpu.memory_space<vmem>>, vector<16x16x32xf32>,
    %67 = vector.extract_strided_slice %65 {offsets = [1, 0, 0], sizes = [1, 16, 32], strides = [1, 1, 1]} : vector<16x16x32xf32> to vector<1x16x32xf32>
    %c0_41 = arith.constant 0 : index
    %c8_42 = arith.constant 8 : index
    %c0_43 = arith.constant 0 : index
    %68 = vector.load %arg6[%c0_41, %c8_42, %c0_43] : memref<18x32x32xf32, #tpu.memory_space<vmem>>, vector<1x16x32xf32>
    tpu.vector_store %arg6[%c0_41, %c8_42, %c0_43], %67 {strides = array<i32>} : memref<18x32x32xf32, #tpu.memory_space<vmem>>, vector<1x16x32xf32>,
    %69 = vector.extract_strided_slice %65 {offsets = [14, 0, 0], sizes = [1, 16, 32], strides = [1, 1, 1]} : vector<16x16x32xf32> to vector<1x16x32xf32>
    %c17_44 = arith.constant 17 : index
    %c8_45 = arith.constant 8 : index
    %c0_46 = arith.constant 0 : index
    %70 = vector.load %arg6[%c17_44, %c8_45, %c0_46] : memref<18x32x32xf32, #tpu.memory_space<vmem>>, vector<1x16x32xf32>
    tpu.vector_store %arg6[%c17_44, %c8_45, %c0_46], %69 {strides = array<i32>} : memref<18x32x32xf32, #tpu.memory_space<vmem>>, vector<1x16x32xf32>,
    %c0_47 = arith.constant 0 : index
    %c9_48 = arith.constant 9 : index
    %c0_49 = arith.constant 0 : index
    %71 = vector.load %arg6[%c0_47, %c9_48, %c0_49] : memref<18x32x32xf32, #tpu.memory_space<vmem>>, vector<18x1x32xf32>
    %c0_50 = arith.constant 0 : index
    %c7_51 = arith.constant 7 : index
    %c0_52 = arith.constant 0 : index
    %72 = vector.load %arg6[%c0_50, %c7_51, %c0_52] : memref<18x32x32xf32, #tpu.memory_space<vmem>>, vector<18x1x32xf32>
    tpu.vector_store %arg6[%c0_50, %c7_51, %c0_52], %71 {strides = array<i32>} : memref<18x32x32xf32, #tpu.memory_space<vmem>>, vector<18x1x32xf32>,
    %c0_53 = arith.constant 0 : index
    %c22_54 = arith.constant 22 : index
    %c0_55 = arith.constant 0 : index
    %73 = vector.load %arg6[%c0_53, %c22_54, %c0_55] : memref<18x32x32xf32, #tpu.memory_space<vmem>>, vector<18x1x32xf32>
    %c0_56 = arith.constant 0 : index
    %c24_57 = arith.constant 24 : index
    %c0_58 = arith.constant 0 : index
    %74 = vector.load %arg6[%c0_56, %c24_57, %c0_58] : memref<18x32x32xf32, #tpu.memory_space<vmem>>, vector<18x1x32xf32>
    tpu.vector_store %arg6[%c0_56, %c24_57, %c0_58], %73 {strides = array<i32>} : memref<18x32x32xf32, #tpu.memory_space<vmem>>, vector<18x1x32xf32>,
    %c0_59 = arith.constant 0 : index
    %c0_60 = arith.constant 0 : index
    %c0_61 = arith.constant 0 : index
    %75 = vector.load %arg6[%c0_59, %c0_60, %c0_61] : memref<18x32x32xf32, #tpu.memory_space<vmem>>, vector<18x32x32xf32>
    %c1_i32_62 = arith.constant 1 : i32
    %76 = tpu.dynamic_rotate %75 by %c1_i32_62 dim 1 : vector<18x32x32xf32>, i32 -> vector<18x32x32xf32>
    %c31_i32_63 = arith.constant 31 : i32
    %77 = tpu.dynamic_rotate %75 by %c31_i32_63 dim 1 : vector<18x32x32xf32>, i32 -> vector<18x32x32xf32>
    %78 = tpu.concatenate %76, %75, %77 in 2 : vector<18x32x32xf32>, vector<18x32x32xf32>, vector<18x32x32xf32> -> vector<18x32x96xf32>
    %79 = vector.extract_strided_slice %78 {offsets = [0, 8, 0], sizes = [16, 16, 96], strides = [1, 1, 1]} : vector<18x32x96xf32> to vector<16x16x96xf32>
    %80 = vector.shape_cast %79 : vector<16x16x96xf32> to vector<256x96xf32>
    %c0_64 = arith.constant 0 : index
    %c0_65 = arith.constant 0 : index
    %c0_66 = arith.constant 0 : index
    %81 = vector.load %arg3[%c0_64, %c0_65, %c0_66] : memref<3x96x32xf32, #tpu.memory_space<vmem>>, vector<1x96x32xf32>
    %82 = vector.shape_cast %81 : vector<1x96x32xf32> to vector<96x32xf32>
    %cst_67 = arith.constant dense<0.000000e+00> : vector<256x32xf32>
    %83 = tpu.matmul %80, %82, %cst_67 {dimension_numbers = #tpu.dot_dimension_numbers<[1], [0], [0], [1], [0, 0, 1, 1], [], []>} : vector<256x96xf32>, vector<96x32xf32>, vector<256x32xf32> -> vector<256x32xf32>
    %84 = vector.extract_strided_slice %78 {offsets = [1, 8, 0], sizes = [16, 16, 96], strides = [1, 1, 1]} : vector<18x32x96xf32> to vector<16x16x96xf32>
    %85 = vector.shape_cast %84 : vector<16x16x96xf32> to vector<256x96xf32>
    %c1_68 = arith.constant 1 : index
    %c0_69 = arith.constant 0 : index
    %c0_70 = arith.constant 0 : index
    %86 = vector.load %arg3[%c1_68, %c0_69, %c0_70] : memref<3x96x32xf32, #tpu.memory_space<vmem>>, vector<1x96x32xf32>
    %87 = vector.shape_cast %86 : vector<1x96x32xf32> to vector<96x32xf32>
    %cst_71 = arith.constant dense<0.000000e+00> : vector<256x32xf32>
    %88 = tpu.matmul %85, %87, %cst_71 {dimension_numbers = #tpu.dot_dimension_numbers<[1], [0], [0], [1], [0, 0, 1, 1], [], []>} : vector<256x96xf32>, vector<96x32xf32>, vector<256x32xf32> -> vector<256x32xf32>
    %89 = arith.addf %83, %88 : vector<256x32xf32>
    %90 = vector.extract_strided_slice %78 {offsets = [2, 8, 0], sizes = [16, 16, 96], strides = [1, 1, 1]} : vector<18x32x96xf32> to vector<16x16x96xf32>
    %91 = vector.shape_cast %90 : vector<16x16x96xf32> to vector<256x96xf32>
    %c2_72 = arith.constant 2 : index
    %c0_73 = arith.constant 0 : index
    %c0_74 = arith.constant 0 : index
    %92 = vector.load %arg3[%c2_72, %c0_73, %c0_74] : memref<3x96x32xf32, #tpu.memory_space<vmem>>, vector<1x96x32xf32>
    %93 = vector.shape_cast %92 : vector<1x96x32xf32> to vector<96x32xf32>
    %cst_75 = arith.constant dense<0.000000e+00> : vector<256x32xf32>
    %94 = tpu.matmul %91, %93, %cst_75 {dimension_numbers = #tpu.dot_dimension_numbers<[1], [0], [0], [1], [0, 0, 1, 1], [], []>} : vector<256x96xf32>, vector<96x32xf32>, vector<256x32xf32> -> vector<256x32xf32>
    %95 = arith.addf %89, %94 : vector<256x32xf32>
    %96 = vector.shape_cast %95 : vector<256x32xf32> to vector<16x16x32xf32>
    %cst_76 = arith.constant dense<0.000000e+00> : vector<32xf32>
    %97 = vector.multi_reduction <add>, %96, %cst_76 [0, 1] : vector<16x16x32xf32> to vector<32xf32>
    %98 = vector.shape_cast %97 : vector<32xf32> to vector<1x1x32xf32>
    %99 = arith.mulf %96, %96 : vector<16x16x32xf32>
    %cst_77 = arith.constant dense<0.000000e+00> : vector<32xf32>
    %100 = vector.multi_reduction <add>, %99, %cst_77 [0, 1] : vector<16x16x32xf32> to vector<32xf32>
    %101 = vector.shape_cast %100 : vector<32xf32> to vector<1x1x32xf32>
    %cst_78 = arith.constant 3.906250e-03 : f32
    %102 = vector.broadcast %cst_78 : f32 to vector<1x1x32xf32>
    %103 = arith.mulf %98, %102 : vector<1x1x32xf32>
    %cst_79 = arith.constant 3.906250e-03 : f32
    %104 = vector.broadcast %cst_79 : f32 to vector<1x1x32xf32>
    %105 = arith.mulf %101, %104 : vector<1x1x32xf32>
    %106 = arith.mulf %103, %103 : vector<1x1x32xf32>
    %107 = arith.subf %105, %106 : vector<1x1x32xf32>
    %108 = vector.broadcast %103 : vector<1x1x32xf32> to vector<16x16x32xf32>
    %109 = arith.subf %96, %108 : vector<16x16x32xf32>
    %cst_80 = arith.constant 9.99999974E-6 : f32
    %110 = vector.broadcast %cst_80 : f32 to vector<1x1x32xf32>
    %111 = arith.addf %107, %110 : vector<1x1x32xf32>
    %112 = math.rsqrt %111 : vector<1x1x32xf32>
    %113 = vector.broadcast %112 : vector<1x1x32xf32> to vector<16x16x32xf32>
    %114 = arith.mulf %109, %113 : vector<16x16x32xf32>
    %115 = vector.broadcast %8 : vector<1x1x32xf32> to vector<16x16x32xf32>
    %116 = arith.mulf %114, %115 : vector<16x16x32xf32>
    %117 = vector.broadcast %10 : vector<1x1x32xf32> to vector<16x16x32xf32>
    %118 = arith.addf %116, %117 : vector<16x16x32xf32>
    %119 = arith.addf %118, %1 : vector<16x16x32xf32>
    %c0_81 = arith.constant 0 : index
    %c0_82 = arith.constant 0 : index
    %c0_83 = arith.constant 0 : index
    %c0_84 = arith.constant 0 : index
    %120 = vector.load %arg5[%c0_81, %c0_82, %c0_83, %c0_84] : memref<1x16x16x32xf32, #tpu.memory_space<vmem>>, vector<1x16x16x32xf32>
    %121 = vector.shape_cast %120 : vector<1x16x16x32xf32> to vector<16x16x32xf32>
    %122 = vector.shape_cast %119 : vector<16x16x32xf32> to vector<1x16x16x32xf32>
    tpu.vector_store %arg5[%c0_81, %c0_82, %c0_83, %c0_84], %122 {strides = array<i32>} : memref<1x16x16x32xf32, #tpu.memory_space<vmem>>, vector<1x16x16x32xf32>,
    return
  }
  func.func @transform_0(%arg0: i32) -> (i32, i32, i32, i32) {
    %c0_i32 = arith.constant 0 : i32
    %c0_i32_0 = arith.constant 0 : i32
    %c0_i32_1 = arith.constant 0 : i32
    %c0_i32_2 = arith.constant 0 : i32
    return %arg0, %c0_i32, %c0_i32_0, %c0_i32_1 : i32, i32, i32, i32
  }
  func.func @transform_1(%arg0: i32) -> (i32, i32, i32) {
    %c0_i32 = arith.constant 0 : i32
    %c0_i32_0 = arith.constant 0 : i32
    %c0_i32_1 = arith.constant 0 : i32
    %c0_i32_2 = arith.constant 0 : i32
    return %c0_i32, %c0_i32_0, %c0_i32_1 : i32, i32, i32
  }
  func.func @transform_2(%arg0: i32) -> (i32, i32, i32) {
    %c0_i32 = arith.constant 0 : i32
    %c0_i32_0 = arith.constant 0 : i32
    %c0_i32_1 = arith.constant 0 : i32
    %c0_i32_2 = arith.constant 0 : i32
    return %c0_i32, %c0_i32_0, %c0_i32_1 : i32, i32, i32
  }
  func.func @transform_3(%arg0: i32) -> (i32, i32) {
    %c0_i32 = arith.constant 0 : i32
    %c0_i32_0 = arith.constant 0 : i32
    %c0_i32_1 = arith.constant 0 : i32
    return %c0_i32, %c0_i32_0 : i32, i32
  }
  func.func @transform_4(%arg0: i32) -> (i32, i32, i32, i32) {
    %c0_i32 = arith.constant 0 : i32
    %c0_i32_0 = arith.constant 0 : i32
    %c0_i32_1 = arith.constant 0 : i32
    %c0_i32_2 = arith.constant 0 : i32
    return %arg0, %c0_i32, %c0_i32_0, %c0_i32_1 : i32, i32, i32, i32
  }
}

</mosaic_0001>

<bundles_post_ra>
// kernel: tpu_custom_call.1
= control target key start
LH: loop header
LB: loop body
LE: loop exit
PB: predicated region body
PF: predicated region fallthrough
CT: control target
= control target key end

     0   :  { %9 = vsyncpa [#allocation4], 0  ;;  %s8854_s0 = inlined_call_operand.vmem [shape: f32[2,16,16,32], index: 0, kind: input, shape index: {}]   ;;  %s8855_s1 = inlined_call_operand.vmem [shape: f32[3,96,32], index: 1, kind: input, shape index: {}]   ;;  %s8856_s2 = inlined_call_operand.vmem [shape: f32[3,96,32], index: 2, kind: input, shape index: {}]   ;;  %s8857_s3 = inlined_call_operand.vmem [shape: f32[4,32], index: 3, kind: input, shape index: {}]   ;;  %s8858_s4 = inlined_call_operand.hbm [shape: f32[2,16,16,32], index: 4, kind: output, shape index: {}]  }
   0x1   :  { %11 = vsyncpa [#allocation4 + $0x1], 0  ;;  %s5545_s15 = smov 0   ;;  %s5547_s16 = smov 0  }
   0x2   :  { %s5549_s17 = smov 0   ;;  %s5551_s18 = smov 0  }
   0x3 LB: > { %s5566_s19 = sadd.s32 4294967295, %s5513_s18   ;;  %s4181_s20 = sadd.s32 4294967294, %s5513_s18   ;;  %s5513_s18 = sphi %s5551_s18, %s9083_s18   ;;  %s5509_s17 = sphi %s5549_s17, %s9082_s17   ;;  %s5505_s16 = sphi %s5547_s16, %s9081_s16   ;;  %s5501_s15 = sphi %s5545_s15, %s9080_s15  }
   0x4   : > { %s5570_s21 = sadd.s32 1, %s5513_s18   ;;  %s113_s22 = sadd.s32 1, %s5509_s17 }
   0x5   : > { %s110_s23 = ssub.s32 %s5513_s18, %s5570_s21  ;;  %p123_p0 = scmp.ne.s32.totalorder %s5509_s17, %s5505_s16 }
   0x6   : > { %p111_p1 = scmp.eq.s32.totalorder %s110_s23, 0  ;;  %p124_p2 = scmp.eq.s32.totalorder %s5566_s19, 1 }
   0x7   : > { %p129_p3 = scmp.ne.s32.totalorder %s5505_s16, %s5501_s15  ;;  %p130_p4 = scmp.eq.s32.totalorder %s4181_s20, 1 }
   0x8   : > { %s5581_s24 = scalar_select %p111_p1, %s5509_s17, %s113_s22  }
   0x9   : > { %p5583_p5 = por %p124_p2, %p123_p0  ;;  %p5587_p6 = por %p130_p4, %p129_p3 }
   0xa   : > { %p4184_p7 = scmp.ge.s32.totalorder %s5513_s18, 1  ;;  %p165_p8 = scmp.lt.s32.totalorder %s5513_s18, 3 }
   0xc   : > { %p166_p9 = pnand %p4184_p7, %p165_p8 }
   0xe   : > { %169 = sbr.rel (%p166_p9) target bundleno = 1378 (0x562), region = 36 }
  0x15   : > { %p191_p10 = scmp.lt.s32.totalorder %s5566_s19, 1  ;;  %v4188_v0 = vld [vmem:[%s8855_s1 + $0x60] sm:$0xff]  ;;  %v4189_v1 = vld [vmem:[%s8855_s1 + $0x68] sm:$0xff]  ;;  %v4190_v3 = vld [vmem:[%s8855_s1 + $0x70] sm:$0xff]  ;;  %vm230_vm0 = vcmask 261120   ;;  %v467_v20 = vlaneseq  ;;  %s5515_s5 = smov 32  }
  0x16   : > { %v5131_v2 = vpack.c.bf16 %v4189_v1, %v4188_v0  ;;  %v4191_v4 = vld [vmem:[%s8855_s1 + $0x78] sm:$0xff]  ;;  %v4192_v6 = vld [vmem:[%s8855_s1 + $0x80] sm:$0xff]  ;;  %v4193_v7 = vld [vmem:[%s8855_s1 + $0x88] sm:$0xff]  ;;  %vm286_vm1 = vcmask 253952   ;;  %s5516_s6 = smov 64   ;;  %vm921_vm4 = vcmask 523264  }
  0x17   : > { %s192_s9 = scalar_select %p191_p10, %s5566_s19, 1  ;;  %v5135_v5 = vpack.c.bf16 %v4191_v4, %v4190_v3  ;;  %v5139_v8 = vpack.c.bf16 %v4193_v7, %v4192_v6  ;;  %v4194_v9 = vld [vmem:[%s8855_s1 + $0x90] sm:$0xff]  ;;  %v4195_v10 = vld [vmem:[%s8855_s1 + $0x98] sm:$0xff]  ;;  %v5727_v34 = vshrl.u32 %v467_v20, 7  ;;  %vm983_vm5 = vcmask 785408  }
  0x18   : > { %5132 = vmatprep.subr.bf16.mxu0 %v5131_v2  ;;  %v5143_v24 = vpack.c.bf16 %v4195_v10, %v4194_v9  ;;  %s188_s13 = sand.u32 1, %s5505_s16   ;;  %s4434_s22 = sshll.u32 %s5566_s19, 12 }
  0x19   : > { %s4433_s14 = sshll.u32 %s192_s9, 8  ;;  %5134 = vmatpush3.bf16.msra.mxu0 %v5131_v2  ;;  %vm560_vm2 = vcmp.lt.s32.totalorder %v5727_v34, 7  ;;  %vm469_vm3 = vcmp.lt.s32.totalorder %v5727_v34, 1  ;;  %s8813_s27 = scalar_lea.sflag [#allocation4], %s188_s13 }
  0x1a   : > { %s5616_s23 = scalar_lea.vmem %s8854_s0, %s4433_s14  ;;  %5136 = vmatprep.subr.bf16.mxu0 %v5135_v5  ;;  %s4185_s14 = sshll.u32 %s188_s13, 8 }
  0x1b   : > { %v5625_v11 = vld [vmem:[%s5616_s23 + $0x18] sm:$0xff]  ;;  %v5628_v12 = vld [vmem:[%s5616_s23] sm:$0xff]  ;;  %v5631_v13 = vld [vmem:[%s5616_s23 + $0x28] sm:$0xff]  ;;  %s8643_s20 = scalar_lea.vmem [#allocation3], %s4185_s14  ;;  %s5517_s29 = smov [#allocation3]  }
  0x1c   : > { %8906 = vst [vmem:[#allocation6_spill] sm:$0xff] %v5625_v11  ;;  %8907 = vst [vmem:[#allocation7_spill] sm:$0xff] %v5628_v12  ;;  %v5642_v14 = vld [vmem:[%s5616_s23 + $0x8] sm:$0xff]  ;;  %v5645_v15 = vld [vmem:[%s5616_s23 + $0x10] sm:$0xff]  ;;  %s5455_s30 = sshll.u32 %s5517_s29, 4  ;;  %s5456_s30 = int_to_ptr.vmem [resolvable:$false] %s5455_s30 }
  0x1d   : > { %8908 = vst [vmem:[#allocation8_spill] sm:$0xff] %v5631_v13  ;;  %234 = vst.msk [vmem:[#allocation2 + $0x50] sm:$0xff] %vm230_vm0, %v5625_v11  ;;  %v5648_v16 = vld [vmem:[%s5616_s23 + $0x20] sm:$0xff]  ;;  %v5659_v17 = vld [vmem:[%s5616_s23 + $0x38] sm:$0xff]  ;;  %5138 = vmatpush3.bf16.msra.mxu0 %v5135_v5  ;;  %s5457_s7 = scalar_lea.vmem %s5456_s30, 8192 }
  0x1e   : > { %264 = vst.msk [vmem:[#allocation2 + $0x10] sm:$0xff] %vm230_vm0, %v5625_v11  ;;  %231 = vst.msk [vmem:[#allocation2 + $0x28] sm:$0xff] %vm230_vm0, %v5628_v12  ;;  %v5662_v18 = vld [vmem:[%s5616_s23 + $0x30] sm:$0xff]  ;;  %v5665_v19 = vld [vmem:[%s5616_s23 + $0x40] sm:$0xff]  ;;  %5140 = vmatprep.subr.bf16.mxu0 %v5139_v8 }
  0x1f   : > { %236 = vst.msk [vmem:[#allocation2 + $0x70] sm:$0xff] %vm230_vm0, %v5631_v13  ;;  %8909 = vst [vmem:[#allocation9_spill] sm:$0xff] %v5642_v14  ;;  %v5674_v21 = vld [vmem:[%s5616_s23 + $0x48] sm:$0xff]  ;;  %v5677_v22 = vld [vmem:[%s5616_s23 + $0x50] sm:$0xff] }
  0x20   : > { %8910 = vst [vmem:[#allocation10_spill] sm:$0xff] %v5645_v15  ;;  %8911 = vst [vmem:[#allocation11_spill] sm:$0xff] %v5648_v16  ;;  %v5680_v23 = vld [vmem:[%s5616_s23 + $0x58] sm:$0xff]  ;;  %v5689_v25 = vld [vmem:[%s5616_s23 + $0x60] sm:$0xff] }
  0x21   : > { %232 = vst.msk [vmem:[#allocation2 + $0x30] sm:$0xff] %vm230_vm0, %v5642_v14  ;;  %233 = vst.msk [vmem:[#allocation2 + $0x48] sm:$0xff] %vm230_vm0, %v5645_v15  ;;  %v5692_v26 = vld [vmem:[%s5616_s23 + $0x68] sm:$0xff]  ;;  %v5695_v27 = vld [vmem:[%s5616_s23 + $0x70] sm:$0xff]  ;;  %5142 = vmatpush3.bf16.msra.mxu0 %v5139_v8 }
  0x22   : > { %263 = vst.msk [vmem:[#allocation2 + $0x8] sm:$0xff] %vm230_vm0, %v5645_v15  ;;  %235 = vst.msk [vmem:[#allocation2 + $0x68] sm:$0xff] %vm230_vm0, %v5648_v16  ;;  %v5704_v28 = vld [vmem:[%s5616_s23 + $0x78] sm:$0xff]  ;;  %v5707_v29 = vld [vmem:[%s5616_s23 + $0x80] sm:$0xff]  ;;  %5144 = vmatprep.subr.bf16.mxu0 %v5143_v24 }
  0x23   : > { %8912 = vst [vmem:[#allocation12_spill] sm:$0xff] %v5659_v17  ;;  %8913 = vst [vmem:[#allocation13_spill] sm:$0xff] %v5662_v18  ;;  %v5710_v30 = vld [vmem:[%s5616_s23 + $0x88] sm:$0xff]  ;;  %v5719_v31 = vld [vmem:[%s5616_s23 + $0x90] sm:$0xff] }
  0x24   : > { %8914 = vst [vmem:[#allocation14_spill] sm:$0xff] %v5665_v19  ;;  %238 = vst.msk [vmem:[#allocation2 + $0x90] sm:$0xff] %vm230_vm0, %v5659_v17  ;;  %v5722_v32 = vld [vmem:[%s5616_s23 + $0x98] sm:$0xff]  ;;  %v5725_v33 = vld [vmem:[%s5616_s23 + $0xa0] sm:$0xff] }
  0x25   : > { %237 = vst.msk [vmem:[#allocation2 + $0x88] sm:$0xff] %vm230_vm0, %v5662_v18  ;;  %239 = vst.msk [vmem:[#allocation2 + $0xa8] sm:$0xff] %vm230_vm0, %v5665_v19  ;;  %v5736_v35 = vld [vmem:[%s5616_s23 + $0xa8] sm:$0xff]  ;;  %v5739_v36 = vld [vmem:[%s5616_s23 + $0xb0] sm:$0xff]  ;;  %5146 = vmatpush3.bf16.msra.mxu0 %v5143_v24 }
  0x26   : > { %8915 = vst [vmem:[#allocation15_spill] sm:$0xff] %v5674_v21  ;;  %8916 = vst [vmem:[#allocation16_spill] sm:$0xff] %v5677_v22  ;;  %v5742_v37 = vld [vmem:[%s5616_s23 + $0xb8] sm:$0xff]  ;;  %v5744_v38 = vld [vmem:[#allocation2 + $0x50] sm:$0xff] }
  0x27   : > { %8917 = vst [vmem:[#allocation17_spill] sm:$0xff] %v5680_v23  ;;  %240 = vst.msk [vmem:[#allocation2 + $0xb0] sm:$0xff] %vm230_vm0, %v5674_v21  ;;  %v5746_v39 = vld [vmem:[#allocation2 + $0x28] sm:$0xff]  ;;  %643 = vrot.lane.b32.xlu1 %v5744_v38, %s5515_s5  ;;  %v5760_v41 = vld [vmem:[#allocation2 + $0x70] sm:$0xff]  ;;  %v526_v56 = vrot.slane %v5744_v38, 1 }
  0x28   : > { %241 = vst.msk [vmem:[#allocation2 + $0xc8] sm:$0xff] %vm230_vm0, %v5677_v22  ;;  %242 = vst.msk [vmem:[#allocation2 + $0xd0] sm:$0xff] %vm230_vm0, %v5680_v23  ;;  %637 = vrot.lane.b32.xlu0 %v5746_v39, %s5515_s5  ;;  %v5758_v40 = vld [vmem:[#allocation2 + $0x30] sm:$0xff]  ;;  %v507_v42 = vrot.slane %v5746_v39, 1  ;;  %v5772_v48 = vld [vmem:[#allocation2 + $0x48] sm:$0xff]  ;;  %v527_v1 = vrot.slane %v5760_v41, 1 }
  0x29   : > { %8918 = vst [vmem:[#allocation18_spill] sm:$0xff] %v5689_v25  ;;  %8919 = vst [vmem:[#allocation19_spill] sm:$0xff] %v5692_v26  ;;  %v525_v43 = vrot.slane %v5758_v40, 1  ;;  %v306_v44 = vld [vmem:[#allocation2 + $0x36] sm:$0x1]  ;;  %v5782_v53 = vld [vmem:[#allocation2 + $0x68] sm:$0xff] }
  0x2a   : > { %8920 = vst [vmem:[#allocation20_spill] sm:$0xff] %v5695_v27  ;;  %243 = vst.msk [vmem:[#allocation2 + $0xe8] sm:$0xff] %vm230_vm0, %v5689_v25  ;;  %v307_v45 = vld [vmem:[#allocation2 + $0x56] sm:$0x1]  ;;  %v508_v55 = vrot.slane %v5772_v48, 1  ;;  %v509_v61 = vrot.slane %v5782_v53, 1 }
  0x2b   : > { %244 = vst.msk [vmem:[#allocation2 + $0xf0] sm:$0xff] %vm230_vm0, %v5692_v26  ;;  %245 = vst.msk [vmem:[#allocation2 + $0x108] sm:$0xff] %vm230_vm0, %v5695_v27  ;;  %v308_v46 = vld [vmem:[#allocation2 + $0x76] sm:$0x1]  ;;  %647 = vrot.lane.b32.xlu1 %v5760_v41, %s5515_s5  ;;  %v580_v49 = vsel %vm560_vm2, %v507_v42, %v525_v43  ;;  %v5808_v7 = vld [vmem:[%s5616_s23 + $0xc0] sm:$0xff]  ;;  %v450_v23 = vrot.slane %v5758_v40, 7 }
  0x2c   : > { %8921 = vst [vmem:[#allocation21_spill] sm:$0xff] %v5704_v28  ;;  %8922 = vst [vmem:[#allocation22_spill] sm:$0xff] %v5707_v29  ;;  %639 = vrot.lane.b32.xlu0 %v5758_v40, %s5515_s5  ;;  %v309_v47 = vld [vmem:[#allocation2 + $0x96] sm:$0x1]  ;;  %v581_v63 = vsel %vm560_vm2, %v508_v55, %v526_v56  ;;  %v5804_v6 = vld [vmem:[#allocation2 + $0x88] sm:$0xff]  ;;  %v582_v8 = vsel %vm560_vm2, %v509_v61, %v527_v1  ;;  %v451_v40 = vrot.slane %v5744_v38, 7 }
  0x2d   : > { %8923 = vst [vmem:[#allocation23_spill] sm:$0xff] %v5710_v30  ;;  %246 = vst.msk [vmem:[#allocation2 + $0x110] sm:$0xff] %vm230_vm0, %v5704_v28  ;;  %v5784_v54 = vld [vmem:[#allocation2 + $0x90] sm:$0xff]  ;;  %v5817_v42 = vld [vmem:[%s5616_s23 + $0xc8] sm:$0xff]  ;;  %v510_v55 = vrot.slane %v5804_v6, 1 }
  0x2e   : > { %247 = vst.msk [vmem:[#allocation2 + $0x128] sm:$0xff] %vm230_vm0, %v5707_v29  ;;  %248 = vst.msk [vmem:[#allocation2 + $0x130] sm:$0xff] %vm230_vm0, %v5710_v30  ;;  %v310_v50 = vld [vmem:[#allocation2 + $0xb6] sm:$0x1]  ;;  %v271_v61 = vld [vmem:[#allocation2 + $0x69] sm:$0x1] }
  0x2f   : > { %8924 = vst [vmem:[#allocation24_spill] sm:$0xff] %v5719_v31  ;;  %8925 = vst [vmem:[#allocation25_spill] sm:$0xff] %v5722_v32  ;;  %v311_v51 = vld [vmem:[#allocation2 + $0xd6] sm:$0x1]  ;;  %781 = vrot.lane.b32.xlu1 %v580_v49, %s5516_s6  ;;  %v961_v38 = vld [vmem:[%s8855_s1 + $0x18] sm:$0xff] }
  0x30   : > { %8926 = vst [vmem:[#allocation26_spill] sm:$0xff] %v5725_v33  ;;  %249 = vst.msk [vmem:[#allocation2 + $0x148] sm:$0xff] %vm230_vm0, %v5719_v31  ;;  %641 = vrot.lane.b32.xlu0 %v5772_v48, %s5515_s5  ;;  %v5843_v49 = vld [vmem:[%s5616_s23 + $0xf0] sm:$0xff] }
  0x31   : > { %250 = vst.msk [vmem:[#allocation2 + $0x150] sm:$0xff] %vm230_vm0, %v5722_v32  ;;  %251 = vst.msk [vmem:[#allocation2 + $0x168] sm:$0xff] %vm230_vm0, %v5725_v33  ;;  %v432_v32 = vrot.slane %v5746_v39, 7  ;;  %v6116_v26 = vld [vmem:[#allocation2 + $0x10] sm:$0xff] }
  0x32   : > { %8927 = vst [vmem:[#allocation27_spill] sm:$0xff] %v5736_v35  ;;  %8928 = vst [vmem:[#allocation28_spill] sm:$0xff] %v5739_v36  ;;  %v312_v52 = vld [vmem:[#allocation2 + $0xf6] sm:$0x1] }
  0x33   : > { %8929 = vst [vmem:[#allocation29_spill] sm:$0xff] %v5742_v37  ;;  %252 = vst.msk [vmem:[#allocation2 + $0x170] sm:$0xff] %vm230_vm0, %v5736_v35  ;;  %651 = vrot.lane.b32.xlu1 %v5784_v54, %s5515_s5 }
  0x34   : > { %253 = vst.msk [vmem:[#allocation2 + $0x188] sm:$0xff] %vm230_vm0, %v5739_v36  ;;  %254 = vst.msk [vmem:[#allocation2 + $0x190] sm:$0xff] %vm230_vm0, %v5742_v37  ;;  %v313_v57 = vld [vmem:[#allocation2 + $0x116] sm:$0x1]  ;;  %645 = vrot.lane.b32.xlu0 %v5782_v53, %s5515_s5 }
  0x35   : > { %324 = vst.msk [vmem:[#allocation2 + $0x38] sm:$0x1] %vm286_vm1, %v306_v44  ;;  %325 = vst.msk [vmem:[#allocation2 + $0x58] sm:$0x1] %vm286_vm1, %v307_v45  ;;  %v314_v62 = vld [vmem:[#allocation2 + $0x136] sm:$0x1] }
  0x36   : > { %326 = vst.msk [vmem:[#allocation2 + $0x78] sm:$0x1] %vm286_vm1, %v308_v46  ;;  %327 = vst.msk [vmem:[#allocation2 + $0x98] sm:$0x1] %vm286_vm1, %v309_v47  ;;  %v5826_v44 = vld [vmem:[%s5616_s23 + $0xd8] sm:$0xff]  ;;  %v5829_v45 = vld [vmem:[%s5616_s23 + $0xe0] sm:$0xff] }
  0x37   : > { %328 = vst.msk [vmem:[#allocation2 + $0xb8] sm:$0x1] %vm286_vm1, %v310_v50  ;;  %329 = vst.msk [vmem:[#allocation2 + $0xd8] sm:$0x1] %vm286_vm1, %v311_v51  ;;  %v5840_v46 = vld [vmem:[%s5616_s23 + $0xe8] sm:$0xff]  ;;  %v5855_v50 = vld [vmem:[%s5616_s23 + $0xf8] sm:$0xff] }
  0x38   : > { %330 = vst.msk [vmem:[#allocation2 + $0xf8] sm:$0x1] %vm286_vm1, %v312_v52  ;;  %331 = vst.msk [vmem:[#allocation2 + $0x118] sm:$0x1] %vm286_vm1, %v313_v57  ;;  %v315_v3 = vld [vmem:[#allocation2 + $0x156] sm:$0x1]  ;;  %785 = vrot.lane.b32.xlu0 %v581_v63, %s5516_s6 }
  0x39   : > { %332 = vst.msk [vmem:[#allocation2 + $0x138] sm:$0x1] %vm286_vm1, %v314_v62  ;;  %333 = vst.msk [vmem:[#allocation2 + $0x158] sm:$0x1] %vm286_vm1, %v315_v3  ;;  %v269_v47 = vld [vmem:[#allocation2 + $0x29] sm:$0x1] }
  0x3a   : > { %v316_v5 = vld [vmem:[#allocation2 + $0x176] sm:$0x1]  ;;  %8930 = vst [vmem:[#allocation30_spill] sm:$0xff] %v5808_v7  ;;  %255 = vst.msk [vmem:[#allocation2 + $0x1a8] sm:$0xff] %vm230_vm0, %v5808_v7  ;;  %v270_v51 = vld [vmem:[#allocation2 + $0x49] sm:$0x1] }
  0x3b   : > { %334 = vst.msk [vmem:[#allocation2 + $0x178] sm:$0x1] %vm286_vm1, %v316_v5  ;;  %v317_v24 = vld [vmem:[#allocation2 + $0x196] sm:$0x1]  ;;  %8931 = vst [vmem:[#allocation31_spill] sm:$0xff] %v5817_v42  ;;  %v4199_v63 = vld [vmem:[%s8855_s1 + $0xb8] sm:$0xff] }
  0x3c   : > { %v348_v58 = vld [vmem:[#allocation2 + $0x38] sm:$0xff]  ;;  %335 = vst.msk [vmem:[#allocation2 + $0x198] sm:$0x1] %vm286_vm1, %v317_v24  ;;  %8933 = vst [vmem:[#allocation33_spill] sm:$0xff] %v5826_v44  ;;  %789 = vrot.lane.b32.xlu0 %v582_v8, %s5516_s6  ;;  %v4198_v62 = vld [vmem:[%s8855_s1 + $0xb0] sm:$0xff] }
  0x3d   : > { %v543_v59 = vrot.slane %v348_v58, 1  ;;  %v352_v60 = vld [vmem:[#allocation2 + $0x58] sm:$0xff]  ;;  %256 = vst.msk [vmem:[#allocation2 + $0x1b0] sm:$0xff] %vm230_vm0, %v5817_v42  ;;  %8934 = vst [vmem:[#allocation34_spill] sm:$0xff] %v5829_v45  ;;  %v4196_v58 = vld [vmem:[%s8855_s1 + $0xa0] sm:$0xff] }
  0x3e   : > { %v544_v2 = vrot.slane %v352_v60, 1  ;;  %v356_v4 = vld [vmem:[#allocation2 + $0x78] sm:$0xff]  ;;  %258 = vst.msk [vmem:[#allocation2 + $0x1d0] sm:$0xff] %vm230_vm0, %v5826_v44  ;;  %259 = vst.msk [vmem:[#allocation2 + $0x1e8] sm:$0xff] %vm230_vm0, %v5829_v45  ;;  %v5885_v5 = vld [vmem:[#allocation2 + $0xa8] sm:$0xff] }
  0x3f   : > { %v562_v0 = vsel %vm560_vm2, %v525_v43, %v543_v59  ;;  %v545_v10 = vrot.slane %v356_v4, 1  ;;  %v360_v20 = vld [vmem:[#allocation2 + $0x98] sm:$0xff]  ;;  %v5823_v43 = vld [vmem:[%s5616_s23 + $0xd0] sm:$0xff]  ;;  %266 = vst.msk [vmem:[#allocation2 + $0x228] sm:$0xff] %vm230_vm0, %v5829_v45  ;;  %8935 = vst [vmem:[#allocation35_spill] sm:$0xff] %v5840_v46  ;;  %v511_v24 = vrot.slane %v5885_v5, 1 }
  0x40   : > { %783 = vrot.lane.b32.xlu1 %v562_v0, %s5516_s6  ;;  %v563_v9 = vsel %vm560_vm2, %v526_v56, %v544_v2  ;;  %8932 = vst [vmem:[#allocation32_spill] sm:$0xff] %v5823_v43  ;;  %257 = vst.msk [vmem:[#allocation2 + $0x1c8] sm:$0xff] %vm230_vm0, %v5823_v43  ;;  %v528_v56 = vrot.slane %v5784_v54, 1  ;;  %v546_v57 = vrot.slane %v360_v20, 1  ;;  %v4197_v59 = vld [vmem:[%s8855_s1 + $0xa8] sm:$0xff]  ;;  %v5151_v0 = vpack.c.bf16 %v4199_v63, %v4198_v62  ;;  %v5887_v8 = vld [vmem:[#allocation2 + $0xb0] sm:$0xff] }
  0x41   : > { %8936 = vst [vmem:[#allocation36_spill] sm:$0xff] %v5843_v49  ;;  %260 = vst.msk [vmem:[#allocation2 + $0x1f0] sm:$0xff] %vm230_vm0, %v5840_v46  ;;  %v564_v52 = vsel %vm560_vm2, %v527_v1, %v545_v10  ;;  %v5147_v60 = vpack.c.bf16 %v4197_v59, %v4196_v58  ;;  %649 = vrot.lane.b32.xlu0 %v5804_v6, %s5515_s5  ;;  %v305_v1 = vld [vmem:[#allocation2 + $0x16] sm:$0x1]  ;;  %v5906_v59 = vld [vmem:[#allocation2 + $0xc8] sm:$0xff]  ;;  %s4119_s23 = sshll.u32 %s8643_s20, 4  ;;  %s8781_s23 = int_to_ptr.vmem [resolvable:$true] %s4119_s23 }
  0x42   : > { %267 = vst.msk [vmem:[#allocation2 + $0x230] sm:$0xff] %vm230_vm0, %v5840_v46  ;;  %261 = vst.msk [vmem:[#allocation2 + $0x208] sm:$0xff] %vm230_vm0, %v5843_v49  ;;  %v583_v2 = vsel %vm560_vm2, %v510_v55, %v528_v56  ;;  %v565_v3 = vsel %vm560_vm2, %v528_v56, %v546_v57  ;;  %v272_v55 = vld [vmem:[#allocation2 + $0x89] sm:$0x1]  ;;  %v5909_v62 = vld [vmem:[#allocation2 + $0xd0] sm:$0xff]  ;;  %s5451_s28 = scalar_lea.vmem %s8781_s23, 4096  ;;  %p5458_p0 = scmp.lt.s32.totalorder %s8781_s23, %s5456_s30 }
  0x43   : > { %288 = vst.msk [vmem:[#allocation2 + $0x27] sm:$0x1] %vm286_vm1, %v269_v47  ;;  %8937 = vst [vmem:[#allocation37_spill] sm:$0xff] %v5855_v50  ;;  %5148 = vmatprep.subr.bf16.mxu0 %v5147_v60  ;;  %v529_v47 = vrot.slane %v5887_v8, 1  ;;  %v273_v56 = vld [vmem:[#allocation2 + $0xa9] sm:$0x1]  ;;  %p5452_p11 = scmp.ne.s32.totalorder %s8781_s23, %s5451_s28  ;;  %p5459_p1 = scmp.lt.s32.totalorder %s5457_s7, %s5451_s28 }
  0x44   : > { %787 = vrot.lane.b32.xlu1 %v563_v9, %s5516_s6  ;;  %262 = vst.msk [vmem:[#allocation2 + $0x210] sm:$0xff] %vm230_vm0, %v5855_v50  ;;  %v318_v4 = vld [vmem:[#allocation2 + $0x1b6] sm:$0x1]  ;;  %v364_v9 = vld [vmem:[#allocation2 + $0xb8] sm:$0xff]  ;;  %5150 = vmatpush3.bf16.msra.mxu0 %v5147_v60  ;;  %v274_v60 = vld [vmem:[#allocation2 + $0xc9] sm:$0x1] }
  0x45   : > { %289 = vst.msk [vmem:[#allocation2 + $0x47] sm:$0x1] %vm286_vm1, %v270_v51  ;;  %290 = vst.msk [vmem:[#allocation2 + $0x67] sm:$0x1] %vm286_vm1, %v271_v61  ;;  %v319_v10 = vld [vmem:[#allocation2 + $0x1d6] sm:$0x1]  ;;  %5152 = vmatprep.subr.bf16.mxu0 %v5151_v0  ;;  %793 = vrot.lane.b32.xlu0 %v583_v2, %s5516_s6  ;;  %v584_v57 = vsel %vm560_vm2, %v511_v24, %v529_v47  ;;  %p5453_p12 = pnand %p5452_p11, %p5583_p5  ;;  %p5460_p2 = por %p5459_p1, %p5458_p0 }
  0x46   : > { %323 = vst.msk [vmem:[#allocation2 + $0x18] sm:$0x1] %vm286_vm1, %v305_v1  ;;  %336 = vst.msk [vmem:[#allocation2 + $0x1b8] sm:$0x1] %vm286_vm1, %v318_v4  ;;  %v547_v51 = vrot.slane %v364_v9, 1  ;;  %v368_v63 = vld [vmem:[#allocation2 + $0xd8] sm:$0xff] }
  0x47   : > { %337 = vst.msk [vmem:[#allocation2 + $0x1d8] sm:$0x1] %vm286_vm1, %v319_v10  ;;  %291 = vst.msk [vmem:[#allocation2 + $0x87] sm:$0x1] %vm286_vm1, %v272_v55  ;;  %v275_v61 = vld [vmem:[#allocation2 + $0xe9] sm:$0x1]  ;;  %p5454_p13 = pneg %p5453_p12 }
  0x48   : > { %791 = vrot.lane.b32.xlu1 %v564_v52, %s5516_s6  ;;  %v320_v20 = vld [vmem:[#allocation2 + $0x1f6] sm:$0x1]  ;;  %5154 = vmatpush3.bf16.msra.mxu0 %v5151_v0  ;;  %v566_v58 = vsel %vm560_vm2, %v529_v47, %v547_v51  ;;  %292 = vst.msk [vmem:[#allocation2 + $0xa7] sm:$0x1] %vm286_vm1, %v273_v56  ;;  %293 = vst.msk [vmem:[#allocation2 + $0xc7] sm:$0x1] %vm286_vm1, %v274_v60 }
  0x49   : > { %338 = vst.msk [vmem:[#allocation2 + $0x1f8] sm:$0x1] %vm286_vm1, %v320_v20  ;;  %653 = vrot.lane.b32.xlu0 %v5885_v5, %s5515_s5  ;;  %294 = vst.msk [vmem:[#allocation2 + $0xe7] sm:$0x1] %vm286_vm1, %v275_v61  ;;  %v276_v0 = vld [vmem:[#allocation2 + $0x109] sm:$0x1]  ;;  %p5461_p3 = pnand %p5460_p2, %p5454_p13 }
  0x4a   : > { %295 = vst.msk [vmem:[#allocation2 + $0x107] sm:$0x1] %vm286_vm1, %v276_v0  ;;  %v512_v1 = vrot.slane %v5906_v59, 1  ;;  %v530_v2 = vrot.slane %v5909_v62, 1  ;;  %v277_v4 = vld [vmem:[#allocation2 + $0x129] sm:$0x1] }
  0x4b   : > { %v321_v52 = vld [vmem:[#allocation2 + $0x216] sm:$0x1]  ;;  %296 = vst.msk [vmem:[#allocation2 + $0x127] sm:$0x1] %vm286_vm1, %v277_v4  ;;  %v5927_v20 = vld [vmem:[#allocation2 + $0xe8] sm:$0xff]  ;;  %v372_v47 = vld [vmem:[#allocation2 + $0xf8] sm:$0xff] }
  0x4c   : > { %795 = vrot.lane.b32.xlu1 %v565_v3, %s5516_s6  ;;  %339 = vst.msk [vmem:[#allocation2 + $0x218] sm:$0x1] %vm286_vm1, %v321_v52  ;;  %v548_v3 = vrot.slane %v368_v63, 1  ;;  %v585_v9 = vsel %vm560_vm2, %v512_v1, %v530_v2  ;;  %v5929_v24 = vld [vmem:[#allocation2 + $0xf0] sm:$0xff]  ;;  %v513_v51 = vrot.slane %v5927_v20, 1  ;;  %v549_v55 = vrot.slane %v372_v47, 1 }
  0x4d   : > { %797 = vrot.lane.b32.xlu0 %v584_v57, %s5516_s6  ;;  %v531_v52 = vrot.slane %v5929_v24, 1  ;;  %v278_v56 = vld [vmem:[#allocation2 + $0x149] sm:$0x1]  ;;  %v5946_v61 = vld [vmem:[#allocation2 + $0x110] sm:$0xff]  ;;  %v376_v63 = vld [vmem:[#allocation2 + $0x118] sm:$0xff] }
  0x4e   : > { %v567_v10 = vsel %vm560_vm2, %v530_v2, %v548_v3  ;;  %297 = vst.msk [vmem:[#allocation2 + $0x147] sm:$0x1] %vm286_vm1, %v278_v56  ;;  %v5944_v60 = vld [vmem:[#allocation2 + $0x108] sm:$0xff]  ;;  %v532_v1 = vrot.slane %v5946_v61, 1  ;;  %v550_v2 = vrot.slane %v376_v63, 1  ;;  %v958_v3 = vld [vmem:[%s8855_s1] sm:$0xff] }
  0x4f   : > { %v586_v57 = vsel %vm560_vm2, %v513_v51, %v531_v52  ;;  %v514_v0 = vrot.slane %v5944_v60, 1  ;;  %v959_v4 = vld [vmem:[%s8855_s1 + $0x8] sm:$0xff]  ;;  %v380_v56 = vld [vmem:[#allocation2 + $0x138] sm:$0xff]  ;;  %v6092_v33 = vld [vmem:[#allocation2 + $0x210] sm:$0xff] }
  0x50   : > { %655 = vrot.lane.b32.xlu1 %v5887_v8, %s5515_s5  ;;  %v5966_v47 = vpack.c.bf16 %v959_v4, %v958_v3  ;;  %v279_v51 = vld [vmem:[#allocation2 + $0x169] sm:$0x1]  ;;  %v551_v63 = vrot.slane %v380_v56, 1  ;;  %v5989_v4 = vld [vmem:[#allocation2 + $0x150] sm:$0xff]  ;;  %v344_v25 = vld [vmem:[#allocation2 + $0x18] sm:$0xff] }
  0x51   : > { %657 = vrot.lane.b32.xlu0 %v5906_v59, %s5515_s5  ;;  %298 = vst.msk [vmem:[#allocation2 + $0x167] sm:$0x1] %vm286_vm1, %v279_v51  ;;  %v5987_v3 = vld [vmem:[#allocation2 + $0x148] sm:$0xff]  ;;  %v534_v51 = vrot.slane %v5989_v4, 1  ;;  %v322_v30 = vld [vmem:[#allocation2 + $0x236] sm:$0x1] }
  0x52   : > { %5156 = vmatprep.subr.bf16.mxu0 %v5966_v47  ;;  %340 = vst.msk [vmem:[#allocation2 + $0x238] sm:$0x1] %vm286_vm1, %v322_v30  ;;  %v6156_v16 = vld [vmem:[#allocation2 + $0x228] sm:$0xff] }
  0x54   : > { %799 = vrot.lane.b32.xlu1 %v566_v58, %s5516_s6  ;;  %v568_v58 = vsel %vm560_vm2, %v531_v52, %v549_v55  ;;  %v5968_v52 = vld [vmem:[#allocation2 + $0x128] sm:$0xff]  ;;  %v5970_v55 = vld [vmem:[#allocation2 + $0x130] sm:$0xff] }
  0x55   : > { %801 = vrot.lane.b32.xlu0 %v585_v9, %s5516_s6  ;;  %v587_v9 = vsel %vm560_vm2, %v514_v0, %v532_v1  ;;  %v280_v0 = vld [vmem:[#allocation2 + $0x189] sm:$0x1] }
  0x56   : > { %299 = vst.msk [vmem:[#allocation2 + $0x187] sm:$0x1] %vm286_vm1, %v280_v0  ;;  %v6004_v0 = vld [vmem:[#allocation2 + $0x168] sm:$0xff] }
  0x58   : > { %659 = vrot.lane.b32.xlu1 %v5909_v62, %s5515_s5 }
  0x59   : > { %661 = vrot.lane.b32.xlu0 %v5927_v20, %s5515_s5  ;;  %v412_v11 = vld [vmem:[#allocation2 + $0x238] sm:$0xff] }
  0x5c   : > { %803 = vrot.lane.b32.xlu1 %v567_v10, %s5516_s6  ;;  %v569_v10 = vsel %vm560_vm2, %v532_v1, %v550_v2 }
  0x5d   : > { %805 = vrot.lane.b32.xlu0 %v586_v57, %s5516_s6  ;;  %v515_v57 = vrot.slane %v5968_v52, 1 }
  0x60   : > { %663 = vrot.lane.b32.xlu1 %v5929_v24, %s5515_s5 }
  0x61   : > { %665 = vrot.lane.b32.xlu0 %v5944_v60, %s5515_s5 }
  0x64   : > { %807 = vrot.lane.b32.xlu1 %v568_v58, %s5516_s6  ;;  %v533_v58 = vrot.slane %v5970_v55, 1 }
  0x65   : > { %809 = vrot.lane.b32.xlu0 %v587_v9, %s5516_s6  ;;  %v384_v9 = vld [vmem:[#allocation2 + $0x158] sm:$0xff] }
  0x66   : > { %v588_v1 = vsel %vm560_vm2, %v515_v57, %v533_v58  ;;  %v570_v2 = vsel %vm560_vm2, %v533_v58, %v551_v63  ;;  %v552_v56 = vrot.slane %v384_v9, 1  ;;  %v281_v57 = vld [vmem:[#allocation2 + $0x1a9] sm:$0x1]  ;;  %v517_v9 = vrot.slane %v6004_v0, 1 }
  0x67   : > { %300 = vst.msk [vmem:[#allocation2 + $0x1a7] sm:$0x1] %vm286_vm1, %v281_v57  ;;  %v6021_v57 = vld [vmem:[#allocation2 + $0x188] sm:$0xff] }
  0x68   : > { %667 = vrot.lane.b32.xlu1 %v5946_v61, %s5515_s5  ;;  %v571_v63 = vsel %vm560_vm2, %v534_v51, %v552_v56 }
  0x69   : > { %669 = vrot.lane.b32.xlu0 %v5968_v52, %s5515_s5 }
  0x6c   : > { %811 = vrot.lane.b32.xlu1 %v569_v10, %s5516_s6  ;;  %v516_v10 = vrot.slane %v5987_v3, 1 }
  0x6d   : > { %813 = vrot.lane.b32.xlu0 %v588_v1, %s5516_s6  ;;  %v6006_v1 = vld [vmem:[#allocation2 + $0x170] sm:$0xff] }
  0x6e   : > { %v589_v58 = vsel %vm560_vm2, %v516_v10, %v534_v51  ;;  %v535_v50 = vrot.slane %v6006_v1, 1  ;;  %v282_v10 = vld [vmem:[#allocation2 + $0x1c9] sm:$0x1] }
  0x6f   : > { %301 = vst.msk [vmem:[#allocation2 + $0x1c7] sm:$0x1] %vm286_vm1, %v282_v10  ;;  %v6037_v10 = vld [vmem:[#allocation2 + $0x1a8] sm:$0xff] }
  0x70   : > { %671 = vrot.lane.b32.xlu1 %v5970_v55, %s5515_s5  ;;  %v590_v51 = vsel %vm560_vm2, %v517_v9, %v535_v50  ;;  %v283_v9 = vld [vmem:[#allocation2 + $0x1e9] sm:$0x1] }
  0x71   : > { %673 = vrot.lane.b32.xlu0 %v5987_v3, %s5515_s5  ;;  %302 = vst.msk [vmem:[#allocation2 + $0x1e7] sm:$0x1] %vm286_vm1, %v283_v9  ;;  %v6057_v9 = vld [vmem:[#allocation2 + $0x1d0] sm:$0xff] }
  0x72   : > { %v538_v7 = vrot.slane %v6057_v9, 1 }
  0x74   : > { %815 = vrot.lane.b32.xlu1 %v570_v2, %s5516_s6  ;;  %v388_v2 = vld [vmem:[#allocation2 + $0x178] sm:$0xff] }
  0x75   : > { %817 = vrot.lane.b32.xlu0 %v589_v58, %s5516_s6  ;;  %v553_v46 = vrot.slane %v388_v2, 1  ;;  %v6023_v58 = vld [vmem:[#allocation2 + $0x190] sm:$0xff]  ;;  %v518_v2 = vrot.slane %v6021_v57, 1 }
  0x76   : > { %v536_v45 = vrot.slane %v6023_v58, 1 }
  0x77   : > { %v572_v56 = vsel %vm560_vm2, %v535_v50, %v553_v46 }
  0x78   : > { %675 = vrot.lane.b32.xlu1 %v5989_v4, %s5515_s5  ;;  %v591_v46 = vsel %vm560_vm2, %v518_v2, %v536_v45 }
  0x79   : > { %677 = vrot.lane.b32.xlu0 %v6004_v0, %s5515_s5 }
  0x7c   : > { %819 = vrot.lane.b32.xlu1 %v571_v63, %s5516_s6  ;;  %v392_v63 = vld [vmem:[#allocation2 + $0x198] sm:$0xff] }
  0x7d   : > { %821 = vrot.lane.b32.xlu0 %v590_v51, %s5516_s6  ;;  %v554_v44 = vrot.slane %v392_v63, 1  ;;  %v6039_v51 = vld [vmem:[#allocation2 + $0x1b0] sm:$0xff]  ;;  %v519_v63 = vrot.slane %v6037_v10, 1 }
  0x7e   : > { %v537_v43 = vrot.slane %v6039_v51, 1 }
  0x7f   : > { %v573_v50 = vsel %vm560_vm2, %v536_v45, %v554_v44  ;;  %v284_v44 = vld [vmem:[#allocation2 + $0x209] sm:$0x1] }
  0x80   : > { %679 = vrot.lane.b32.xlu1 %v6006_v1, %s5515_s5  ;;  %v592_v45 = vsel %vm560_vm2, %v519_v63, %v537_v43  ;;  %303 = vst.msk [vmem:[#allocation2 + $0x207] sm:$0x1] %vm286_vm1, %v284_v44  ;;  %v6072_v44 = vld [vmem:[#allocation2 + $0x1e8] sm:$0xff] }
  0x81   : > { %681 = vrot.lane.b32.xlu0 %v6021_v57, %s5515_s5 }
  0x84   : > { %823 = vrot.lane.b32.xlu1 %v572_v56, %s5516_s6  ;;  %v396_v56 = vld [vmem:[#allocation2 + $0x1b8] sm:$0xff] }
  0x85   : > { %825 = vrot.lane.b32.xlu0 %v591_v46, %s5516_s6  ;;  %v555_v2 = vrot.slane %v396_v56, 1  ;;  %v400_v56 = vld [vmem:[#allocation2 + $0x1d8] sm:$0xff] }
  0x86   : > { %v556_v37 = vrot.slane %v400_v56, 1  ;;  %v521_v56 = vrot.slane %v6072_v44, 1 }
  0x87   : > { %v574_v46 = vsel %vm560_vm2, %v537_v43, %v555_v2  ;;  %v268_v43 = vld [vmem:[#allocation2 + $0x9] sm:$0x1] }
  0x88   : > { %683 = vrot.lane.b32.xlu1 %v6023_v58, %s5515_s5  ;;  %v575_v2 = vsel %vm560_vm2, %v538_v7, %v556_v37  ;;  %287 = vst.msk [vmem:[#allocation2 + $0x7] sm:$0x1] %vm286_vm1, %v268_v43  ;;  %v345_v37 = vld [vmem:[#allocation2 + $0x20] sm:$0xff] }
  0x89   : > { %685 = vrot.lane.b32.xlu0 %v6037_v10, %s5515_s5  ;;  %v414_v31 = vrot.slane %v345_v37, 7  ;;  %v349_v37 = vld [vmem:[#allocation2 + $0x40] sm:$0xff] }
  0x8a   : > { %v415_v22 = vrot.slane %v349_v37, 7 }
  0x8b   : > { %v489_v39 = vsel %vm469_vm3, %v414_v31, %v432_v32  ;;  %v6114_v31 = vld [vmem:[#allocation2 + $0x8] sm:$0xff] }
  0x8c   : > { %827 = vrot.lane.b32.xlu1 %v573_v50, %s5516_s6  ;;  %v6055_v50 = vld [vmem:[#allocation2 + $0x1c8] sm:$0xff] }
  0x8d   : > { %829 = vrot.lane.b32.xlu0 %v592_v45, %s5516_s6  ;;  %v520_v42 = vrot.slane %v6055_v50, 1  ;;  %v6074_v45 = vld [vmem:[#allocation2 + $0x1f0] sm:$0xff] }
  0x8e   : > { %v539_v36 = vrot.slane %v6074_v45, 1 }
  0x8f   : > { %v593_v63 = vsel %vm560_vm2, %v520_v42, %v538_v7 }
  0x90   : > { %687 = vrot.lane.b32.xlu1 %v6039_v51, %s5515_s5  ;;  %v594_v7 = vsel %vm560_vm2, %v521_v56, %v539_v36 }
  0x91   : > { %689 = vrot.lane.b32.xlu0 %v6055_v50, %s5515_s5 }
  0x94   : > { %831 = vrot.lane.b32.xlu1 %v574_v46, %s5516_s6  ;;  %v404_v46 = vld [vmem:[#allocation2 + $0x1f8] sm:$0xff] }
  0x95   : > { %833 = vrot.lane.b32.xlu0 %v593_v63, %s5516_s6  ;;  %v557_v35 = vrot.slane %v404_v46, 1  ;;  %v408_v46 = vld [vmem:[#allocation2 + $0x218] sm:$0xff] }
  0x96   : > { %v558_v56 = vrot.slane %v408_v46, 1 }
  0x97   : > { %v576_v42 = vsel %vm560_vm2, %v539_v36, %v557_v35  ;;  %v540_v36 = vrot.slane %v6092_v33, 1 }
  0x98   : > { %691 = vrot.lane.b32.xlu1 %v6057_v9, %s5515_s5 }
  0x99   : > { %693 = vrot.lane.b32.xlu0 %v6072_v44, %s5515_s5  ;;  %v6088_v43 = vpop.permute.xlu1 %643 }
  0x9a   : > { %v638_v63 = vpop.permute.xlu0 %637 }
  0x9c   : > { %835 = vrot.lane.b32.xlu1 %v575_v2, %s5516_s6  ;;  %v6090_v2 = vld [vmem:[#allocation2 + $0x208] sm:$0xff] }
  0x9d   : > { %837 = vrot.lane.b32.xlu0 %v594_v7, %s5516_s6  ;;  %v522_v35 = vrot.slane %v6090_v2, 1  ;;  %v6101_v29 = vpop.permute.xlu1 %647  ;;  %v577_v7 = vsel %vm560_vm2, %v540_v36, %v558_v56  ;;  %v524_v56 = vrot.slane %v6116_v26, 1 }
  0x9e   : > { %v640_v28 = vpop.permute.xlu0 %639 }
  0x9f   : > { %v595_v30 = vsel %vm560_vm2, %v522_v35, %v540_v36  ;;  %v353_v35 = vld [vmem:[#allocation2 + $0x60] sm:$0xff]  ;;  %v506_v36 = vrot.slane %v6114_v31, 1 }
  0xa0   : > { %695 = vrot.lane.b32.xlu1 %v6074_v45, %s5515_s5 }
  0xa1   : > { %697 = vrot.lane.b32.xlu0 %v6090_v2, %s5515_s5  ;;  %v782_v27 = vpop.permute.xlu1 %781 }
  0xa2   : > { %v642_v46 = vpop.permute.xlu0 %641 }
  0xa4   : > { %839 = vrot.lane.b32.xlu1 %v576_v42, %s5516_s6  ;;  %v887_v42 = vsel %vm230_vm0, %v489_v39, %v638_v63  ;;  %v433_v63 = vrot.slane %v5772_v48, 7  ;;  %v542_v39 = vrot.slane %v344_v25, 1  ;;  %v416_v48 = vrot.slane %v353_v35, 7  ;;  %v960_v25 = vld [vmem:[%s8855_s1 + $0x10] sm:$0xff] }
  0xa5   : > { %v6120_v21 = vsel %vm921_vm4, %v887_v42, %v782_v27  ;;  %841 = vrot.lane.b32.xlu0 %v595_v30, %s5516_s6  ;;  %v6130_v27 = vpop.permute.xlu1 %651  ;;  %v471_v30 = vsel %vm469_vm3, %v432_v32, %v450_v23  ;;  %v434_v23 = vrot.slane %v5782_v53, 7  ;;  %v452_v42 = vrot.slane %v5760_v41, 7  ;;  %v6158_v53 = vld [vmem:[#allocation2 + $0x230] sm:$0xff] }
  0xa6   : > { %4723 = vmatprep.mubr.msk.f32.mxu0 %vm983_vm5, %v6120_v21  ;;  %v646_v37 = vpop.permute.xlu0 %645  ;;  %v561_v32 = vsel %vm560_vm2, %v524_v56, %v542_v39  ;;  %v472_v35 = vsel %vm469_vm3, %v433_v63, %v451_v40  ;;  %v888_v19 = vsel %vm230_vm0, %v471_v30, %v640_v28  ;;  %v357_v28 = vld [vmem:[#allocation2 + $0x80] sm:$0xff]  ;;  %v963_v39 = vld [vmem:[%s8855_s1 + $0x28] sm:$0xff]  ;;  %v435_v40 = vrot.slane %v5804_v6, 7 }
  0xa7   : > { %v890_v30 = vsel %vm230_vm0, %v472_v35, %v6088_v43  ;;  %v417_v6 = vrot.slane %v357_v28, 7 }
  0xa8   : > { %699 = vrot.lane.b32.xlu1 %v6092_v33, %s5515_s5 }
  0xa9   : > { %633 = vrot.lane.b32.xlu0 %v6114_v31, %s5515_s5  ;;  %v492_v28 = vsel %vm469_vm3, %v417_v6, %v435_v40 }
  0xaa   : > { %v786_v18 = vpop.permute.xlu0 %785 }
  0xac   : > { %843 = vrot.lane.b32.xlu1 %v577_v7, %s5516_s6  ;;  %v490_v7 = vsel %vm469_vm3, %v415_v22, %v433_v63  ;;  %v579_v22 = vsel %vm560_vm2, %v506_v36, %v524_v56  ;;  %v491_v36 = vsel %vm469_vm3, %v416_v48, %v434_v23  ;;  %v5159_v63 = vpack.c.bf16 %v961_v38, %v960_v25 }
  0xad   : > { %v889_v17 = vsel %vm230_vm0, %v490_v7, %v642_v46  ;;  %777 = vrot.lane.b32.xlu0 %v579_v22, %s5516_s6  ;;  %v962_v46 = vld [vmem:[%s8855_s1 + $0x20] sm:$0xff]  ;;  %v473_v7 = vsel %vm469_vm3, %v434_v23, %v452_v42  ;;  %v891_v48 = vsel %vm230_vm0, %v491_v36, %v646_v37  ;;  %v964_v37 = vld [vmem:[%s8855_s1 + $0x30] sm:$0xff]  ;;  %v965_v23 = vld [vmem:[%s8855_s1 + $0x38] sm:$0xff] }
  0xae   : > { %v6163_v56 = vsel %vm921_vm4, %v889_v17, %v786_v18  ;;  %v453_v17 = vrot.slane %v5784_v54, 7  ;;  %v541_v18 = vrot.slane %v6158_v53, 1  ;;  %v790_v54 = vpop.permute.xlu0 %789  ;;  %v5163_v43 = vpack.c.bf16 %v963_v39, %v962_v46 }
  0xaf   : > { %v6191_v38 = vsel %vm921_vm4, %v891_v48, %v790_v54  ;;  %v5167_v39 = vpack.c.bf16 %v965_v23, %v964_v37 }
  0xb0   : > { %635 = vrot.lane.b32.xlu1 %v6116_v26, %s5515_s5  ;;  %v474_v36 = vsel %vm469_vm3, %v435_v40, %v453_v17  ;;  %v436_v17 = vrot.slane %v5885_v5, 7  ;;  %v968_v5 = vld [vmem:[%s8855_s1 + $0x50] sm:$0xff] }
  0xb1   : > { %701 = vrot.lane.b32.xlu0 %v6156_v16, %s5515_s5 }
  0xb2   : > { %v784_v13 = vpop.permute.xlu1 %783 }
  0xb3   : > { %v6166_v41 = vsel %vm921_vm4, %v888_v19, %v784_v13  ;;  %v523_v13 = vrot.slane %v6156_v16, 1  ;;  %v559_v19 = vrot.slane %v412_v11, 1  ;;  %v650_v42 = vpop.permute.xlu0 %649 }
  0xb4   : > { %779 = vrot.lane.b32.xlu1 %v561_v32, %s5516_s6  ;;  %4724 = vmatmul.mubr.msk.f32.vlgmr.msra.gmra.mrb[0].mxu0 %vm983_vm5, %v6166_v41  ;;  %v892_v32 = vsel %vm230_vm0, %v473_v7, %v6101_v29  ;;  %v966_v29 = vld [vmem:[%s8855_s1 + $0x40] sm:$0xff]  ;;  %v893_v40 = vsel %vm230_vm0, %v492_v28, %v650_v42  ;;  %v4265_v42 = vld [vmem:[%s8855_s1 + $0xc8] sm:$0xff] }
  0xb5   : > { %4726 = vmatprep.mubr.msk.f32.mxu0 %vm983_vm5, %v6163_v56  ;;  %5158 = vmatpush3.bf16.msra.mxu0 %v5966_v47  ;;  %v596_v47 = vsel %vm560_vm2, %v523_v13, %v541_v18  ;;  %v578_v22 = vsel %vm560_vm2, %v541_v18, %v559_v19  ;;  %v361_v13 = vld [vmem:[#allocation2 + $0xa0] sm:$0xff]  ;;  %v454_v18 = vrot.slane %v5887_v8, 7  ;;  %v894_v19 = vsel %vm230_vm0, %v474_v36, %v6130_v27  ;;  %v969_v8 = vld [vmem:[%s8855_s1 + $0x58] sm:$0xff] }
  0xb6   : > { %v788_v25 = vpop.permute.xlu1 %787  ;;  %5160 = vmatprep.subr.bf16.mxu0 %v5159_v63  ;;  %845 = vrot.lane.b32.xlu0 %v596_v47, %s5516_s6  ;;  %v5175_v47 = vpack.c.bf16 %v969_v8, %v968_v5  ;;  %v455_v36 = vrot.slane %v5909_v62, 7 }
  0xb7   : > { %v6194_v11 = vsel %vm921_vm4, %v890_v30, %v788_v25  ;;  %v794_v30 = vpop.permute.xlu0 %793  ;;  %v418_v25 = vrot.slane %v361_v13, 7  ;;  %v475_v23 = vsel %vm469_vm3, %v436_v17, %v454_v18 }
  0xb8   : > { %703 = vrot.lane.b32.xlu1 %v6158_v53, %s5515_s5  ;;  %4727 = vmatmul.mubr.msk.f32.gmra.mrb[2].mxu0 %vm983_vm5, %v6194_v11  ;;  %v6239_v48 = vsel %vm921_vm4, %v893_v40, %v794_v30 }
  0xb9   : > { %4729 = vmatprep.mubr.msk.f32.mxu0 %vm983_vm5, %v6191_v38  ;;  %5162 = vmatpush3.bf16.msra.mxu0 %v5159_v63  ;;  %v967_v63 = vld [vmem:[%s8855_s1 + $0x48] sm:$0xff]  ;;  %v493_v37 = vsel %vm469_vm3, %v418_v25, %v436_v17  ;;  %v438_v25 = vrot.slane %v5927_v20, 7 }
  0xba   : > { %v792_v35 = vpop.permute.xlu1 %791  ;;  %5164 = vmatprep.subr.bf16.mxu0 %v5163_v43  ;;  %v5171_v6 = vpack.c.bf16 %v967_v63, %v966_v29 }
  0xbb   : > { %v6221_v46 = vsel %vm921_vm4, %v892_v32, %v792_v35  ;;  %v654_v27 = vpop.permute.xlu0 %653  ;;  %v4264_v32 = vld [vmem:[%s8855_s1 + $0xc0] sm:$0xff]  ;;  %v437_v35 = vrot.slane %v5906_v59, 7 }
  0xbc   : > { %847 = vrot.lane.b32.xlu1 %v578_v22, %s5516_s6  ;;  %4730 = vmatmul.mubr.msk.f32.gmra.mrb[4].mxu0 %vm983_vm5, %v6221_v46  ;;  %v365_v22 = vld [vmem:[#allocation2 + $0xc0] sm:$0xff]  ;;  %v895_v28 = vsel %vm230_vm0, %v493_v37, %v654_v27 }
  0xbd   : > { %5166 = vmatpush3.bf16.msra.mxu0 %v5163_v43  ;;  %4732 = vmatprep.mubr.msk.f32.mxu0 %vm983_vm5, %v6239_v48  ;;  %v419_v18 = vrot.slane %v365_v22, 7  ;;  %v476_v30 = vsel %vm469_vm3, %v437_v35, %v455_v36 }
  0xbe   : > { %v796_v7 = vpop.permute.xlu1 %795  ;;  %5168 = vmatprep.subr.bf16.mxu0 %v5167_v39 }
  0xbf   : > { %v6242_v54 = vsel %vm921_vm4, %v894_v19, %v796_v7  ;;  %v798_v13 = vpop.permute.xlu0 %797  ;;  %v6274_v19 = vpack.c.bf16 %v4265_v42, %v4264_v32  ;;  %v494_v40 = vsel %vm469_vm3, %v419_v18, %v437_v35  ;;  %v369_v7 = vld [vmem:[#allocation2 + $0xe0] sm:$0xff]  ;;  %v439_v35 = vrot.slane %v5944_v60, 7 }
  0xc0   : > { %4733 = vmatmul.mubr.msk.f32.gmra.mrb[6].mxu0 %vm983_vm5, %v6242_v54  ;;  %v6269_v63 = vsel %vm921_vm4, %v895_v28, %v798_v13  ;;  %v373_v42 = vld [vmem:[#allocation2 + $0x100] sm:$0xff] }
  0xc1   : > { %5170 = vmatpush3.bf16.msra.mxu0 %v5167_v39  ;;  %4735 = vmatprep.mubr.msk.f32.mxu0 %vm983_vm5, %v6269_v63 }
  0xc2   : > { %v656_v43 = vpop.permute.xlu1 %655  ;;  %5172 = vmatprep.subr.bf16.mxu0 %v5171_v6 }
  0xc3   : > { %v896_v39 = vsel %vm230_vm0, %v475_v23, %v656_v43  ;;  %v658_v59 = vpop.permute.xlu0 %657  ;;  %v456_v43 = vrot.slane %v5929_v24, 7 }
  0xc5   : > { %5174 = vmatpush3.bf16.msra.mxu0 %v5171_v6  ;;  %v897_v6 = vsel %vm230_vm0, %v494_v40, %v658_v59  ;;  %v477_v24 = vsel %vm469_vm3, %v438_v25, %v456_v43  ;;  %v458_v43 = vrot.slane %v5970_v55, 7 }
  0xc6   : > { %v800_v29 = vpop.permute.xlu1 %799  ;;  %5176 = vmatprep.subr.bf16.mxu0 %v5175_v47 }
  0xc7   : > { %v6272_v17 = vsel %vm921_vm4, %v896_v39, %v800_v29  ;;  %v802_v8 = vpop.permute.xlu0 %801  ;;  %v457_v29 = vrot.slane %v5946_v61, 7 }
  0xc8   : > { %4736 = vmatmul.mubr.msk.f32.gmra.mrb[8].mxu0 %vm983_vm5, %v6272_v17  ;;  %v6290_v37 = vsel %vm921_vm4, %v897_v6, %v802_v8 }
  0xc9   : > { %5178 = vmatpush3.bf16.msra.mxu0 %v5175_v47  ;;  %v420_v47 = vrot.slane %v369_v7, 7  ;;  %4738 = vmatprep.mubr.msk.f32.mxu0 %vm983_vm5, %v6290_v37  ;;  %v478_v61 = vsel %vm469_vm3, %v439_v35, %v457_v29  ;;  %v377_v7 = vld [vmem:[#allocation2 + $0x120] sm:$0xff]  ;;  %v459_v29 = vrot.slane %v5989_v4, 7 }
  0xca   : > { %v660_v62 = vpop.permute.xlu1 %659  ;;  %5180 = vmatprep.subr.bf16.mxu0 %v6274_v19 }
  0xcb   : > { %v898_v5 = vsel %vm230_vm0, %v476_v30, %v660_v62  ;;  %v662_v20 = vpop.permute.xlu0 %661  ;;  %v495_v32 = vsel %vm469_vm3, %v420_v47, %v438_v25  ;;  %v421_v62 = vrot.slane %v373_v42, 7  ;;  %v440_v25 = vrot.slane %v5968_v52, 7  ;;  %v381_v42 = vld [vmem:[#allocation2 + $0x140] sm:$0xff] }
  0xcc   : > { %v899_v36 = vsel %vm230_vm0, %v495_v32, %v662_v20 }
  0xcd   : > { %v496_v30 = vsel %vm469_vm3, %v421_v62, %v439_v35  ;;  %v479_v55 = vsel %vm469_vm3, %v440_v25, %v458_v43  ;;  %v441_v35 = vrot.slane %v5987_v3, 7  ;;  %v460_v43 = vrot.slane %v6006_v1, 7 }
  0xce   : > { %v804_v27 = vpop.permute.xlu1 %803 }
  0xcf   : > { %v6293_v23 = vsel %vm921_vm4, %v898_v5, %v804_v27  ;;  %v806_v39 = vpop.permute.xlu0 %805  ;;  %v480_v4 = vsel %vm469_vm3, %v441_v35, %v459_v29  ;;  %v461_v29 = vrot.slane %v6023_v58, 7 }
  0xd0   : > { %4739 = vmatmul.mubr.msk.f32.gmra.mrb[10].mxu0 %vm983_vm5, %v6293_v23  ;;  %v6308_v18 = vsel %vm921_vm4, %v899_v36, %v806_v39 }
  0xd1   : > { %4741 = vmatprep.mubr.msk.f32.mxu0 %vm983_vm5, %v6308_v18 }
  0xd2   : > { %v664_v22 = vpop.permute.xlu1 %663 }
  0xd3   : > { %v900_v28 = vsel %vm230_vm0, %v477_v24, %v664_v22  ;;  %v666_v60 = vpop.permute.xlu0 %665  ;;  %v422_v22 = vrot.slane %v377_v7, 7  ;;  %v385_v7 = vld [vmem:[#allocation2 + $0x160] sm:$0xff] }
  0xd4   : > { %v901_v6 = vsel %vm230_vm0, %v496_v30, %v666_v60 }
  0xd5   : > { %v497_v24 = vsel %vm469_vm3, %v422_v22, %v440_v25  ;;  %v442_v25 = vrot.slane %v6004_v0, 7 }
  0xd6   : > { %v808_v13 = vpop.permute.xlu1 %807 }
  0xd7   : > { %v6311_v59 = vsel %vm921_vm4, %v900_v28, %v808_v13  ;;  %v810_v8 = vpop.permute.xlu0 %809  ;;  %v481_v1 = vsel %vm469_vm3, %v442_v25, %v460_v43  ;;  %v462_v43 = vrot.slane %v6039_v51, 7 }
  0xd8   : > { %4742 = vmatmul.mubr.msk.f32.gmra.mrb[12].mxu0 %vm983_vm5, %v6311_v59  ;;  %v6326_v47 = vsel %vm921_vm4, %v901_v6, %v810_v8 }
  0xd9   : > { %4744 = vmatprep.mubr.msk.f32.mxu0 %vm983_vm5, %v6326_v47 }
  0xda   : > { %v668_v40 = vpop.permute.xlu1 %667 }
  0xdb   : > { %v902_v5 = vsel %vm230_vm0, %v478_v61, %v668_v40  ;;  %v670_v52 = vpop.permute.xlu0 %669  ;;  %v423_v40 = vrot.slane %v381_v42, 7  ;;  %v389_v42 = vld [vmem:[#allocation2 + $0x180] sm:$0xff] }
  0xdc   : > { %v903_v36 = vsel %vm230_vm0, %v497_v24, %v670_v52 }
  0xdd   : > { %v498_v61 = vsel %vm469_vm3, %v423_v40, %v441_v35  ;;  %v443_v35 = vrot.slane %v6021_v57, 7 }
  0xde   : > { %v812_v27 = vpop.permute.xlu1 %811 }
  0xdf   : > { %v6329_v20 = vsel %vm921_vm4, %v902_v5, %v812_v27  ;;  %v814_v39 = vpop.permute.xlu0 %813  ;;  %v482_v58 = vsel %vm469_vm3, %v443_v35, %v461_v29  ;;  %v463_v29 = vrot.slane %v6057_v9, 7 }
  0xe0   : > { %4745 = vmatmul.mubr.msk.f32.gmra.mrb[14].mxu0 %vm983_vm5, %v6329_v20  ;;  %v6344_v62 = vsel %vm921_vm4, %v903_v36, %v814_v39 }
  0xe1   : > { %4747 = vmatprep.mubr.msk.f32.mxu0 %vm983_vm5, %v6344_v62 }
  0xe2   : > { %v672_v32 = vpop.permute.xlu1 %671 }
  0xe3   : > { %v904_v28 = vsel %vm230_vm0, %v479_v55, %v672_v32  ;;  %v674_v3 = vpop.permute.xlu0 %673  ;;  %v424_v32 = vrot.slane %v385_v7, 7  ;;  %v393_v7 = vld [vmem:[#allocation2 + $0x1a0] sm:$0xff] }
  0xe4   : > { %v905_v6 = vsel %vm230_vm0, %v498_v61, %v674_v3 }
  0xe5   : > { %v499_v55 = vsel %vm469_vm3, %v424_v32, %v442_v25  ;;  %v444_v25 = vrot.slane %v6037_v10, 7 }
  0xe6   : > { %v816_v13 = vpop.permute.xlu1 %815 }
  0xe7   : > { %v6347_v60 = vsel %vm921_vm4, %v904_v28, %v816_v13  ;;  %v818_v8 = vpop.permute.xlu0 %817  ;;  %v483_v51 = vsel %vm469_vm3, %v444_v25, %v462_v43  ;;  %v464_v43 = vrot.slane %v6074_v45, 7 }
  0xe8   : > { %4748 = vmatmul.mubr.msk.f32.gmra.mrb[16].mxu0 %vm983_vm5, %v6347_v60  ;;  %v6362_v22 = vsel %vm921_vm4, %v905_v6, %v818_v8 }
  0xe9   : > { %4750 = vmatprep.mubr.msk.f32.mxu0 %vm983_vm5, %v6362_v22 }
  0xea   : > { %v676_v30 = vpop.permute.xlu1 %675 }
  0xeb   : > { %v906_v5 = vsel %vm230_vm0, %v480_v4, %v676_v30  ;;  %v678_v0 = vpop.permute.xlu0 %677  ;;  %v425_v30 = vrot.slane %v389_v42, 7  ;;  %v397_v42 = vld [vmem:[#allocation2 + $0x1c0] sm:$0xff] }
  0xec   : > { %v907_v36 = vsel %vm230_vm0, %v499_v55, %v678_v0 }
  0xed   : > { %v500_v4 = vsel %vm469_vm3, %v425_v30, %v443_v35  ;;  %v445_v35 = vrot.slane %v6055_v50, 7 }
  0xee   : > { %v820_v27 = vpop.permute.xlu1 %819 }
  0xef   : > { %v6365_v52 = vsel %vm921_vm4, %v906_v5, %v820_v27  ;;  %v822_v39 = vpop.permute.xlu0 %821  ;;  %v484_v9 = vsel %vm469_vm3, %v445_v35, %v463_v29 }
  0xf0   : > { %4751 = vmatmul.mubr.msk.f32.gmra.mrb[18].mxu0 %vm983_vm5, %v6365_v52  ;;  %v6380_v40 = vsel %vm921_vm4, %v907_v36, %v822_v39 }
  0xf1   : > { %4753 = vmatprep.mubr.msk.f32.mxu0 %vm983_vm5, %v6380_v40 }
  0xf2   : > { %v680_v24 = vpop.permute.xlu1 %679 }
  0xf3   : > { %v908_v28 = vsel %vm230_vm0, %v481_v1, %v680_v24  ;;  %v682_v57 = vpop.permute.xlu0 %681  ;;  %v426_v24 = vrot.slane %v393_v7, 7  ;;  %v401_v7 = vld [vmem:[#allocation2 + $0x1e0] sm:$0xff] }
  0xf4   : > { %v909_v6 = vsel %vm230_vm0, %v500_v4, %v682_v57 }
  0xf5   : > { %v501_v1 = vsel %vm469_vm3, %v426_v24, %v444_v25  ;;  %v446_v25 = vrot.slane %v6072_v44, 7 }
  0xf6   : > { %v824_v13 = vpop.permute.xlu1 %823 }
  0xf7   : > { %v6383_v3 = vsel %vm921_vm4, %v908_v28, %v824_v13  ;;  %v826_v8 = vpop.permute.xlu0 %825  ;;  %v485_v45 = vsel %vm469_vm3, %v446_v25, %v464_v43 }
  0xf8   : > { %4754 = vmatmul.mubr.msk.f32.gmra.mrb[20].mxu0 %vm983_vm5, %v6383_v3  ;;  %v6398_v32 = vsel %vm921_vm4, %v909_v6, %v826_v8 }
  0xf9   : > { %4756 = vmatprep.mubr.msk.f32.mxu0 %vm983_vm5, %v6398_v32 }
  0xfa   : > { %v684_v61 = vpop.permute.xlu1 %683 }
  0xfb   : > { %v910_v5 = vsel %vm230_vm0, %v482_v58, %v684_v61  ;;  %v686_v10 = vpop.permute.xlu0 %685  ;;  %v427_v61 = vrot.slane %v397_v42, 7  ;;  %v405_v42 = vld [vmem:[#allocation2 + $0x200] sm:$0xff] }
  0xfc   : > { %v911_v36 = vsel %vm230_vm0, %v501_v1, %v686_v10 }
  0xfd   : > { %v502_v58 = vsel %vm469_vm3, %v427_v61, %v445_v35  ;;  %v285_v35 = vld [vmem:[#allocation2 + $0x229] sm:$0x1]  ;;  %v465_v61 = vrot.slane %v6092_v33, 7 }
  0xfe   : > { %v828_v27 = vpop.permute.xlu1 %827  ;;  %304 = vst.msk [vmem:[#allocation2 + $0x227] sm:$0x1] %vm286_vm1, %v285_v35  ;;  %v4266_v35 = vld [vmem:[%s8855_s1 + $0xd0] sm:$0xff] }
  0xff   : > { %v6401_v0 = vsel %vm921_vm4, %v910_v5, %v828_v27  ;;  %v830_v39 = vpop.permute.xlu0 %829 }
 0x100   : > { %4757 = vmatmul.mubr.msk.f32.gmra.mrb[22].mxu0 %vm983_vm5, %v6401_v0  ;;  %v6416_v30 = vsel %vm921_vm4, %v911_v36, %v830_v39  ;;  %v447_v36 = vrot.slane %v6090_v2, 7 }
 0x101   : > { %4759 = vmatprep.mubr.msk.f32.mxu0 %vm983_vm5, %v6416_v30 }
 0x102   : > { %v688_v55 = vpop.permute.xlu1 %687  ;;  %v486_v33 = vsel %vm469_vm3, %v447_v36, %v465_v61 }
 0x103   : > { %v912_v28 = vsel %vm230_vm0, %v483_v51, %v688_v55  ;;  %v690_v50 = vpop.permute.xlu0 %689  ;;  %v428_v55 = vrot.slane %v401_v7, 7 }
 0x104   : > { %v913_v6 = vsel %vm230_vm0, %v502_v58, %v690_v50  ;;  %v429_v58 = vrot.slane %v405_v42, 7 }
 0x105   : > { %v503_v51 = vsel %vm469_vm3, %v428_v55, %v446_v25  ;;  %v341_v25 = vld [vmem:[#allocation2] sm:$0xff]  ;;  %v449_v55 = vrot.slane %v6116_v26, 7 }
 0x106   : > { %v832_v13 = vpop.permute.xlu1 %831  ;;  %v504_v7 = vsel %vm469_vm3, %v429_v58, %v447_v36  ;;  %v4267_v36 = vld [vmem:[%s8855_s1 + $0xd8] sm:$0xff] }
 0x107   : > { %v6419_v57 = vsel %vm921_vm4, %v912_v28, %v832_v13  ;;  %v834_v8 = vpop.permute.xlu0 %833 }
 0x108   : > { %4760 = vmatmul.mubr.msk.f32.gmra.mrb[24].mxu0 %vm983_vm5, %v6419_v57  ;;  %v6434_v24 = vsel %vm921_vm4, %v913_v6, %v834_v8  ;;  %v431_v6 = vrot.slane %v6114_v31, 7 }
 0x109   : > { %4762 = vmatprep.mubr.msk.f32.mxu0 %vm983_vm5, %v6434_v24 }
 0x10a   : > { %v692_v4 = vpop.permute.xlu1 %691  ;;  %v470_v26 = vsel %vm469_vm3, %v431_v6, %v449_v55 }
 0x10b   : > { %v914_v5 = vsel %vm230_vm0, %v484_v9, %v692_v4  ;;  %v694_v44 = vpop.permute.xlu0 %693 }
 0x10c   : > { %v915_v28 = vsel %vm230_vm0, %v503_v51, %v694_v44  ;;  %v413_v51 = vrot.slane %v341_v25, 7  ;;  %v4270_v25 = vld [vmem:[%s8855_s1 + $0xf0] sm:$0xff] }
 0x10e   : > { %v836_v27 = vpop.permute.xlu1 %835  ;;  %v488_v42 = vsel %vm469_vm3, %v413_v51, %v431_v6  ;;  %v4271_v6 = vld [vmem:[%s8855_s1 + $0xf8] sm:$0xff] }
 0x10f   : > { %v6437_v10 = vsel %vm921_vm4, %v914_v5, %v836_v27  ;;  %v838_v13 = vpop.permute.xlu0 %837 }
 0x110   : > { %4763 = vmatmul.mubr.msk.f32.gmra.mrb[26].mxu0 %vm983_vm5, %v6437_v10  ;;  %v6453_v50 = vsel %vm921_vm4, %v915_v28, %v838_v13 }
 0x111   : > { %4765 = vmatprep.mubr.msk.f32.mxu0 %vm983_vm5, %v6453_v50 }
 0x112   : > { %v696_v1 = vpop.permute.xlu1 %695 }
 0x113   : > { %v916_v39 = vsel %vm230_vm0, %v485_v45, %v696_v1  ;;  %v698_v2 = vpop.permute.xlu0 %697 }
 0x114   : > { %v917_v5 = vsel %vm230_vm0, %v504_v7, %v698_v2  ;;  %v5183_v2 = vpack.c.bf16 %v4267_v36, %v4266_v35  ;;  %v4269_v7 = vld [vmem:[%s8855_s1 + $0xe8] sm:$0xff] }
 0x116   : > { %v840_v29 = vpop.permute.xlu1 %839 }
 0x117   : > { %v6456_v4 = vsel %vm921_vm4, %v916_v39, %v840_v29  ;;  %v842_v27 = vpop.permute.xlu0 %841 }
 0x118   : > { %4766 = vmatmul.mubr.msk.f32.gmra.mrb[28].mxu0 %vm983_vm5, %v6456_v4  ;;  %v6471_v44 = vsel %vm921_vm4, %v917_v5, %v842_v27  ;;  %v4273_v5 = vld [vmem:[%s8855_s1 + $0x108] sm:$0xff]  ;;  %v4275_v27 = vld [vmem:[%s8855_s1 + $0x118] sm:$0xff] }
 0x119   : > { %4768 = vmatprep.mubr.msk.f32.mxu0 %vm983_vm5, %v6471_v44 }
 0x11a   : > { %v700_v9 = vpop.permute.xlu1 %699 }
 0x11b   : > { %v918_v8 = vsel %vm230_vm0, %v486_v33, %v700_v9  ;;  %v634_v31 = vpop.permute.xlu0 %633  ;;  %v4268_v9 = vld [vmem:[%s8855_s1 + $0xe0] sm:$0xff] }
 0x11c   : > { %v885_v28 = vsel %vm230_vm0, %v488_v42, %v634_v31  ;;  %v5187_v33 = vpack.c.bf16 %v4269_v7, %v4268_v9 }
 0x11e   : > { %v844_v43 = vpop.permute.xlu1 %843 }
 0x11f   : > { %v6474_v1 = vsel %vm921_vm4, %v918_v8, %v844_v43  ;;  %v778_v13 = vpop.permute.xlu0 %777  ;;  %v4274_v8 = vld [vmem:[%s8855_s1 + $0x110] sm:$0xff] }
 0x120   : > { %4769 = vmatmul.mubr.msk.f32.gmra.mrb[30].mxu0 %vm983_vm5, %v6474_v1  ;;  %v922_v61 = vsel %vm921_vm4, %v885_v28, %v778_v13  ;;  %v5199_v43 = vpack.c.bf16 %v4275_v27, %v4274_v8 }
 0x121   : > { %4795 = vmatprep.mubr.msk.f32.mxu0 %vm983_vm5, %v922_v61 }
 0x122   : > { %v636_v45 = vpop.permute.xlu1 %635 }
 0x123   : > { %v886_v39 = vsel %vm230_vm0, %v470_v26, %v636_v45 }
 0x126   : > { %v780_v29 = vpop.permute.xlu1 %779 }
 0x127   : > { %v923_v58 = vsel %vm921_vm4, %v886_v39, %v780_v29 }
 0x128   : > { %4796 = vmatmul.mubr.msk.f32.vlgmr.msra.gmra.mrb[0].mxu0 %vm983_vm5, %v923_v58 }
 0x129   : > { %5182 = vmatpush3.bf16.msra.mxu0 %v6274_v19  ;;  %4798 = vmatprep.mubr.msk.f32.mxu0 %vm983_vm5, %v6120_v21  ;;  %v5191_v19 = vpack.c.bf16 %v4271_v6, %v4270_v25  ;;  %v4272_v21 = vld [vmem:[%s8855_s1 + $0x100] sm:$0xff] }
 0x12a   : > { %5184 = vmatprep.subr.bf16.mxu0 %v5183_v2 }
 0x12c   : > { %4799 = vmatmul.mubr.msk.f32.gmra.mrb[2].mxu0 %vm983_vm5, %v6166_v41  ;;  %v5195_v41 = vpack.c.bf16 %v4273_v5, %v4272_v21 }
 0x12d   : > { %4801 = vmatprep.mubr.msk.f32.mxu0 %vm983_vm5, %v6163_v56  ;;  %5186 = vmatpush3.bf16.msra.mxu0 %v5183_v2 }
 0x12e   : > { %5188 = vmatprep.subr.bf16.mxu0 %v5187_v33 }
 0x130   : > { %4802 = vmatmul.mubr.msk.f32.gmra.mrb[4].mxu0 %vm983_vm5, %v6194_v11 }
 0x131   : > { %4804 = vmatprep.mubr.msk.f32.mxu0 %vm983_vm5, %v6191_v38  ;;  %5190 = vmatpush3.bf16.msra.mxu0 %v5187_v33 }
 0x132   : > { %5192 = vmatprep.subr.bf16.mxu0 %v5191_v19 }
 0x134   : > { %4805 = vmatmul.mubr.msk.f32.gmra.mrb[6].mxu0 %vm983_vm5, %v6221_v46 }
 0x135   : > { %4807 = vmatprep.mubr.msk.f32.mxu0 %vm983_vm5, %v6239_v48  ;;  %5194 = vmatpush3.bf16.msra.mxu0 %v5191_v19 }
 0x136   : > { %5196 = vmatprep.subr.bf16.mxu0 %v5195_v41 }
 0x138   : > { %4808 = vmatmul.mubr.msk.f32.gmra.mrb[8].mxu0 %vm983_vm5, %v6242_v54 }
 0x139   : > { %4810 = vmatprep.mubr.msk.f32.mxu0 %vm983_vm5, %v6269_v63  ;;  %5198 = vmatpush3.bf16.msra.mxu0 %v5195_v41 }
 0x13a   : > { %5200 = vmatprep.subr.bf16.mxu0 %v5199_v43 }
 0x13c   : > { %4811 = vmatmul.mubr.msk.f32.gmra.mrb[10].mxu0 %vm983_vm5, %v6272_v17 }
 0x13d   : > { %4813 = vmatprep.mubr.msk.f32.mxu0 %vm983_vm5, %v6290_v37  ;;  %5202 = vmatpush3.bf16.msra.mxu0 %v5199_v43 }
 0x140   : > { %4814 = vmatmul.mubr.msk.f32.gmra.mrb[12].mxu0 %vm983_vm5, %v6293_v23 }
 0x141   : > { %4816 = vmatprep.mubr.msk.f32.mxu0 %vm983_vm5, %v6308_v18 }
 0x144   : > { %4817 = vmatmul.mubr.msk.f32.gmra.mrb[14].mxu0 %vm983_vm5, %v6311_v59 }
 0x145   : > { %4819 = vmatprep.mubr.msk.f32.mxu0 %vm983_vm5, %v6326_v47 }
 0x148   : > { %4820 = vmatmul.mubr.msk.f32.gmra.mrb[16].mxu0 %vm983_vm5, %v6329_v20 }
 0x149   : > { %4822 = vmatprep.mubr.msk.f32.mxu0 %vm983_vm5, %v6344_v62 }
 0x14c   : > { %4823 = vmatmul.mubr.msk.f32.gmra.mrb[18].mxu0 %vm983_vm5, %v6347_v60 }
 0x14d   : > { %4825 = vmatprep.mubr.msk.f32.mxu0 %vm983_vm5, %v6362_v22 }
 0x150   : > { %4826 = vmatmul.mubr.msk.f32.gmra.mrb[20].mxu0 %vm983_vm5, %v6365_v52 }
 0x151   : > { %4828 = vmatprep.mubr.msk.f32.mxu0 %vm983_vm5, %v6380_v40 }
 0x154   : > { %4829 = vmatmul.mubr.msk.f32.gmra.mrb[22].mxu0 %vm983_vm5, %v6383_v3 }
 0x155   : > { %4831 = vmatprep.mubr.msk.f32.mxu0 %vm983_vm5, %v6398_v32 }
 0x158   : > { %4832 = vmatmul.mubr.msk.f32.gmra.mrb[24].mxu0 %vm983_vm5, %v6401_v0 }
 0x159   : > { %4834 = vmatprep.mubr.msk.f32.mxu0 %vm983_vm5, %v6416_v30 }
 0x15c   : > { %4835 = vmatmul.mubr.msk.f32.gmra.mrb[26].mxu0 %vm983_vm5, %v6419_v57 }
 0x15d   : > { %4837 = vmatprep.mubr.msk.f32.mxu0 %vm983_vm5, %v6434_v24 }
 0x160   : > { %4838 = vmatmul.mubr.msk.f32.gmra.mrb[28].mxu0 %vm983_vm5, %v6437_v10 }
 0x161   : > { %4840 = vmatprep.mubr.msk.f32.mxu0 %vm983_vm5, %v6453_v50 }
 0x164   : > { %4841 = vmatmul.mubr.msk.f32.gmra.mrb[30].mxu0 %vm983_vm5, %v6456_v4 }
 0x165   : > { %4867 = vmatprep.mubr.msk.f32.mxu0 %vm983_vm5, %v6163_v56  ;;  %v409_v56 = vld [vmem:[#allocation2 + $0x220] sm:$0xff] }
 0x168   : > { %4868 = vmatmul.mubr.msk.f32.vlgmr.msra.gmra.mrb[0].mxu0 %vm983_vm5, %v6194_v11  ;;  %v430_v11 = vrot.slane %v409_v56, 7 }
 0x169   : > { %4870 = vmatprep.mubr.msk.f32.mxu0 %vm983_vm5, %v6191_v38  ;;  %v448_v38 = vrot.slane %v6156_v16, 7  ;;  %v704_v16 = vpop.permute.xlu1 %703 }
 0x16c   : > { %4871 = vmatmul.mubr.msk.f32.gmra.mrb[2].mxu0 %vm983_vm5, %v6221_v46  ;;  %v702_v46 = vpop.permute.xlu0 %701 }
 0x16d   : > { %4873 = vmatprep.mubr.msk.f32.mxu0 %vm983_vm5, %v6239_v48  ;;  %v505_v48 = vsel %vm469_vm3, %v430_v11, %v448_v38 }
 0x170   : > { %4874 = vmatmul.mubr.msk.f32.gmra.mrb[4].mxu0 %vm983_vm5, %v6242_v54  ;;  %v466_v54 = vrot.slane %v6158_v53, 7 }
 0x171   : > { %4876 = vmatprep.mubr.msk.f32.mxu0 %vm983_vm5, %v6269_v63  ;;  %v919_v63 = vsel %vm230_vm0, %v505_v48, %v702_v46 }
 0x174   : > { %4877 = vmatmul.mubr.msk.f32.gmra.mrb[6].mxu0 %vm983_vm5, %v6272_v17  ;;  %v846_v17 = vpop.permute.xlu0 %845 }
 0x175   : > { %4879 = vmatprep.mubr.msk.f32.mxu0 %vm983_vm5, %v6290_v37  ;;  %v487_v37 = vsel %vm469_vm3, %v448_v38, %v466_v54 }
 0x176   : > { %v920_v53 = vsel %vm230_vm0, %v487_v37, %v704_v16 }
 0x178   : > { %4880 = vmatmul.mubr.msk.f32.gmra.mrb[8].mxu0 %vm983_vm5, %v6293_v23  ;;  %v956_v23 = vsel %vm921_vm4, %v919_v63, %v846_v17 }
 0x179   : > { %4882 = vmatprep.mubr.msk.f32.mxu0 %vm983_vm5, %v6308_v18  ;;  %v848_v18 = vpop.permute.xlu1 %847 }
 0x17c   : > { %4883 = vmatmul.mubr.msk.f32.gmra.mrb[10].mxu0 %vm983_vm5, %v6311_v59  ;;  %v957_v59 = vsel %vm921_vm4, %v920_v53, %v848_v18 }
 0x17d   : > { %4885 = vmatprep.mubr.msk.f32.mxu0 %vm983_vm5, %v6326_v47 }
 0x180   : > { %4886 = vmatmul.mubr.msk.f32.gmra.mrb[12].mxu0 %vm983_vm5, %v6329_v20 }
 0x181   : > { %4888 = vmatprep.mubr.msk.f32.mxu0 %vm983_vm5, %v6344_v62 }
 0x184   : > { %4889 = vmatmul.mubr.msk.f32.gmra.mrb[14].mxu0 %vm983_vm5, %v6347_v60 }
 0x185   : > { %4891 = vmatprep.mubr.msk.f32.mxu0 %vm983_vm5, %v6362_v22 }
 0x188   : > { %4892 = vmatmul.mubr.msk.f32.gmra.mrb[16].mxu0 %vm983_vm5, %v6365_v52 }
 0x189   : > { %4894 = vmatprep.mubr.msk.f32.mxu0 %vm983_vm5, %v6380_v40 }
 0x18c   : > { %4895 = vmatmul.mubr.msk.f32.gmra.mrb[18].mxu0 %vm983_vm5, %v6383_v3 }
 0x18d   : > { %4897 = vmatprep.mubr.msk.f32.mxu0 %vm983_vm5, %v6398_v32 }
 0x190   : > { %4898 = vmatmul.mubr.msk.f32.gmra.mrb[20].mxu0 %vm983_vm5, %v6401_v0 }
 0x191   : > { %4900 = vmatprep.mubr.msk.f32.mxu0 %vm983_vm5, %v6416_v30 }
 0x194   : > { %4901 = vmatmul.mubr.msk.f32.gmra.mrb[22].mxu0 %vm983_vm5, %v6419_v57 }
 0x195   : > { %4903 = vmatprep.mubr.msk.f32.mxu0 %vm983_vm5, %v6434_v24 }
 0x198   : > { %4904 = vmatmul.mubr.msk.f32.gmra.mrb[24].mxu0 %vm983_vm5, %v6437_v10 }
 0x199   : > { %4906 = vmatprep.mubr.msk.f32.mxu0 %vm983_vm5, %v6453_v50 }
 0x19c   : > { %4907 = vmatmul.mubr.msk.f32.gmra.mrb[26].mxu0 %vm983_vm5, %v6456_v4 }
 0x19d   : > { %4909 = vmatprep.mubr.msk.f32.mxu0 %vm983_vm5, %v6471_v44 }
 0x1a0   : > { %4910 = vmatmul.mubr.msk.f32.gmra.mrb[28].mxu0 %vm983_vm5, %v6474_v1 }
 0x1a1   : > { %4912 = vmatprep.mubr.msk.f32.mxu0 %vm983_vm5, %v956_v23 }
 0x1a4   : > { %4913 = vmatmul.mubr.msk.f32.gmra.mrb[30].mxu0 %vm983_vm5, %v957_v59 }
 0x23b   : > { %v6653_v47 = vpop.f32.mrb[0].mxu0 }
 0x23c   : > { %v1813_v20 = vsel %vm230_vm0, %v6653_v47, 0.0  ;;  %v1882_v62 = vmul.f32 %v6653_v47, %v6653_v47  ;;  %v6659_v60 = vpop.f32.mrb[1].mxu0 }
 0x23d   : > { %v1812_v22 = vsel %vm230_vm0, %v6659_v60, 0.0  ;;  %v1881_v52 = vmul.f32 %v6659_v60, %v6659_v60 }
 0x23e   : > { %v1914_v40 = vsel %vm230_vm0, %v1882_v62, 0.0  ;;  %v1814_v3 = vadd.f32 %v1813_v20, %v1812_v22 }
 0x23f   : > { %v1913_v32 = vsel %vm230_vm0, %v1881_v52, 0.0  ;;  %v6667_v0 = vpop.f32.mrb[2].mxu0 }
 0x240   : > { %v1915_v30 = vadd.f32 %v1914_v40, %v1913_v32  ;;  %v6669_v57 = vpop.f32.mrb[3].mxu0  ;;  %v1884_v24 = vmul.f32 %v6667_v0, %v6667_v0  ;;  %v1817_v55 = vsel %vm230_vm0, %v6667_v0, 0.0 }
 0x241   : > { %v1815_v10 = vsel %vm230_vm0, %v6669_v57, 0.0  ;;  %v1883_v50 = vmul.f32 %v6669_v57, %v6669_v57 }
 0x242   : > { %v1816_v4 = vadd.f32 %v1815_v10, %v1814_v3  ;;  %v1918_v42 = vsel %vm230_vm0, %v1884_v24, 0.0 }
 0x243   : > { %v1916_v44 = vsel %vm230_vm0, %v1883_v50, 0.0  ;;  %v6680_v1 = vpop.f32.mrb[4].mxu0 }
 0x244   : > { %v1917_v51 = vadd.f32 %v1916_v44, %v1915_v30  ;;  %v6682_v31 = vpop.f32.mrb[5].mxu0  ;;  %v1818_v45 = vadd.f32 %v1817_v55, %v1816_v4  ;;  %v1886_v26 = vmul.f32 %v6680_v1, %v6680_v1  ;;  %v1821_v13 = vsel %vm230_vm0, %v6680_v1, 0.0 }
 0x245   : > { %v1819_v35 = vsel %vm230_vm0, %v6682_v31, 0.0  ;;  %v1885_v36 = vmul.f32 %v6682_v31, %v6682_v31 }
 0x246   : > { %v1820_v28 = vadd.f32 %v1819_v35, %v1818_v45  ;;  %v1919_v39 = vadd.f32 %v1918_v42, %v1917_v51  ;;  %v1922_v7 = vsel %vm230_vm0, %v1886_v26, 0.0 }
 0x247   : > { %v1920_v29 = vsel %vm230_vm0, %v1885_v36, 0.0  ;;  %v6694_v61 = vpop.f32.mrb[6].mxu0 }
 0x248   : > { %v1921_v58 = vadd.f32 %v1920_v29, %v1919_v39  ;;  %v6696_v2 = vpop.f32.mrb[7].mxu0  ;;  %v1822_v9 = vadd.f32 %v1821_v13, %v1820_v28  ;;  %v1888_v33 = vmul.f32 %v6694_v61, %v6694_v61  ;;  %v1825_v5 = vsel %vm230_vm0, %v6694_v61, 0.0 }
 0x249   : > { %v1823_v25 = vsel %vm230_vm0, %v6696_v2, 0.0  ;;  %v1887_v6 = vmul.f32 %v6696_v2, %v6696_v2 }
 0x24a   : > { %v1824_v19 = vadd.f32 %v1823_v25, %v1822_v9  ;;  %v1923_v21 = vadd.f32 %v1922_v7, %v1921_v58  ;;  %v1926_v38 = vsel %vm230_vm0, %v1888_v33, 0.0 }
 0x24b   : > { %v1924_v41 = vsel %vm230_vm0, %v1887_v6, 0.0  ;;  %v6708_v8 = vpop.f32.mrb[8].mxu0 }
 0x24c   : > { %v1925_v27 = vadd.f32 %v1924_v41, %v1923_v21  ;;  %v6710_v43 = vpop.f32.mrb[9].mxu0  ;;  %v1826_v56 = vadd.f32 %v1825_v5, %v1824_v19  ;;  %v1890_v11 = vmul.f32 %v6708_v8, %v6708_v8  ;;  %v1829_v63 = vsel %vm230_vm0, %v6708_v8, 0.0 }
 0x24d   : > { %v1827_v46 = vsel %vm230_vm0, %v6710_v43, 0.0  ;;  %v1889_v48 = vmul.f32 %v6710_v43, %v6710_v43 }
 0x24e   : > { %v1828_v54 = vadd.f32 %v1827_v46, %v1826_v56  ;;  %v1927_v16 = vadd.f32 %v1926_v38, %v1925_v27  ;;  %v1930_v59 = vsel %vm230_vm0, %v1890_v11, 0.0 }
 0x24f   : > { %v1928_v17 = vsel %vm230_vm0, %v1889_v48, 0.0  ;;  %v6722_v37 = vpop.f32.mrb[10].mxu0 }
 0x250   : > { %v1929_v23 = vadd.f32 %v1928_v17, %v1927_v16  ;;  %v6724_v53 = vpop.f32.mrb[11].mxu0  ;;  %v1830_v18 = vadd.f32 %v1829_v63, %v1828_v54  ;;  %v1892_v20 = vmul.f32 %v6722_v37, %v6722_v37  ;;  %v1833_v3 = vsel %vm230_vm0, %v6722_v37, 0.0 }
 0x251   : > { %v1831_v62 = vsel %vm230_vm0, %v6724_v53, 0.0  ;;  %v1891_v22 = vmul.f32 %v6724_v53, %v6724_v53 }
 0x252   : > { %v1832_v52 = vadd.f32 %v1831_v62, %v1830_v18  ;;  %v1931_v40 = vadd.f32 %v1930_v59, %v1929_v23  ;;  %v1934_v4 = vsel %vm230_vm0, %v1892_v20, 0.0 }
 0x253   : > { %v1932_v32 = vsel %vm230_vm0, %v1891_v22, 0.0  ;;  %v6736_v30 = vpop.f32.mrb[12].mxu0 }
 0x254   : > { %v1933_v24 = vadd.f32 %v1932_v32, %v1931_v40  ;;  %v6738_v10 = vpop.f32.mrb[13].mxu0  ;;  %v1834_v50 = vadd.f32 %v1833_v3, %v1832_v52  ;;  %v1894_v55 = vmul.f32 %v6736_v30, %v6736_v30  ;;  %v1837_v26 = vsel %vm230_vm0, %v6736_v30, 0.0 }
 0x255   : > { %v1835_v44 = vsel %vm230_vm0, %v6738_v10, 0.0  ;;  %v1893_v51 = vmul.f32 %v6738_v10, %v6738_v10 }
 0x256   : > { %v1836_v45 = vadd.f32 %v1835_v44, %v1834_v50  ;;  %v1935_v42 = vadd.f32 %v1934_v4, %v1933_v24  ;;  %v1938_v29 = vsel %vm230_vm0, %v1894_v55, 0.0 }
 0x257   : > { %v1936_v35 = vsel %vm230_vm0, %v1893_v51, 0.0  ;;  %v6750_v36 = vpop.f32.mrb[14].mxu0 }
 0x258   : > { %v1937_v28 = vadd.f32 %v1936_v35, %v1935_v42  ;;  %v6752_v39 = vpop.f32.mrb[15].mxu0  ;;  %v1838_v13 = vadd.f32 %v1837_v26, %v1836_v45  ;;  %v1896_v58 = vmul.f32 %v6750_v36, %v6750_v36  ;;  %v1841_v6 = vsel %vm230_vm0, %v6750_v36, 0.0 }
 0x259   : > { %v1839_v9 = vsel %vm230_vm0, %v6752_v39, 0.0  ;;  %v1895_v7 = vmul.f32 %v6752_v39, %v6752_v39 }
 0x25a   : > { %v1840_v33 = vadd.f32 %v1839_v9, %v1838_v13  ;;  %v1939_v25 = vadd.f32 %v1938_v29, %v1937_v28  ;;  %v1942_v56 = vsel %vm230_vm0, %v1896_v58, 0.0 }
 0x25b   : > { %v1940_v19 = vsel %vm230_vm0, %v1895_v7, 0.0  ;;  %v6764_v21 = vpop.f32.mrb[16].mxu0 }
 0x25c   : > { %v1941_v5 = vadd.f32 %v1940_v19, %v1939_v25  ;;  %v6766_v41 = vpop.f32.mrb[17].mxu0  ;;  %v1842_v27 = vadd.f32 %v1841_v6, %v1840_v33  ;;  %v1898_v38 = vmul.f32 %v6764_v21, %v6764_v21  ;;  %v1845_v16 = vsel %vm230_vm0, %v6764_v21, 0.0 }
 0x25d   : > { %v1843_v11 = vsel %vm230_vm0, %v6766_v41, 0.0  ;;  %v1897_v46 = vmul.f32 %v6766_v41, %v6766_v41 }
 0x25e   : > { %v1844_v48 = vadd.f32 %v1843_v11, %v1842_v27  ;;  %v1943_v54 = vadd.f32 %v1942_v56, %v1941_v5  ;;  %v1946_v20 = vsel %vm230_vm0, %v1898_v38, 0.0 }
 0x25f   : > { %v1944_v63 = vsel %vm230_vm0, %v1897_v46, 0.0  ;;  %v6778_v17 = vpop.f32.mrb[18].mxu0 }
 0x260   : > { %v1945_v23 = vadd.f32 %v1944_v63, %v1943_v54  ;;  %v6780_v18 = vpop.f32.mrb[19].mxu0  ;;  %v1846_v59 = vadd.f32 %v1845_v16, %v1844_v48  ;;  %v1900_v62 = vmul.f32 %v6778_v17, %v6778_v17  ;;  %v1849_v32 = vsel %vm230_vm0, %v6778_v17, 0.0 }
 0x261   : > { %v1847_v22 = vsel %vm230_vm0, %v6780_v18, 0.0  ;;  %v1899_v52 = vmul.f32 %v6780_v18, %v6780_v18 }
 0x262   : > { %v1848_v40 = vadd.f32 %v1847_v22, %v1846_v59  ;;  %v1947_v3 = vadd.f32 %v1946_v20, %v1945_v23  ;;  %v1950_v51 = vsel %vm230_vm0, %v1900_v62, 0.0 }
 0x263   : > { %v1948_v24 = vsel %vm230_vm0, %v1899_v52, 0.0  ;;  %v6792_v50 = vpop.f32.mrb[20].mxu0 }
 0x264   : > { %v1949_v4 = vadd.f32 %v1948_v24, %v1947_v3  ;;  %v6794_v55 = vpop.f32.mrb[21].mxu0  ;;  %v1850_v44 = vadd.f32 %v1849_v32, %v1848_v40  ;;  %v1902_v45 = vmul.f32 %v6792_v50, %v6792_v50  ;;  %v1853_v13 = vsel %vm230_vm0, %v6792_v50, 0.0 }
 0x265   : > { %v1851_v42 = vsel %vm230_vm0, %v6794_v55, 0.0  ;;  %v1901_v26 = vmul.f32 %v6794_v55, %v6794_v55 }
 0x266   : > { %v1852_v35 = vadd.f32 %v1851_v42, %v1850_v44  ;;  %v1951_v28 = vadd.f32 %v1950_v51, %v1949_v4  ;;  %v1954_v25 = vsel %vm230_vm0, %v1902_v45, 0.0 }
 0x267   : > { %v1952_v29 = vsel %vm230_vm0, %v1901_v26, 0.0  ;;  %v6806_v58 = vpop.f32.mrb[22].mxu0 }
 0x268   : > { %v1953_v9 = vadd.f32 %v1952_v29, %v1951_v28  ;;  %v6808_v7 = vpop.f32.mrb[23].mxu0  ;;  %v1854_v33 = vadd.f32 %v1853_v13, %v1852_v35  ;;  %v1904_v6 = vmul.f32 %v6806_v58, %v6806_v58  ;;  %v1857_v38 = vsel %vm230_vm0, %v6806_v58, 0.0 }
 0x269   : > { %v1855_v19 = vsel %vm230_vm0, %v6808_v7, 0.0  ;;  %v1903_v5 = vmul.f32 %v6808_v7, %v6808_v7 }
 0x26a   : > { %v1856_v27 = vadd.f32 %v1855_v19, %v1854_v33  ;;  %v1955_v56 = vadd.f32 %v1954_v25, %v1953_v9  ;;  %v1958_v63 = vsel %vm230_vm0, %v1904_v6, 0.0 }
 0x26b   : > { %v1956_v11 = vsel %vm230_vm0, %v1903_v5, 0.0  ;;  %v6820_v46 = vpop.f32.mrb[24].mxu0 }
 0x26c   : > { %v1957_v48 = vadd.f32 %v1956_v11, %v1955_v56  ;;  %v6822_v54 = vpop.f32.mrb[25].mxu0  ;;  %v1858_v16 = vadd.f32 %v1857_v38, %v1856_v27  ;;  %v1906_v23 = vmul.f32 %v6820_v46, %v6820_v46  ;;  %v1861_v52 = vsel %vm230_vm0, %v6820_v46, 0.0 }
 0x26d   : > { %v1859_v59 = vsel %vm230_vm0, %v6822_v54, 0.0  ;;  %v1905_v20 = vmul.f32 %v6822_v54, %v6822_v54 }
 0x26e   : > { %v1860_v62 = vadd.f32 %v1859_v59, %v1858_v16  ;;  %v1959_v22 = vadd.f32 %v1958_v63, %v1957_v48  ;;  %v1962_v44 = vsel %vm230_vm0, %v1906_v23, 0.0 }
 0x26f   : > { %v1960_v40 = vsel %vm230_vm0, %v1905_v20, 0.0  ;;  %v6834_v3 = vpop.f32.mrb[26].mxu0 }
 0x270   : > { %v1961_v32 = vadd.f32 %v1960_v40, %v1959_v22  ;;  %v6836_v24 = vpop.f32.mrb[27].mxu0  ;;  %v1862_v4 = vadd.f32 %v1861_v52, %v1860_v62  ;;  %v1908_v51 = vmul.f32 %v6834_v3, %v6834_v3  ;;  %v1865_v28 = vsel %vm230_vm0, %v6834_v3, 0.0 }
 0x271   : > { %v1863_v45 = vsel %vm230_vm0, %v6836_v24, 0.0  ;;  %v1907_v42 = vmul.f32 %v6836_v24, %v6836_v24 }
 0x272   : > { %v1864_v26 = vadd.f32 %v1863_v45, %v1862_v4  ;;  %v1963_v35 = vadd.f32 %v1962_v44, %v1961_v32  ;;  %v1966_v6 = vsel %vm230_vm0, %v1908_v51, 0.0 }
 0x273   : > { %v1964_v13 = vsel %vm230_vm0, %v1907_v42, 0.0  ;;  %v6848_v29 = vpop.f32.mrb[28].mxu0 }
 0x274   : > { %v1965_v9 = vadd.f32 %v1964_v13, %v1963_v35  ;;  %v6850_v33 = vpop.f32.mrb[29].mxu0  ;;  %v1866_v25 = vadd.f32 %v1865_v28, %v1864_v26  ;;  %v1910_v19 = vmul.f32 %v6848_v29, %v6848_v29  ;;  %v1869_v11 = vsel %vm230_vm0, %v6848_v29, 0.0 }
 0x275   : > { %v1867_v5 = vsel %vm230_vm0, %v6850_v33, 0.0  ;;  %v1909_v27 = vmul.f32 %v6850_v33, %v6850_v33 }
 0x276   : > { %v1868_v56 = vadd.f32 %v1867_v5, %v1866_v25  ;;  %v1967_v38 = vadd.f32 %v1966_v6, %v1965_v9  ;;  %v1970_v20 = vsel %vm230_vm0, %v1910_v19, 0.0 }
 0x277   : > { %v1968_v48 = vsel %vm230_vm0, %v1909_v27, 0.0  ;;  %v6862_v16 = vpop.f32.mrb[30].mxu0 }
 0x278   : > { %v1969_v63 = vadd.f32 %v1968_v48, %v1967_v38  ;;  %v6864_v23 = vpop.f32.mrb[31].mxu0  ;;  %v1870_v59 = vadd.f32 %v1869_v11, %v1868_v56  ;;  %v1912_v62 = vmul.f32 %v6862_v16, %v6862_v16  ;;  %v1873_v4 = vsel %vm230_vm0, %v6862_v16, 0.0 }
 0x279   : > { %v1871_v22 = vsel %vm230_vm0, %v6864_v23, 0.0  ;;  %v1911_v52 = vmul.f32 %v6864_v23, %v6864_v23 }
 0x27a   : > { %v1872_v40 = vadd.f32 %v1871_v22, %v1870_v59  ;;  %v1971_v32 = vadd.f32 %v1970_v20, %v1969_v63  ;;  %v1974_v42 = vsel %vm230_vm0, %v1912_v62, 0.0 }
 0x27b   : > { %v1972_v44 = vsel %vm230_vm0, %v1911_v52, 0.0 }
 0x27c   : > { %v1874_v51 = vadd.f32 %v1873_v4, %v1872_v40  ;;  %v1973_v45 = vadd.f32 %v1972_v44, %v1971_v32 }
 0x27e   : > { %v1875_v26 = vrot.slane %v1874_v51, 4  ;;  %v1975_v35 = vadd.f32 %v1974_v42, %v1973_v45 }
 0x280   : > { %v1876_v28 = vadd.f32 %v1875_v26, %v1874_v51  ;;  %v1976_v13 = vrot.slane %v1975_v35, 4 }
 0x282   : > { %v1877_v9 = vrot.slane %v1876_v28, 2  ;;  %v1977_v25 = vadd.f32 %v1976_v13, %v1975_v35 }
 0x284   : > { %v1878_v6 = vadd.f32 %v1877_v9, %v1876_v28  ;;  %v1978_v19 = vrot.slane %v1977_v25, 2 }
 0x286   : > { %v1879_v5 = vrot.slane %v1878_v6, 1  ;;  %v1979_v27 = vadd.f32 %v1978_v19, %v1977_v25 }
 0x288   : > { %v1880_v56 = vadd.f32 %v1879_v5, %v1878_v6  ;;  %v1980_v38 = vrot.slane %v1979_v27, 1 }
 0x28a   : > { %v1981_v11 = vadd.f32 %v1980_v38, %v1979_v27  ;;  %v6877_v48 = vmul.f32 0.00390625, %v1880_v56 }
 0x28c   : > { %v1983_v63 = vmul.f32 0.00390625, %v1981_v11  ;;  %v1984_v59 = vmul.f32 %v6877_v48, %v6877_v48  ;;  %v2016_v20 = vsub.f32 %v6864_v23, %v6877_v48  ;;  %v1986_v62 = vsub.f32 %v6659_v60, %v6877_v48 }
 0x28d   : > { %v1987_v22 = vsub.f32 %v6653_v47, %v6877_v48  ;;  %v1988_v52 = vsub.f32 %v6669_v57, %v6877_v48  ;;  %v1989_v40 = vsub.f32 %v6667_v0, %v6877_v48  ;;  %v1990_v32 = vsub.f32 %v6682_v31, %v6877_v48 }
 0x28e   : > { %v1985_v4 = vsub.f32 %v1983_v63, %v1984_v59  ;;  %v1991_v44 = vsub.f32 %v6680_v1, %v6877_v48  ;;  %v1992_v23 = vsub.f32 %v6696_v2, %v6877_v48  ;;  %v1993_v60 = vsub.f32 %v6694_v61, %v6877_v48 }
 0x28f   : > { %v1994_v47 = vsub.f32 %v6710_v43, %v6877_v48  ;;  %v1995_v57 = vsub.f32 %v6708_v8, %v6877_v48  ;;  %v1996_v0 = vsub.f32 %v6724_v53, %v6877_v48  ;;  %v1997_v31 = vsub.f32 %v6722_v37, %v6877_v48 }
 0x290   : > { %v2018_v51 = vadd.f32 1e-05, %v1985_v4  ;;  %v1998_v1 = vsub.f32 %v6738_v10, %v6877_v48  ;;  %v1999_v2 = vsub.f32 %v6736_v30, %v6877_v48  ;;  %v2000_v61 = vsub.f32 %v6752_v39, %v6877_v48 }
 0x291   : > { %v2001_v43 = vsub.f32 %v6750_v36, %v6877_v48  ;;  %v2002_v8 = vsub.f32 %v6766_v41, %v6877_v48  ;;  %v2003_v53 = vsub.f32 %v6764_v21, %v6877_v48  ;;  %v2004_v37 = vsub.f32 %v6780_v18, %v6877_v48 }
 0x292   : > { %5446 = vrsqrt.f32 %v2018_v51  ;;  %v2005_v10 = vsub.f32 %v6778_v17, %v6877_v48  ;;  %v2006_v30 = vsub.f32 %v6794_v55, %v6877_v48  ;;  %v2007_v39 = vsub.f32 %v6792_v50, %v6877_v48 }
 0x293   : > { %v2008_v36 = vsub.f32 %v6808_v7, %v6877_v48  ;;  %v2009_v41 = vsub.f32 %v6806_v58, %v6877_v48  ;;  %v2010_v21 = vsub.f32 %v6822_v54, %v6877_v48  ;;  %v2011_v18 = vsub.f32 %v6820_v46, %v6877_v48  ;;  %v228_v46 = vld [vmem:[%s8857_s3] sm:$0xf] }
 0x294   : > { %v2012_v17 = vsub.f32 %v6836_v24, %v6877_v48  ;;  %v2013_v55 = vsub.f32 %v6834_v3, %v6877_v48  ;;  %v2014_v50 = vsub.f32 %v6850_v33, %v6877_v48  ;;  %v2015_v7 = vsub.f32 %v6848_v29, %v6877_v48 }
 0x295   : > { %v2017_v58 = vsub.f32 %v6862_v16, %v6877_v48  ;;  %v2054_v54 = vsub.s32 0, %v5727_v34  ;;  %v2090_v24 = vsub.s32 1, %v5727_v34 }
 0x297   : > { %v6950_v45 = vrot.slane %v228_v46, %v2054_v54  ;;  %v6952_v42 = vrot.slane %v228_v46, %v2090_v24 }
 0x29c   : > { %v5447_v3 = vpop.eup %5446 }
 0x29d   : > { %v2050_v33 = vmul.f32 %v5447_v3, %v2016_v20  ;;  %v2021_v26 = vmul.f32 %v5447_v3, %v1987_v22  ;;  %v2020_v35 = vmul.f32 %v5447_v3, %v1986_v62  ;;  %v2022_v29 = vmul.f32 %v5447_v3, %v1988_v52 }
 0x29e   : > { %v2023_v28 = vmul.f32 %v5447_v3, %v1989_v40  ;;  %v2024_v13 = vmul.f32 %v5447_v3, %v1990_v32  ;;  %v2025_v16 = vmul.f32 %v5447_v3, %v1991_v44  ;;  %v2026_v9 = vmul.f32 %v5447_v3, %v1992_v23 }
 0x29f   : > { %v2086_v25 = vmul.f32 %v6950_v45, %v2050_v33  ;;  %v2057_v6 = vmul.f32 %v6950_v45, %v2021_v26  ;;  %v2027_v19 = vmul.f32 %v5447_v3, %v1993_v60  ;;  %v2028_v5 = vmul.f32 %v5447_v3, %v1994_v47 }
 0x2a0   : > { %v2029_v27 = vmul.f32 %v5447_v3, %v1995_v57  ;;  %v2030_v56 = vmul.f32 %v5447_v3, %v1996_v0  ;;  %v2031_v38 = vmul.f32 %v5447_v3, %v1997_v31  ;;  %v2032_v11 = vmul.f32 %v5447_v3, %v1998_v1 }
 0x2a1   : > { %v2122_v48 = vadd.f32 %v6952_v42, %v2086_v25  ;;  %v2093_v63 = vadd.f32 %v6952_v42, %v2057_v6  ;;  %v2033_v59 = vmul.f32 %v5447_v3, %v1999_v2  ;;  %v2034_v20 = vmul.f32 %v5447_v3, %v2000_v61 }
 0x2a2   : > { %v2035_v62 = vmul.f32 %v5447_v3, %v2001_v43  ;;  %v2036_v22 = vmul.f32 %v5447_v3, %v2002_v8  ;;  %v2037_v52 = vmul.f32 %v5447_v3, %v2003_v53  ;;  %v2038_v40 = vmul.f32 %v5447_v3, %v2004_v37 }
 0x2a3   : > { %v2154_v32 = vmax.f32 %v2122_v48, 0.0  ;;  %v2125_v4 = vmax.f32 %v2093_v63, 0.0  ;;  %v2039_v44 = vmul.f32 %v5447_v3, %v2005_v10  ;;  %v2040_v23 = vmul.f32 %v5447_v3, %v2006_v30 }
 0x2a4   : > { %v2041_v60 = vmul.f32 %v5447_v3, %v2007_v39  ;;  %v2042_v47 = vmul.f32 %v5447_v3, %v2008_v36  ;;  %v2043_v57 = vmul.f32 %v5447_v3, %v2009_v41  ;;  %v2044_v0 = vmul.f32 %v5447_v3, %v2010_v21 }
 0x2a5   : > { %2186 = vst.msk [vmem:[#allocation2 + $0x208] sm:$0xff] %vm230_vm0, %v2154_v32  ;;  %2157 = vst.msk [vmem:[#allocation2 + $0x30] sm:$0xff] %vm230_vm0, %v2125_v4  ;;  %v2045_v31 = vmul.f32 %v5447_v3, %v2011_v18  ;;  %v2046_v51 = vmul.f32 %v5447_v3, %v2012_v17  ;;  %v2047_v1 = vmul.f32 %v5447_v3, %v2013_v55 }
 0x2a6   : > { %v2048_v2 = vmul.f32 %v5447_v3, %v2014_v50  ;;  %v2049_v61 = vmul.f32 %v5447_v3, %v2015_v7  ;;  %v2051_v43 = vmul.f32 %v5447_v3, %v2017_v58  ;;  %v2056_v8 = vmul.f32 %v6950_v45, %v2020_v35 }
 0x2a7   : > { %v2058_v53 = vmul.f32 %v6950_v45, %v2022_v29  ;;  %v2059_v37 = vmul.f32 %v6950_v45, %v2023_v28  ;;  %v2060_v10 = vmul.f32 %v6950_v45, %v2024_v13  ;;  %v2061_v39 = vmul.f32 %v6950_v45, %v2025_v16 }
 0x2a8   : > { %v2092_v30 = vadd.f32 %v6952_v42, %v2056_v8  ;;  %v2062_v36 = vmul.f32 %v6950_v45, %v2026_v9  ;;  %v2063_v41 = vmul.f32 %v6950_v45, %v2027_v19  ;;  %v2064_v21 = vmul.f32 %v6950_v45, %v2028_v5 }
 0x2a9   : > { %v2065_v18 = vmul.f32 %v6950_v45, %v2029_v27  ;;  %v2066_v17 = vmul.f32 %v6950_v45, %v2030_v56  ;;  %v2067_v55 = vmul.f32 %v6950_v45, %v2031_v38  ;;  %v2068_v7 = vmul.f32 %v6950_v45, %v2032_v11 }
 0x2aa   : > { %v2124_v50 = vmax.f32 %v2092_v30, 0.0  ;;  %v2069_v58 = vmul.f32 %v6950_v45, %v2033_v59  ;;  %v2070_v54 = vmul.f32 %v6950_v45, %v2034_v20  ;;  %v2071_v46 = vmul.f32 %v6950_v45, %v2035_v62 }
 0x2ab   : > { %v2072_v24 = vmul.f32 %v6950_v45, %v2036_v22  ;;  %v2073_v3 = vmul.f32 %v6950_v45, %v2037_v52  ;;  %v2074_v33 = vmul.f32 %v6950_v45, %v2038_v40  ;;  %v2075_v35 = vmul.f32 %v6950_v45, %v2039_v44 }
 0x2ac   : > { %v6979_v26 = vld [vmem:[#allocation2 + $0x30] sm:$0xff]  ;;  %2156 = vst.msk [vmem:[#allocation2 + $0x28] sm:$0xff] %vm230_vm0, %v2124_v50  ;;  %v2076_v29 = vmul.f32 %v6950_v45, %v2040_v23  ;;  %v2077_v28 = vmul.f32 %v6950_v45, %v2041_v60  ;;  %v2078_v13 = vmul.f32 %v6950_v45, %v2042_v47  ;;  %v2079_v6 = vmul.f32 %v6950_v45, %v2043_v57  ;;  %v2208_v5 = vld [vmem:[#allocation2 + $0x209] sm:$0x1] }
 0x2ad   : > { %v2229_v16 = vld [vmem:[#allocation2 + $0x36] sm:$0x1]  ;;  %2558 = vrot.lane.b32.xlu1 %v6979_v26, %s5515_s5  ;;  %v2373_v9 = vrot.slane %v6979_v26, 7  ;;  %v8888_v25 = vrot.slane %v6979_v26, 1  ;;  %v2080_v19 = vmul.f32 %v6950_v45, %v2044_v0  ;;  %v2081_v27 = vmul.f32 %v6950_v45, %v2045_v31  ;;  %2226 = vst.msk [vmem:[#allocation2 + $0x207] sm:$0x1] %vm286_vm1, %v2208_v5 }
 0x2ae   : > { %2247 = vst.msk [vmem:[#allocation2 + $0x38] sm:$0x1] %vm286_vm1, %v2229_v16  ;;  %v2082_v56 = vmul.f32 %v6950_v45, %v2046_v51  ;;  %v2083_v38 = vmul.f32 %v6950_v45, %v2047_v1  ;;  %v2084_v11 = vmul.f32 %v6950_v45, %v2048_v2  ;;  %v2085_v48 = vmul.f32 %v6950_v45, %v2049_v61 }
 0x2af   : > { %v2087_v63 = vmul.f32 %v6950_v45, %v2051_v43  ;;  %v2095_v59 = vadd.f32 %v6952_v42, %v2059_v37  ;;  %v2094_v20 = vadd.f32 %v6952_v42, %v2058_v53  ;;  %v2096_v62 = vadd.f32 %v6952_v42, %v2060_v10 }
 0x2b0   : > { %v2097_v22 = vadd.f32 %v6952_v42, %v2061_v39  ;;  %v2098_v52 = vadd.f32 %v6952_v42, %v2062_v36  ;;  %v2099_v40 = vadd.f32 %v6952_v42, %v2063_v41  ;;  %v2100_v4 = vadd.f32 %v6952_v42, %v2064_v21 }
 0x2b1   : > { %v2127_v32 = vmax.f32 %v2095_v59, 0.0  ;;  %v2101_v44 = vadd.f32 %v6952_v42, %v2065_v18  ;;  %v2102_v23 = vadd.f32 %v6952_v42, %v2066_v17  ;;  %v2103_v45 = vadd.f32 %v6952_v42, %v2067_v55 }
 0x2b2   : > { %v2104_v60 = vadd.f32 %v6952_v42, %v2068_v7  ;;  %v2105_v47 = vadd.f32 %v6952_v42, %v2069_v58  ;;  %v2106_v57 = vadd.f32 %v6952_v42, %v2070_v54  ;;  %v2107_v31 = vadd.f32 %v6952_v42, %v2071_v46 }
 0x2b3   : > { %v7013_v0 = vld [vmem:[#allocation2 + $0x28] sm:$0xff]  ;;  %2159 = vst.msk [vmem:[#allocation2 + $0x50] sm:$0xff] %vm230_vm0, %v2127_v32  ;;  %v2108_v51 = vadd.f32 %v6952_v42, %v2072_v24  ;;  %v2109_v1 = vadd.f32 %v6952_v42, %v2073_v3  ;;  %v2110_v2 = vadd.f32 %v6952_v42, %v2074_v33  ;;  %2189 = vst.msk [vmem:[#allocation2 + $0x10] sm:$0xff] %vm230_vm0, %v2127_v32  ;;  %v2126_v55 = vmax.f32 %v2094_v20, 0.0 }
 0x2b4   : > { %v2193_v61 = vld [vmem:[#allocation2 + $0x29] sm:$0x1]  ;;  %2556 = vrot.lane.b32.xlu0 %v7013_v0, %s5515_s5  ;;  %v7024_v43 = vadd.f32 %v6952_v42, %v2075_v35  ;;  %v7027_v8 = vadd.f32 %v6952_v42, %v2076_v29  ;;  %v7030_v53 = vadd.f32 %v6952_v42, %v2077_v28  ;;  %v7033_v37 = vadd.f32 %v6952_v42, %v2078_v13 }
 0x2b5   : > { %2211 = vst.msk [vmem:[#allocation2 + $0x27] sm:$0x1] %vm286_vm1, %v2193_v61  ;;  %v7037_v10 = vadd.f32 %v6952_v42, %v2079_v6  ;;  %v7040_v30 = vadd.f32 %v6952_v42, %v2080_v19  ;;  %v7043_v39 = vadd.f32 %v6952_v42, %v2081_v27  ;;  %v7046_v36 = vadd.f32 %v6952_v42, %v2082_v56 }
 0x2b6   : > { %v7049_v41 = vadd.f32 %v6952_v42, %v2083_v38  ;;  %v7052_v21 = vadd.f32 %v6952_v42, %v2084_v11  ;;  %v7055_v18 = vadd.f32 %v6952_v42, %v2085_v48  ;;  %v7058_v17 = vadd.f32 %v6952_v42, %v2087_v63  ;;  %2158 = vst.msk [vmem:[#allocation2 + $0x48] sm:$0xff] %vm230_vm0, %v2126_v55 }
 0x2b7   : > { %v2128_v50 = vmax.f32 %v2096_v62, 0.0  ;;  %v2129_v7 = vmax.f32 %v2097_v22, 0.0  ;;  %v2130_v58 = vmax.f32 %v2098_v52, 0.0  ;;  %v2131_v54 = vmax.f32 %v2099_v40, 0.0  ;;  %2188 = vst.msk [vmem:[#allocation2 + $0x8] sm:$0xff] %vm230_vm0, %v2126_v55 }
 0x2b8   : > { %v2132_v46 = vmax.f32 %v2100_v4, 0.0  ;;  %v2133_v24 = vmax.f32 %v2101_v44, 0.0  ;;  %v2134_v3 = vmax.f32 %v2102_v23, 0.0  ;;  %v2135_v33 = vmax.f32 %v2103_v45, 0.0  ;;  %v7108_v23 = vld [vmem:[#allocation2 + $0x208] sm:$0xff] }
 0x2b9   : > { %v2136_v35 = vmax.f32 %v2104_v60, 0.0  ;;  %v2137_v29 = vmax.f32 %v2105_v47, 0.0  ;;  %v2138_v28 = vmax.f32 %v2106_v57, 0.0  ;;  %2161 = vst.msk [vmem:[#allocation2 + $0x70] sm:$0xff] %vm230_vm0, %v2129_v7  ;;  %2160 = vst.msk [vmem:[#allocation2 + $0x68] sm:$0xff] %vm230_vm0, %v2128_v50  ;;  %v2139_v13 = vmax.f32 %v2107_v31, 0.0 }
 0x2ba   : > { %2162 = vst.msk [vmem:[#allocation2 + $0x88] sm:$0xff] %vm230_vm0, %v2130_v58  ;;  %v7065_v42 = vld [vmem:[#allocation2 + $0x50] sm:$0xff]  ;;  %v2140_v16 = vmax.f32 %v2108_v51, 0.0  ;;  %v2141_v6 = vmax.f32 %v2109_v1, 0.0  ;;  %v2142_v19 = vmax.f32 %v2110_v2, 0.0  ;;  %2163 = vst.msk [vmem:[#allocation2 + $0x90] sm:$0xff] %vm230_vm0, %v2131_v54 }
 0x2bb   : > { %2164 = vst.msk [vmem:[#allocation2 + $0xa8] sm:$0xff] %vm230_vm0, %v2132_v46  ;;  %2165 = vst.msk [vmem:[#allocation2 + $0xb0] sm:$0xff] %vm230_vm0, %v2133_v24  ;;  %v8887_v5 = vrot.slane %v7013_v0, 7  ;;  %v2427_v27 = vrot.slane %v7013_v0, 1  ;;  %2562 = vrot.lane.b32.xlu1 %v7065_v42, %s5515_s5  ;;  %v2143_v56 = vmax.f32 %v7024_v43, 0.0  ;;  %v2144_v38 = vmax.f32 %v7027_v8, 0.0 }
 0x2bc   : > { %2166 = vst.msk [vmem:[#allocation2 + $0xc8] sm:$0xff] %vm230_vm0, %v2134_v3  ;;  %2167 = vst.msk [vmem:[#allocation2 + $0xd0] sm:$0xff] %vm230_vm0, %v2135_v33  ;;  %v2230_v11 = vld [vmem:[#allocation2 + $0x56] sm:$0x1]  ;;  %v2145_v48 = vmax.f32 %v7030_v53, 0.0  ;;  %v2146_v63 = vmax.f32 %v7033_v37, 0.0 }
 0x2bd   : > { %2168 = vst.msk [vmem:[#allocation2 + $0xe8] sm:$0xff] %vm230_vm0, %v2136_v35  ;;  %2169 = vst.msk [vmem:[#allocation2 + $0xf0] sm:$0xff] %vm230_vm0, %v2137_v29  ;;  %v2147_v59 = vmax.f32 %v7037_v10, 0.0  ;;  %v2148_v20 = vmax.f32 %v7040_v30, 0.0  ;;  %v2149_v62 = vmax.f32 %v7043_v39, 0.0  ;;  %v2150_v22 = vmax.f32 %v7046_v36, 0.0 }
 0x2be   : > { %2170 = vst.msk [vmem:[#allocation2 + $0x108] sm:$0xff] %vm230_vm0, %v2138_v28  ;;  %2171 = vst.msk [vmem:[#allocation2 + $0x110] sm:$0xff] %vm230_vm0, %v2139_v13  ;;  %v2151_v52 = vmax.f32 %v7049_v41, 0.0  ;;  %v2152_v40 = vmax.f32 %v7052_v21, 0.0  ;;  %v2228_v32 = vld [vmem:[#allocation2 + $0x16] sm:$0x1]  ;;  %v7114_v45 = vsel %vm560_vm2, %v2427_v27, %v8888_v25  ;;  %v7131_v31 = vsel %vm469_vm3, %v8887_v5, %v2373_v9 }
 0x2bf   : > { %2172 = vst.msk [vmem:[#allocation2 + $0x128] sm:$0xff] %vm230_vm0, %v2140_v16  ;;  %2173 = vst.msk [vmem:[#allocation2 + $0x130] sm:$0xff] %vm230_vm0, %v2141_v6  ;;  %v2153_v4 = vmax.f32 %v7055_v18, 0.0  ;;  %v2155_v44 = vmax.f32 %v7058_v17, 0.0  ;;  %v7116_v60 = vld [vmem:[#allocation2 + $0x48] sm:$0xff]  ;;  %v7123_v57 = vld [vmem:[#allocation2 + $0x10] sm:$0xff] }
 0x2c0   : > { %2174 = vst.msk [vmem:[#allocation2 + $0x148] sm:$0xff] %vm230_vm0, %v2142_v19  ;;  %2175 = vst.msk [vmem:[#allocation2 + $0x150] sm:$0xff] %vm230_vm0, %v2143_v56  ;;  %v7118_v47 = vld [vmem:[#allocation2 + $0x70] sm:$0xff]  ;;  %2560 = vrot.lane.b32.xlu0 %v7116_v60, %s5515_s5  ;;  %v7137_v51 = vld [vmem:[#allocation2 + $0x68] sm:$0xff]  ;;  %v8892_v61 = vrot.slane %v7065_v42, 1  ;;  %v2428_v37 = vrot.slane %v7116_v60, 1 }
 0x2c1   : > { %2248 = vst.msk [vmem:[#allocation2 + $0x58] sm:$0x1] %vm286_vm1, %v2230_v11  ;;  %2246 = vst.msk [vmem:[#allocation2 + $0x18] sm:$0x1] %vm286_vm1, %v2228_v32  ;;  %2566 = vrot.lane.b32.xlu1 %v7118_v47, %s5515_s5  ;;  %v7139_v1 = vld [vmem:[#allocation2 + $0x90] sm:$0xff]  ;;  %v7143_v43 = vld [vmem:[#allocation2 + $0x88] sm:$0xff] }
 0x2c2   : > { %2176 = vst.msk [vmem:[#allocation2 + $0x168] sm:$0xff] %vm230_vm0, %v2144_v38  ;;  %2177 = vst.msk [vmem:[#allocation2 + $0x170] sm:$0xff] %vm230_vm0, %v2145_v48  ;;  %v7145_v8 = vld [vmem:[#allocation2 + $0xb0] sm:$0xff]  ;;  %v7151_v30 = vld [vmem:[#allocation2 + $0xa8] sm:$0xff]  ;;  %v8891_v41 = vrot.slane %v7118_v47, 1  ;;  %v2429_v18 = vrot.slane %v7137_v51, 1  ;;  %v7261_v58 = vsel %vm560_vm2, %v2428_v37, %v8892_v61 }
 0x2c3   : > { %2178 = vst.msk [vmem:[#allocation2 + $0x188] sm:$0xff] %vm230_vm0, %v2146_v63  ;;  %2179 = vst.msk [vmem:[#allocation2 + $0x190] sm:$0xff] %vm230_vm0, %v2147_v59  ;;  %v7153_v39 = vld [vmem:[#allocation2 + $0xd0] sm:$0xff]  ;;  %v7160_v55 = vld [vmem:[#allocation2 + $0xc8] sm:$0xff]  ;;  %v8889_v7 = vrot.slane %v7139_v1, 1  ;;  %v2430_v54 = vrot.slane %v7143_v43, 1 }
 0x2c4   : > { %2180 = vst.msk [vmem:[#allocation2 + $0x1a8] sm:$0xff] %vm230_vm0, %v2148_v20  ;;  %2181 = vst.msk [vmem:[#allocation2 + $0x1b0] sm:$0xff] %vm230_vm0, %v2149_v62  ;;  %v7162_v50 = vld [vmem:[#allocation2 + $0xf0] sm:$0xff]  ;;  %2564 = vrot.lane.b32.xlu0 %v7137_v51, %s5515_s5  ;;  %v7172_v24 = vld [vmem:[#allocation2 + $0xe8] sm:$0xff]  ;;  %v8890_v33 = vrot.slane %v7145_v8, 1  ;;  %v2431_v29 = vrot.slane %v7151_v30, 1  ;;  %v7270_v10 = vsel %vm560_vm2, %v2429_v18, %v8891_v41 }
 0x2c5   : > { %2182 = vst.msk [vmem:[#allocation2 + $0x1c8] sm:$0xff] %vm230_vm0, %v2150_v22  ;;  %2183 = vst.msk [vmem:[#allocation2 + $0x1d0] sm:$0xff] %vm230_vm0, %v2151_v52  ;;  %2570 = vrot.lane.b32.xlu1 %v7139_v1, %s5515_s5  ;;  %v7174_v3 = vld [vmem:[#allocation2 + $0x110] sm:$0xff]  ;;  %v7180_v13 = vld [vmem:[#allocation2 + $0x108] sm:$0xff]  ;;  %v2433_v63 = vrot.slane %v7172_v24, 1  ;;  %v7278_v5 = vsel %vm560_vm2, %v2430_v54, %v8889_v7  ;;  %v8945_v54 = vrot.slane %v7153_v39, 1 }
 0x2c6   : > { %2184 = vst.msk [vmem:[#allocation2 + $0x1e8] sm:$0xff] %vm230_vm0, %v2152_v40  ;;  %2190 = vst.msk [vmem:[#allocation2 + $0x228] sm:$0xff] %vm230_vm0, %v2152_v40  ;;  %v7186_v56 = vld [vmem:[#allocation2 + $0x130] sm:$0xff]  ;;  %v7188_v38 = vld [vmem:[#allocation2 + $0x128] sm:$0xff]  ;;  %v2434_v52 = vrot.slane %v7180_v13, 1  ;;  %v8946_v7 = vrot.slane %v7160_v55, 1 }
 0x2c7   : > { %2185 = vst.msk [vmem:[#allocation2 + $0x1f0] sm:$0xff] %vm230_vm0, %v2153_v4  ;;  %2187 = vst.msk [vmem:[#allocation2 + $0x210] sm:$0xff] %vm230_vm0, %v2155_v44  ;;  %v7194_v20 = vld [vmem:[#allocation2 + $0x150] sm:$0xff]  ;;  %v7203_v40 = vld [vmem:[#allocation2 + $0x148] sm:$0xff]  ;;  %v2435_v22 = vrot.slane %v7188_v38, 1  ;;  %v8947_v41 = vrot.slane %v7162_v50, 1 }
 0x2c8   : > { %2191 = vst.msk [vmem:[#allocation2 + $0x230] sm:$0xff] %vm230_vm0, %v2153_v4  ;;  %8938 = vst [vmem:[#allocation38_spill] sm:$0xff] %v7143_v43  ;;  %2568 = vrot.lane.b32.xlu0 %v7143_v43, %s5515_s5  ;;  %v2436_v46 = vrot.slane %v7203_v40, 1  ;;  %v7245_v2 = vld [vmem:[#allocation2 + $0x8] sm:$0xff]  ;;  %v2231_v16 = vld [vmem:[#allocation2 + $0x76] sm:$0x1] }
 0x2c9   : > { %8939 = vst [vmem:[#allocation39_spill] sm:$0xff] %v7151_v30  ;;  %8940 = vst [vmem:[#allocation40_spill] sm:$0xff] %v7160_v55  ;;  %2574 = vrot.lane.b32.xlu1 %v7145_v8, %s5515_s5  ;;  %v7205_v32 = vld [vmem:[#allocation2 + $0x170] sm:$0xff]  ;;  %v7207_v4 = vld [vmem:[#allocation2 + $0x168] sm:$0xff]  ;;  %v2426_v19 = vrot.slane %v7245_v2, 1  ;;  %v7307_v61 = vsel %vm560_vm2, %v2433_v63, %v8947_v41  ;;  %v8961_v12 = vrot.slane %v7139_v1, 7 }
 0x2ca   : > { %8941 = vst [vmem:[#allocation41_spill] sm:$0xff] %v7172_v24  ;;  %8942 = vst [vmem:[#allocation42_spill] sm:$0xff] %v7180_v13  ;;  %v7212_v59 = vld [vmem:[#allocation2 + $0x190] sm:$0xff]  ;;  %v7214_v48 = vld [vmem:[#allocation2 + $0x188] sm:$0xff]  ;;  %v2437_v25 = vrot.slane %v7207_v4, 1  ;;  %v8951_v14 = vrot.slane %v7205_v32, 1 }
 0x2cb   : > { %8943 = vst [vmem:[#allocation43_spill] sm:$0xff] %v7188_v38  ;;  %8944 = vst [vmem:[#allocation44_spill] sm:$0xff] %v7203_v40  ;;  %v7216_v27 = vld [vmem:[#allocation2 + $0x1b0] sm:$0xff]  ;;  %v7221_v36 = vld [vmem:[#allocation2 + $0x1a8] sm:$0xff]  ;;  %v2438_v9 = vrot.slane %v7214_v48, 1 }
 0x2cc   : > { %v7223_v35 = vld [vmem:[#allocation2 + $0x1d0] sm:$0xff]  ;;  %v7225_v44 = vld [vmem:[#allocation2 + $0x1c8] sm:$0xff]  ;;  %2572 = vrot.lane.b32.xlu0 %v7151_v30, %s5515_s5  ;;  %v2439_v28 = vrot.slane %v7221_v36, 1  ;;  %2249 = vst.msk [vmem:[#allocation2 + $0x78] sm:$0x1] %vm286_vm1, %v2231_v16  ;;  %v7286_v16 = vsel %vm560_vm2, %v2431_v29, %v8890_v33  ;;  %v7301_v29 = vsel %vm560_vm2, %v8946_v7, %v8945_v54  ;;  %v8949_v7 = vrot.slane %v7186_v56, 1 }
 0x2cd   : > { %v7233_v21 = vld [vmem:[#allocation2 + $0x1e8] sm:$0xff]  ;;  %2578 = vrot.lane.b32.xlu1 %v7153_v39, %s5515_s5  ;;  %v2440_v62 = vrot.slane %v7225_v44, 1  ;;  %v2232_v6 = vld [vmem:[#allocation2 + $0x96] sm:$0x1]  ;;  %v8950_v54 = vrot.slane %v7194_v20, 1 }
 0x2ce   : > { %v7231_v17 = vld [vmem:[#allocation2 + $0x1f0] sm:$0xff]  ;;  %v2441_v11 = vrot.slane %v7233_v21, 1  ;;  %2250 = vst.msk [vmem:[#allocation2 + $0x98] sm:$0x1] %vm286_vm1, %v2232_v6  ;;  %v7322_v41 = vsel %vm560_vm2, %v2435_v22, %v8949_v7  ;;  %v8952_v22 = vrot.slane %v7212_v59, 1  ;;  %v8953_v7 = vrot.slane %v7216_v27, 1 }
 0x2cf   : > { %v7243_v53 = vld [vmem:[#allocation2 + $0x210] sm:$0xff]  ;;  %v2196_v49 = vld [vmem:[#allocation2 + $0x89] sm:$0x1] }
 0x2d0   : > { %v2233_v37 = vld [vmem:[#allocation2 + $0xb6] sm:$0x1]  ;;  %2576 = vrot.lane.b32.xlu0 %v7160_v55, %s5515_s5  ;;  %2214 = vst.msk [vmem:[#allocation2 + $0x87] sm:$0x1] %vm286_vm1, %v2196_v49  ;;  %v8969_v49 = vrot.slane %v7123_v57, 1 }
 0x2d1   : > { %v2234_v18 = vld [vmem:[#allocation2 + $0xd6] sm:$0x1]  ;;  %2582 = vrot.lane.b32.xlu1 %v7162_v50, %s5515_s5  ;;  %2251 = vst.msk [vmem:[#allocation2 + $0xb8] sm:$0x1] %vm286_vm1, %v2233_v37  ;;  %v8948_v37 = vrot.slane %v7174_v3, 1 }
 0x2d2   : > { %2252 = vst.msk [vmem:[#allocation2 + $0xd8] sm:$0x1] %vm286_vm1, %v2234_v18  ;;  %v2235_v33 = vld [vmem:[#allocation2 + $0xf6] sm:$0x1] }
 0x2d3   : > { %v2236_v6 = vld [vmem:[#allocation2 + $0x116] sm:$0x1]  ;;  %2253 = vst.msk [vmem:[#allocation2 + $0xf8] sm:$0x1] %vm286_vm1, %v2235_v33  ;;  %v7315_v18 = vsel %vm560_vm2, %v2434_v52, %v8948_v37  ;;  %v7328_v33 = vsel %vm560_vm2, %v2436_v46, %v8950_v54  ;;  %v7334_v52 = vsel %vm560_vm2, %v2437_v25, %v8951_v14  ;;  %v7343_v46 = vsel %vm560_vm2, %v2438_v9, %v8952_v22 }
 0x2d4   : > { %v2237_v15 = vld [vmem:[#allocation2 + $0x136] sm:$0x1]  ;;  %2254 = vst.msk [vmem:[#allocation2 + $0x118] sm:$0x1] %vm286_vm1, %v2236_v6  ;;  %v7349_v14 = vsel %vm560_vm2, %v2439_v28, %v8953_v7  ;;  %v8954_v25 = vrot.slane %v7065_v42, 7  ;;  %v8956_v9 = vrot.slane %v7223_v35, 1  ;;  %2580 = vrot.lane.b32.xlu0 %v7172_v24, %s5515_s5 }
 0x2d5   : > { %2255 = vst.msk [vmem:[#allocation2 + $0x138] sm:$0x1] %vm286_vm1, %v2237_v15  ;;  %v2238_v63 = vld [vmem:[#allocation2 + $0x156] sm:$0x1]  ;;  %v8957_v22 = vrot.slane %v7118_v47, 7  ;;  %v8958_v7 = vrot.slane %v7137_v51, 7  ;;  %2586 = vrot.lane.b32.xlu1 %v7174_v3, %s5515_s5 }
 0x2d6   : > { %v2239_v6 = vld [vmem:[#allocation2 + $0x176] sm:$0x1]  ;;  %2256 = vst.msk [vmem:[#allocation2 + $0x158] sm:$0x1] %vm286_vm1, %v2238_v63  ;;  %v8955_v63 = vrot.slane %v7116_v60, 7  ;;  %v7366_v28 = vsel %vm560_vm2, %v2440_v62, %v8956_v9  ;;  %v8962_v62 = vrot.slane %v7143_v43, 7  ;;  %v7417_v43 = vsel %vm560_vm2, %v2426_v19, %v8969_v49 }
 0x2d7   : > { %v2240_v15 = vld [vmem:[#allocation2 + $0x196] sm:$0x1]  ;;  %2257 = vst.msk [vmem:[#allocation2 + $0x178] sm:$0x1] %vm286_vm1, %v2239_v6  ;;  %v2194_v6 = vld [vmem:[#allocation2 + $0x49] sm:$0x1] }
 0x2d8   : > { %2258 = vst.msk [vmem:[#allocation2 + $0x198] sm:$0x1] %vm286_vm1, %v2240_v15  ;;  %v2241_v37 = vld [vmem:[#allocation2 + $0x1b6] sm:$0x1]  ;;  %v7357_v54 = vsel %vm469_vm3, %v8955_v63, %v8954_v25  ;;  %2212 = vst.msk [vmem:[#allocation2 + $0x47] sm:$0x1] %vm286_vm1, %v2194_v6  ;;  %v7374_v25 = vsel %vm469_vm3, %v8958_v7, %v8957_v22  ;;  %v7388_v9 = vsel %vm469_vm3, %v8962_v62, %v8961_v12  ;;  %2584 = vrot.lane.b32.xlu0 %v7180_v13, %s5515_s5 }
 0x2d9   : > { %v2242_v15 = vld [vmem:[#allocation2 + $0x1d6] sm:$0x1]  ;;  %2259 = vst.msk [vmem:[#allocation2 + $0x1b8] sm:$0x1] %vm286_vm1, %v2241_v37  ;;  %v2195_v63 = vld [vmem:[#allocation2 + $0x69] sm:$0x1]  ;;  %2590 = vrot.lane.b32.xlu1 %v7186_v56, %s5515_s5 }
 0x2da   : > { %2260 = vst.msk [vmem:[#allocation2 + $0x1d8] sm:$0x1] %vm286_vm1, %v2242_v15  ;;  %v2243_v37 = vld [vmem:[#allocation2 + $0x1f6] sm:$0x1]  ;;  %v8959_v6 = vrot.slane %v7231_v17, 1  ;;  %v8963_v22 = vrot.slane %v7243_v53, 1 }
 0x2db   : > { %2213 = vst.msk [vmem:[#allocation2 + $0x67] sm:$0x1] %vm286_vm1, %v2195_v63  ;;  %2261 = vst.msk [vmem:[#allocation2 + $0x1f8] sm:$0x1] %vm286_vm1, %v2243_v37  ;;  %v8964_v7 = vrot.slane %v7108_v23, 1  ;;  %v8967_v62 = vrot.slane %v7151_v30, 7 }
 0x2dc   : > { %v7380_v15 = vsel %vm560_vm2, %v2441_v11, %v8959_v6  ;;  %v2244_v11 = vld [vmem:[#allocation2 + $0x216] sm:$0x1]  ;;  %v8966_v6 = vrot.slane %v7145_v8, 7  ;;  %v2197_v37 = vld [vmem:[#allocation2 + $0xa9] sm:$0x1]  ;;  %8970 = vst [vmem:[#allocation48_spill] sm:$0xff] %v7417_v43  ;;  %2588 = vrot.lane.b32.xlu0 %v7188_v38, %s5515_s5 }
 0x2dd   : > { %8960 = vst [vmem:[#allocation45_spill] sm:$0xff] %v7380_v15  ;;  %v7403_v12 = vsel %vm560_vm2, %v8964_v7, %v8963_v22  ;;  %2262 = vst.msk [vmem:[#allocation2 + $0x218] sm:$0x1] %vm286_vm1, %v2244_v11  ;;  %v8971_v22 = vrot.slane %v7153_v39, 7  ;;  %v8972_v7 = vrot.slane %v7160_v55, 7  ;;  %v8975_v19 = vrot.slane %v7172_v24, 7  ;;  %2594 = vrot.lane.b32.xlu1 %v7194_v20, %s5515_s5 }
 0x2de   : > { %8965 = vst [vmem:[#allocation46_spill] sm:$0xff] %v7403_v12  ;;  %v7411_v63 = vsel %vm469_vm3, %v8967_v62, %v8966_v6  ;;  %2215 = vst.msk [vmem:[#allocation2 + $0xa7] sm:$0x1] %vm286_vm1, %v2197_v37  ;;  %v2198_v6 = vld [vmem:[#allocation2 + $0xc9] sm:$0x1]  ;;  %v8974_v62 = vrot.slane %v7162_v50, 7 }
 0x2df   : > { %8968 = vst [vmem:[#allocation47_spill] sm:$0xff] %v7411_v63  ;;  %v7427_v30 = vsel %vm469_vm3, %v8972_v7, %v8971_v22  ;;  %2216 = vst.msk [vmem:[#allocation2 + $0xc7] sm:$0x1] %vm286_vm1, %v2198_v6  ;;  %v2199_v37 = vld [vmem:[#allocation2 + $0xe9] sm:$0x1]  ;;  %v8977_v43 = vrot.slane %v7174_v3, 7 }
 0x2e0   : > { %8973 = vst [vmem:[#allocation49_spill] sm:$0xff] %v7427_v30  ;;  %v7436_v11 = vsel %vm469_vm3, %v8975_v19, %v8974_v62  ;;  %v2245_v49 = vld [vmem:[#allocation2 + $0x236] sm:$0x1]  ;;  %v8978_v55 = vrot.slane %v7180_v13, 7  ;;  %2217 = vst.msk [vmem:[#allocation2 + $0xe7] sm:$0x1] %vm286_vm1, %v2199_v37  ;;  %2592 = vrot.lane.b32.xlu0 %v7203_v40, %s5515_s5 }
 0x2e1   : > { %8976 = vst [vmem:[#allocation50_spill] sm:$0xff] %v7436_v11  ;;  %2263 = vst.msk [vmem:[#allocation2 + $0x238] sm:$0x1] %vm286_vm1, %v2245_v49  ;;  %v8980_v7 = vrot.slane %v7186_v56, 7  ;;  %v8981_v6 = vrot.slane %v7188_v38, 7  ;;  %v8983_v19 = vrot.slane %v7194_v20, 7  ;;  %2598 = vrot.lane.b32.xlu1 %v7205_v32, %s5515_s5 }
 0x2e2   : > { %v7444_v22 = vsel %vm469_vm3, %v8978_v55, %v8977_v43  ;;  %v8984_v24 = vrot.slane %v7203_v40, 7  ;;  %v8986_v55 = vrot.slane %v7205_v32, 7  ;;  %v8987_v37 = vrot.slane %v7207_v4, 7  ;;  %v2201_v38 = vld [vmem:[#allocation2 + $0x129] sm:$0x1]  ;;  %v4310_v11 = vld [vmem:[%s8856_s2 + $0x70] sm:$0xff] }
 0x2e3   : > { %8979 = vst [vmem:[#allocation51_spill] sm:$0xff] %v7444_v22  ;;  %v7454_v62 = vsel %vm469_vm3, %v8981_v6, %v8980_v7  ;;  %v2385_v6 = vrot.slane %v7216_v27, 7  ;;  %2219 = vst.msk [vmem:[#allocation2 + $0x127] sm:$0x1] %vm286_vm1, %v2201_v38  ;;  %v2202_v13 = vld [vmem:[#allocation2 + $0x149] sm:$0x1] }
 0x2e4   : > { %8982 = vst [vmem:[#allocation52_spill] sm:$0xff] %v7454_v62  ;;  %v7462_v43 = vsel %vm469_vm3, %v8984_v24, %v8983_v19  ;;  %v7470_v49 = vsel %vm469_vm3, %v8987_v37, %v8986_v55  ;;  %v2384_v24 = vrot.slane %v7212_v59, 7  ;;  %v2200_v55 = vld [vmem:[#allocation2 + $0x109] sm:$0x1]  ;;  %v2386_v37 = vrot.slane %v7223_v35, 7  ;;  %v4308_v62 = vld [vmem:[%s8856_s2 + $0x60] sm:$0xff]  ;;  %2596 = vrot.lane.b32.xlu0 %v7207_v4, %s5515_s5 }
 0x2e5   : > { %8985 = vst [vmem:[#allocation53_spill] sm:$0xff] %v7462_v43  ;;  %8988 = vst [vmem:[#allocation54_spill] sm:$0xff] %v7470_v49  ;;  %v2387_v43 = vrot.slane %v7231_v17, 7  ;;  %v2203_v19 = vld [vmem:[#allocation2 + $0x169] sm:$0x1]  ;;  %v2372_v7 = vrot.slane %v7123_v57, 7  ;;  %2602 = vrot.lane.b32.xlu1 %v7212_v59, %s5515_s5 }
 0x2e6   : > { %2218 = vst.msk [vmem:[#allocation2 + $0x107] sm:$0x1] %vm286_vm1, %v2200_v55  ;;  %v4309_v22 = vld [vmem:[%s8856_s2 + $0x68] sm:$0xff]  ;;  %v2388_v55 = vrot.slane %v7243_v53, 7  ;;  %2220 = vst.msk [vmem:[#allocation2 + $0x147] sm:$0x1] %vm286_vm1, %v2202_v13 }
 0x2e7   : > { %2221 = vst.msk [vmem:[#allocation2 + $0x167] sm:$0x1] %vm286_vm1, %v2203_v19  ;;  %v2204_v38 = vld [vmem:[#allocation2 + $0x189] sm:$0x1]  ;;  %v8989_v30 = vrot.slane %v7214_v48, 7  ;;  %v5203_v49 = vpack.c.bf16 %v4309_v22, %v4308_v62  ;;  %v4311_v13 = vld [vmem:[%s8856_s2 + $0x78] sm:$0xff] }
 0x2e8   : > { %2222 = vst.msk [vmem:[#allocation2 + $0x187] sm:$0x1] %vm286_vm1, %v2204_v38  ;;  %v2205_v63 = vld [vmem:[#allocation2 + $0x1a9] sm:$0x1]  ;;  %v8991_v15 = vrot.slane %v7221_v36, 7  ;;  %v5207_v22 = vpack.c.bf16 %v4311_v13, %v4310_v11  ;;  %v8992_v62 = vrot.slane %v7225_v44, 7  ;;  %2600 = vrot.lane.b32.xlu0 %v7214_v48, %s5515_s5 }
 0x2e9   : > { %v7513_v12 = vsel %vm469_vm3, %v8989_v30, %v2384_v24  ;;  %v2206_v19 = vld [vmem:[#allocation2 + $0x1c9] sm:$0x1]  ;;  %2223 = vst.msk [vmem:[#allocation2 + $0x1a7] sm:$0x1] %vm286_vm1, %v2205_v63  ;;  %5204 = vmatprep.subr.bf16.mxu1 %v5203_v49  ;;  %v8994_v11 = vrot.slane %v7108_v23, 7  ;;  %2606 = vrot.lane.b32.xlu1 %v7216_v27, %s5515_s5 }
 0x2ea   : > { %8990 = vst [vmem:[#allocation55_spill] sm:$0xff] %v7513_v12  ;;  %v7523_v40 = vsel %vm469_vm3, %v8991_v15, %v2385_v6  ;;  %2224 = vst.msk [vmem:[#allocation2 + $0x1c7] sm:$0x1] %vm286_vm1, %v2206_v19  ;;  %v2207_v30 = vld [vmem:[#allocation2 + $0x1e9] sm:$0x1]  ;;  %v7531_v12 = vsel %vm469_vm3, %v8992_v62, %v2386_v37  ;;  %v4312_v15 = vld [vmem:[%s8856_s2 + $0x80] sm:$0xff]  ;;  %5206 = vmatpush3.bf16.msra.mxu1 %v5203_v49 }
 0x2eb   : > { %v2192_v24 = vld [vmem:[#allocation2 + $0x9] sm:$0x1]  ;;  %v8993_v6 = vrot.slane %v7233_v21, 7  ;;  %2225 = vst.msk [vmem:[#allocation2 + $0x1e7] sm:$0x1] %vm286_vm1, %v2207_v30  ;;  %v7556_v37 = vsel %vm469_vm3, %v8994_v11, %v2388_v55  ;;  %5208 = vmatprep.subr.bf16.mxu1 %v5207_v22  ;;  %v4315_v49 = vld [vmem:[%s8856_s2 + $0x98] sm:$0xff] }
 0x2ec   : > { %v2209_v38 = vld [vmem:[#allocation2 + $0x229] sm:$0x1]  ;;  %2210 = vst.msk [vmem:[#allocation2 + $0x7] sm:$0x1] %vm286_vm1, %v2192_v24  ;;  %v4314_v24 = vld [vmem:[%s8856_s2 + $0x90] sm:$0xff]  ;;  %v4316_v55 = vld [vmem:[%s8856_s2 + $0xa0] sm:$0xff]  ;;  %2604 = vrot.lane.b32.xlu0 %v7221_v36, %s5515_s5 }
 0x2ed   : > { %v4313_v63 = vld [vmem:[%s8856_s2 + $0x88] sm:$0xff]  ;;  %v7543_v19 = vsel %vm469_vm3, %v8993_v6, %v2387_v43  ;;  %2227 = vst.msk [vmem:[#allocation2 + $0x227] sm:$0x1] %vm286_vm1, %v2209_v38  ;;  %v8995_v43 = vrot.slane %v7245_v2, 7  ;;  %2610 = vrot.lane.b32.xlu1 %v7223_v35, %s5515_s5  ;;  %v2271_v6 = vld [vmem:[#allocation2 + $0x38] sm:$0xff]  ;;  %v2876_v11 = vld [vmem:[%s8856_s2] sm:$0xff] }
 0x2ee   : > { %v5211_v30 = vpack.c.bf16 %v4313_v63, %v4312_v15  ;;  %5210 = vmatpush3.bf16.msra.mxu1 %v5207_v22  ;;  %v4317_v38 = vld [vmem:[%s8856_s2 + $0xa8] sm:$0xff]  ;;  %v4318_v22 = vld [vmem:[%s8856_s2 + $0xb0] sm:$0xff]  ;;  %v4319_v15 = vld [vmem:[%s8856_s2 + $0xb8] sm:$0xff] }
 0x2ef   : > { %v7562_v13 = vsel %vm469_vm3, %v8995_v43, %v2372_v7  ;;  %v5215_v7 = vpack.c.bf16 %v4315_v49, %v4314_v24  ;;  %v5219_v62 = vpack.c.bf16 %v4317_v38, %v4316_v55  ;;  %v5223_v63 = vpack.c.bf16 %v4319_v15, %v4318_v22  ;;  %v2877_v43 = vld [vmem:[%s8856_s2 + $0x8] sm:$0xff]  ;;  %v2275_v49 = vld [vmem:[#allocation2 + $0x58] sm:$0xff] }
 0x2f0   : > { %5212 = vmatprep.subr.bf16.mxu1 %v5211_v30  ;;  %2608 = vrot.lane.b32.xlu0 %v7225_v44, %s5515_s5  ;;  %v2463_v24 = vrot.slane %v2271_v6, 1  ;;  %v2464_v38 = vrot.slane %v2275_v49, 1  ;;  %v8997_v22 = vrot.slane %v7065_v42, 1  ;;  %v8998_v6 = vrot.slane %v7118_v47, 1  ;;  %v2287_v42 = vld [vmem:[#allocation2 + $0xb8] sm:$0xff] }
 0x2f1   : > { %2614 = vrot.lane.b32.xlu1 %v7231_v17, %s5515_s5  ;;  %v2467_v49 = vrot.slane %v2287_v42, 1  ;;  %v2291_v47 = vld [vmem:[#allocation2 + $0xd8] sm:$0xff]  ;;  %v2268_v42 = vld [vmem:[#allocation2 + $0x20] sm:$0xff] }
 0x2f2   : > { %5214 = vmatpush3.bf16.msra.mxu1 %v5211_v30  ;;  %v7604_v30 = vpack.c.bf16 %v2877_v43, %v2876_v11  ;;  %v2482_v15 = vsel %vm560_vm2, %v8997_v22, %v2464_v38  ;;  %v9001_v38 = vrot.slane %v7153_v39, 1  ;;  %v9002_v22 = vrot.slane %v7162_v50, 1  ;;  %v2303_v39 = vld [vmem:[#allocation2 + $0x138] sm:$0xff] }
 0x2f3   : > { %5216 = vmatprep.subr.bf16.mxu1 %v5215_v7  ;;  %v2307_v50 = vld [vmem:[#allocation2 + $0x158] sm:$0xff] }
 0x2f4   : > { %2612 = vrot.lane.b32.xlu0 %v7233_v21, %s5515_s5 }
 0x2f5   : > { %2618 = vrot.lane.b32.xlu1 %v7243_v53, %s5515_s5 }
 0x2f6   : > { %5218 = vmatpush3.bf16.msra.mxu1 %v5215_v7  ;;  %v8996_v7 = vrot.slane %v6979_v26, 1  ;;  %v2283_v26 = vld [vmem:[#allocation2 + $0x98] sm:$0xff] }
 0x2f7   : > { %5220 = vmatprep.subr.bf16.mxu1 %v5219_v62  ;;  %v2466_v43 = vrot.slane %v2283_v26, 1  ;;  %v2471_v26 = vrot.slane %v2303_v39, 1  ;;  %v9010_v39 = vrot.slane %v7223_v35, 1 }
 0x2f8   : > { %2616 = vrot.lane.b32.xlu0 %v7108_v23, %s5515_s5  ;;  %v2481_v55 = vsel %vm560_vm2, %v8996_v7, %v2463_v24  ;;  %v8999_v24 = vrot.slane %v7139_v1, 1  ;;  %v9000_v7 = vrot.slane %v7145_v8, 1  ;;  %v2295_v1 = vld [vmem:[#allocation2 + $0xf8] sm:$0xff] }
 0x2f9   : > { %2554 = vrot.lane.b32.xlu1 %v7123_v57, %s5515_s5  ;;  %v2299_v8 = vld [vmem:[#allocation2 + $0x118] sm:$0xff] }
 0x2fa   : > { %5222 = vmatpush3.bf16.msra.mxu1 %v5219_v62  ;;  %v2279_v62 = vld [vmem:[#allocation2 + $0x78] sm:$0xff] }
 0x2fb   : > { %5224 = vmatprep.subr.bf16.mxu1 %v5223_v63 }
 0x2fc   : > { %2552 = vrot.lane.b32.xlu0 %v7245_v2, %s5515_s5 }
 0x2fd   : > { %2702 = vrot.lane.b32.xlu1 %v2481_v55, %s5516_s6  ;;  %v2468_v55 = vrot.slane %v2291_v47, 1  ;;  %v9006_v47 = vrot.slane %v7205_v32, 1  ;;  %v9008_v32 = vrot.slane %v7212_v59, 1 }
 0x2fe   : > { %5226 = vmatpush3.bf16.msra.mxu1 %v5223_v63  ;;  %v2465_v63 = vrot.slane %v2279_v62, 1  ;;  %v2469_v62 = vrot.slane %v2295_v1, 1 }
 0x2ff   : > { %5228 = vmatprep.subr.bf16.mxu1 %v7604_v30 }
 0x300   : > { %2700 = vrot.lane.b32.xlu0 %v7114_v45, %s5516_s6  ;;  %v2483_v11 = vsel %vm560_vm2, %v8998_v6, %v2465_v63  ;;  %v2484_v45 = vsel %vm560_vm2, %v8999_v24, %v2466_v43  ;;  %v9003_v63 = vrot.slane %v7174_v3, 1  ;;  %v9004_v6 = vrot.slane %v7186_v56, 1  ;;  %v2311_v3 = vld [vmem:[#allocation2 + $0x178] sm:$0xff] }
 0x301   : > { %2706 = vrot.lane.b32.xlu1 %v2482_v15, %s5516_s6  ;;  %v2470_v15 = vrot.slane %v2299_v8, 1  ;;  %v9005_v24 = vrot.slane %v7194_v20, 1  ;;  %v2272_v8 = vld [vmem:[#allocation2 + $0x40] sm:$0xff] }
 0x304   : > { %2704 = vrot.lane.b32.xlu0 %v7261_v58, %s5516_s6  ;;  %v2485_v58 = vsel %vm560_vm2, %v9000_v7, %v2467_v49  ;;  %v2337_v49 = vrot.slane %v2268_v42, 7  ;;  %v2267_v42 = vld [vmem:[#allocation2 + $0x18] sm:$0xff] }
 0x305   : > { %2710 = vrot.lane.b32.xlu1 %v2483_v11, %s5516_s6  ;;  %v2472_v11 = vrot.slane %v2307_v50, 1 }
 0x308   : > { %2708 = vrot.lane.b32.xlu0 %v7270_v10, %s5516_s6  ;;  %v2486_v10 = vsel %vm560_vm2, %v9001_v38, %v2468_v55  ;;  %v9007_v55 = vrot.slane %v7013_v0, 7  ;;  %v9009_v0 = vrot.slane %v7216_v27, 1 }
 0x309   : > { %2714 = vrot.lane.b32.xlu1 %v2484_v45, %s5516_s6  ;;  %v2473_v45 = vrot.slane %v2311_v3, 1 }
 0x30b   : > { %v2491_v20 = vsel %vm560_vm2, %v9006_v47, %v2473_v45 }
 0x30c   : > { %2712 = vrot.lane.b32.xlu0 %v7278_v5, %s5516_s6  ;;  %v2487_v5 = vsel %vm560_vm2, %v9002_v22, %v2469_v62 }
 0x30d   : > { %2718 = vrot.lane.b32.xlu1 %v2485_v58, %s5516_s6 }
 0x310   : > { %2716 = vrot.lane.b32.xlu0 %v7286_v16, %s5516_s6  ;;  %v2488_v16 = vsel %vm560_vm2, %v9003_v63, %v2470_v15  ;;  %v2338_v15 = vrot.slane %v2272_v8, 7  ;;  %v2276_v63 = vld [vmem:[#allocation2 + $0x60] sm:$0xff] }
 0x311   : > { %2722 = vrot.lane.b32.xlu1 %v2486_v10, %s5516_s6  ;;  %v9020_v8 = vld [vmem:[#allocation46_spill] sm:$0xff] }
 0x314   : > { %2720 = vrot.lane.b32.xlu0 %v7301_v29, %s5516_s6  ;;  %v2489_v29 = vsel %vm560_vm2, %v9004_v6, %v2471_v26  ;;  %v9011_v26 = vrot.slane %v7116_v60, 7 }
 0x315   : > { %2726 = vrot.lane.b32.xlu1 %v2487_v5, %s5516_s6  ;;  %v2327_v5 = vld [vmem:[#allocation2 + $0x1f8] sm:$0xff] }
 0x318   : > { %2724 = vrot.lane.b32.xlu0 %v7307_v61, %s5516_s6  ;;  %v2490_v61 = vsel %vm560_vm2, %v9005_v24, %v2472_v11  ;;  %v9013_v24 = vrot.slane %v7137_v51, 7  ;;  %v2462_v51 = vrot.slane %v2267_v42, 1 }
 0x319   : > { %2730 = vrot.lane.b32.xlu1 %v2488_v16, %s5516_s6  ;;  %v2477_v16 = vrot.slane %v2327_v5, 1 }
 0x31c   : > { %2728 = vrot.lane.b32.xlu0 %v7315_v18, %s5516_s6  ;;  %v2315_v18 = vld [vmem:[#allocation2 + $0x198] sm:$0xff] }
 0x31d   : > { %2734 = vrot.lane.b32.xlu1 %v2489_v29, %s5516_s6  ;;  %v2474_v7 = vrot.slane %v2315_v18, 1  ;;  %v2339_v29 = vrot.slane %v2276_v63, 7 }
 0x31f   : > { %v2559_v43 = vpop.permute.xlu1 %2558  ;;  %v2492_v38 = vsel %vm560_vm2, %v9008_v32, %v2474_v7  ;;  %v9015_v7 = vld [vmem:[#allocation45_spill] sm:$0xff] }
 0x320   : > { %v7680_v56 = vsel %vm230_vm0, %v7131_v31, %v2559_v43  ;;  %2732 = vrot.lane.b32.xlu0 %v7322_v41, %s5516_s6  ;;  %v2319_v31 = vld [vmem:[#allocation2 + $0x1b8] sm:$0xff]  ;;  %v2409_v41 = vsel %vm469_vm3, %v2337_v49, %v9007_v55  ;;  %v2280_v43 = vld [vmem:[#allocation2 + $0x80] sm:$0xff] }
 0x321   : > { %2738 = vrot.lane.b32.xlu1 %v2490_v61, %s5516_s6  ;;  %v2475_v10 = vrot.slane %v2319_v31, 1  ;;  %v2411_v61 = vsel %vm469_vm3, %v2339_v29, %v9013_v24  ;;  %v2340_v18 = vrot.slane %v2280_v43, 7  ;;  %v9016_v31 = vld [vmem:[#allocation38_spill] sm:$0xff]  ;;  %v7795_v29 = vld [vmem:[#allocation2 + $0x228] sm:$0xff] }
 0x323   : > { %v2493_v62 = vsel %vm560_vm2, %v9009_v0, %v2475_v10 }
 0x324   : > { %2736 = vrot.lane.b32.xlu0 %v7328_v33, %s5516_s6  ;;  %v2323_v33 = vld [vmem:[#allocation2 + $0x1d8] sm:$0xff] }
 0x325   : > { %2742 = vrot.lane.b32.xlu1 %v2491_v20, %s5516_s6  ;;  %v2476_v22 = vrot.slane %v2323_v33, 1  ;;  %v2284_v20 = vld [vmem:[#allocation2 + $0xa0] sm:$0xff]  ;;  %v9019_v33 = vrot.slane %v7123_v57, 1 }
 0x326   : > { %v2557_v58 = vpop.permute.xlu0 %2556  ;;  %v2341_v32 = vrot.slane %v2284_v20, 7  ;;  %v2296_v20 = vld [vmem:[#allocation2 + $0x100] sm:$0xff] }
 0x327   : > { %v7697_v1 = vsel %vm230_vm0, %v2409_v41, %v2557_v58  ;;  %v2494_v27 = vsel %vm560_vm2, %v9010_v39, %v2476_v22  ;;  %v9017_v58 = vrot.slane %v9016_v31, 7  ;;  %v2480_v0 = vsel %vm560_vm2, %v9019_v33, %v2462_v51  ;;  %v2335_v22 = vld [vmem:[#allocation2 + $0x238] sm:$0xff] }
 0x328   : > { %2740 = vrot.lane.b32.xlu0 %v7334_v52, %s5516_s6  ;;  %v9028_v51 = vld [vmem:[#allocation41_spill] sm:$0xff] }
 0x329   : > { %2746 = vrot.lane.b32.xlu1 %v2492_v38, %s5516_s6  ;;  %v2412_v55 = vsel %vm469_vm3, %v2340_v18, %v9017_v58  ;;  %v9018_v38 = vld [vmem:[#allocation47_spill] sm:$0xff]  ;;  %v9027_v18 = vld [vmem:[#allocation50_spill] sm:$0xff] }
 0x32c   : > { %2744 = vrot.lane.b32.xlu0 %v7343_v46, %s5516_s6  ;;  %v2331_v46 = vld [vmem:[#allocation2 + $0x218] sm:$0xff] }
 0x32d   : > { %2750 = vrot.lane.b32.xlu1 %v2493_v62, %s5516_s6  ;;  %v2563_v59 = vpop.permute.xlu1 %2562  ;;  %v2478_v60 = vrot.slane %v2331_v46, 1  ;;  %v2288_v62 = vld [vmem:[#allocation2 + $0xc0] sm:$0xff]  ;;  %v9023_v46 = vld [vmem:[#allocation49_spill] sm:$0xff] }
 0x32e   : > { %v7715_v52 = vsel %vm230_vm0, %v7357_v54, %v2563_v59  ;;  %v2410_v54 = vsel %vm469_vm3, %v2338_v15, %v9011_v26  ;;  %v9021_v59 = vld [vmem:[#allocation39_spill] sm:$0xff]  ;;  %v2342_v63 = vrot.slane %v2288_v62, 7  ;;  %v9031_v62 = vld [vmem:[#allocation42_spill] sm:$0xff] }
 0x32f   : > { %v9022_v5 = vrot.slane %v9021_v59, 7 }
 0x330   : > { %2748 = vrot.lane.b32.xlu0 %v7349_v14, %s5516_s6  ;;  %v9012_v14 = vrot.slane %v7231_v17, 1 }
 0x331   : > { %2754 = vrot.lane.b32.xlu1 %v2494_v27, %s5516_s6  ;;  %v2413_v15 = vsel %vm469_vm3, %v2341_v32, %v9022_v5 }
 0x332   : > { %v2561_v50 = vpop.permute.xlu0 %2560  ;;  %v2495_v3 = vsel %vm560_vm2, %v9012_v14, %v2477_v16  ;;  %v7782_v16 = vld [vmem:[#allocation2 + $0x230] sm:$0xff] }
 0x333   : > { %v2567_v6 = vpop.permute.xlu1 %2566  ;;  %v7729_v35 = vsel %vm230_vm0, %v2410_v54, %v2561_v50  ;;  %v2292_v54 = vld [vmem:[#allocation2 + $0xe0] sm:$0xff]  ;;  %v2479_v50 = vrot.slane %v2335_v22, 1  ;;  %v2461_v14 = vrot.slane %v7782_v16, 1 }
 0x334   : > { %v7733_v11 = vsel %vm230_vm0, %v7374_v25, %v2567_v6  ;;  %2752 = vrot.lane.b32.xlu0 %v7366_v28, %s5516_s6  ;;  %v9014_v28 = vrot.slane %v7243_v53, 1  ;;  %v9024_v6 = vld [vmem:[#allocation48_spill] sm:$0xff] }
 0x335   : > { %2758 = vrot.lane.b32.xlu1 %v2495_v3, %s5516_s6  ;;  %v9025_v3 = vld [vmem:[#allocation40_spill] sm:$0xff] }
 0x336   : > { %v2565_v25 = vpop.permute.xlu0 %2564  ;;  %v2496_v47 = vsel %vm560_vm2, %v9014_v28, %v2478_v60  ;;  %v9026_v43 = vrot.slane %v9025_v3, 7 }
 0x337   : > { %v2571_v45 = vpop.permute.xlu1 %2570  ;;  %v7747_v17 = vsel %vm230_vm0, %v2411_v61, %v2565_v25  ;;  %v2343_v61 = vrot.slane %v2292_v54, 7  ;;  %v9034_v54 = vld [vmem:[#allocation43_spill] sm:$0xff] }
 0x338   : > { %v7751_v49 = vsel %vm230_vm0, %v7388_v9, %v2571_v45  ;;  %2756 = vrot.lane.b32.xlu0 %v9015_v7, %s5516_s6  ;;  %v2414_v60 = vsel %vm469_vm3, %v2342_v63, %v9026_v43  ;;  %v2443_v45 = vrot.slane %v7795_v29, 1  ;;  %v9029_v7 = vrot.slane %v9028_v51, 7 }
 0x339   : > { %2762 = vrot.lane.b32.xlu1 %v2496_v47, %s5516_s6  ;;  %v2497_v47 = vsel %vm560_vm2, %v2461_v14, %v2479_v50  ;;  %v9035_v50 = vrot.slane %v9034_v54, 7 }
 0x33a   : > { %v2569_v41 = vpop.permute.xlu0 %2568  ;;  %v2415_v31 = vsel %vm469_vm3, %v2343_v61, %v9029_v7  ;;  %v2515_v32 = vsel %vm560_vm2, %v2443_v45, %v2461_v14  ;;  %v2308_v61 = vld [vmem:[#allocation2 + $0x160] sm:$0xff]  ;;  %v9037_v45 = vld [vmem:[#allocation44_spill] sm:$0xff] }
 0x33b   : > { %v2575_v9 = vpop.permute.xlu1 %2574  ;;  %v7765_v53 = vsel %vm230_vm0, %v2412_v55, %v2569_v41  ;;  %v2344_v41 = vrot.slane %v2296_v20, 7  ;;  %v2347_v7 = vrot.slane %v2308_v61, 7 }
 0x33c   : > { %v7769_v10 = vsel %vm230_vm0, %v9018_v38, %v2575_v9  ;;  %2760 = vrot.lane.b32.xlu0 %v9020_v8, %s5516_s6  ;;  %v9030_v38 = vld [vmem:[#allocation51_spill] sm:$0xff]  ;;  %v9032_v8 = vrot.slane %v9031_v62, 7 }
 0x33d   : > { %2698 = vrot.lane.b32.xlu1 %v2480_v0, %s5516_s6  ;;  %v2300_v0 = vld [vmem:[#allocation2 + $0x120] sm:$0xff] }
 0x33e   : > { %v2573_v39 = vpop.permute.xlu0 %2572  ;;  %v2416_v22 = vsel %vm469_vm3, %v2344_v41, %v9032_v8  ;;  %v2312_v41 = vld [vmem:[#allocation2 + $0x180] sm:$0xff] }
 0x33f   : > { %v2579_v27 = vpop.permute.xlu1 %2578  ;;  %v7785_v57 = vsel %vm230_vm0, %v2413_v15, %v2573_v39  ;;  %v2345_v15 = vrot.slane %v2300_v0, 7  ;;  %v2348_v8 = vrot.slane %v2312_v41, 7 }
 0x340   : > { %v7789_v26 = vsel %vm230_vm0, %v9023_v46, %v2579_v27  ;;  %2696 = vrot.lane.b32.xlu0 %v9024_v6, %s5516_s6  ;;  %v9033_v27 = vld [vmem:[#allocation52_spill] sm:$0xff]  ;;  %v2304_v46 = vld [vmem:[#allocation2 + $0x140] sm:$0xff] }
 0x341   : > { %2622 = vrot.lane.b32.xlu1 %v7782_v16, %s5515_s5  ;;  %v2417_v6 = vsel %vm469_vm3, %v2345_v15, %v9035_v50  ;;  %v2346_v43 = vrot.slane %v2304_v46, 7  ;;  %v2316_v15 = vld [vmem:[#allocation2 + $0x1a0] sm:$0xff] }
 0x342   : > { %v2577_v42 = vpop.permute.xlu0 %2576  ;;  %v2349_v50 = vrot.slane %v2316_v15, 7 }
 0x343   : > { %v2583_v24 = vpop.permute.xlu1 %2582  ;;  %v7803_v25 = vsel %vm230_vm0, %v2414_v60, %v2577_v42  ;;  %v9036_v42 = vld [vmem:[#allocation53_spill] sm:$0xff] }
 0x344   : > { %v7808_v28 = vsel %vm230_vm0, %v9027_v18, %v2583_v24  ;;  %2620 = vrot.lane.b32.xlu0 %v7795_v29, %s5515_s5  ;;  %v9038_v18 = vrot.slane %v9037_v45, 7 }
 0x345   : > { %2766 = vrot.lane.b32.xlu1 %v2497_v47, %s5516_s6 }
 0x346   : > { %v2581_v58 = vpop.permute.xlu0 %2580  ;;  %v2418_v47 = vsel %vm469_vm3, %v2346_v43, %v9038_v18  ;;  %v9043_v43 = vrot.slane %v7221_v36, 7 }
 0x347   : > { %v2587_v55 = vpop.permute.xlu1 %2586  ;;  %v7820_v9 = vsel %vm230_vm0, %v2415_v31, %v2581_v58  ;;  %v9039_v58 = vld [vmem:[#allocation54_spill] sm:$0xff] }
 0x348   : > { %v7826_v33 = vsel %vm230_vm0, %v9030_v38, %v2587_v55  ;;  %2764 = vrot.lane.b32.xlu0 %v2515_v32, %s5516_s6  ;;  %v9040_v32 = vrot.slane %v7207_v4, 7  ;;  %s8779_s6 = scalar_lea.hbm %s8858_s4, %s4434_s22 }
 0x34a   : > { %v2585_v59 = vpop.permute.xlu0 %2584  ;;  %v2419_v38 = vsel %vm469_vm3, %v2347_v7, %v9040_v32 }
 0x34b   : > { %v2591_v5 = vpop.permute.xlu1 %2590  ;;  %v7834_v39 = vsel %vm230_vm0, %v2416_v22, %v2585_v59  ;;  %v9041_v59 = vld [vmem:[#allocation55_spill] sm:$0xff] }
 0x34c   : > { %v7838_v63 = vsel %vm230_vm0, %v9033_v27, %v2591_v5  ;;  %v9042_v27 = vrot.slane %v7214_v48, 7 }
 0x34e   : > { %v2589_v14 = vpop.permute.xlu0 %2588  ;;  %v2420_v46 = vsel %vm469_vm3, %v2348_v8, %v9042_v27  ;;  %v2264_v27 = vld [vmem:[#allocation2] sm:$0xff] }
 0x34f   : > { %v2595_v3 = vpop.permute.xlu1 %2594  ;;  %v7845_v60 = vsel %vm230_vm0, %v2417_v6, %v2589_v14 }
 0x350   : > { %v7849_v24 = vsel %vm230_vm0, %v9036_v42, %v2595_v3  ;;  %v2320_v3 = vld [vmem:[#allocation2 + $0x1c0] sm:$0xff]  ;;  %v2421_v42 = vsel %vm469_vm3, %v2349_v50, %v9043_v43  ;;  %v9047_v43 = vrot.slane %v7245_v2, 7 }
 0x351   : > { %v2350_v45 = vrot.slane %v2320_v3, 7 }
 0x352   : > { %v2593_v20 = vpop.permute.xlu0 %2592 }
 0x353   : > { %v2599_v51 = vpop.permute.xlu1 %2598  ;;  %v7856_v31 = vsel %vm230_vm0, %v2418_v47, %v2593_v20  ;;  %v2324_v20 = vld [vmem:[#allocation2 + $0x1e0] sm:$0xff] }
 0x354   : > { %v7860_v55 = vsel %vm230_vm0, %v9039_v58, %v2599_v51  ;;  %v2351_v58 = vrot.slane %v2324_v20, 7 }
 0x356   : > { %v2597_v0 = vpop.permute.xlu0 %2596 }
 0x357   : > { %v2603_v62 = vpop.permute.xlu1 %2602  ;;  %v7867_v22 = vsel %vm230_vm0, %v2419_v38, %v2597_v0  ;;  %v2328_v38 = vld [vmem:[#allocation2 + $0x200] sm:$0xff] }
 0x358   : > { %v7871_v5 = vsel %vm230_vm0, %v9041_v59, %v2603_v62  ;;  %v2352_v8 = vrot.slane %v2328_v38, 7 }
 0x35a   : > { %v2601_v4 = vpop.permute.xlu0 %2600 }
 0x35b   : > { %v2607_v54 = vpop.permute.xlu1 %2606  ;;  %v7878_v6 = vsel %vm230_vm0, %v2420_v46, %v2601_v4 }
 0x35c   : > { %v7882_v14 = vsel %vm230_vm0, %v7523_v40, %v2607_v54  ;;  %v9044_v40 = vrot.slane %v7225_v44, 7  ;;  %v2336_v54 = vrot.slane %v2264_v27, 7  ;;  %v2884_v27 = vld [vmem:[%s8856_s2 + $0x40] sm:$0xff] }
 0x35e   : > { %v2605_v48 = vpop.permute.xlu0 %2604  ;;  %v2422_v51 = vsel %vm469_vm3, %v2350_v45, %v9044_v40  ;;  %v2879_v45 = vld [vmem:[%s8856_s2 + $0x18] sm:$0xff] }
 0x35f   : > { %v2611_v61 = vpop.permute.xlu1 %2610  ;;  %v7889_v18 = vsel %vm230_vm0, %v2421_v42, %v2605_v48 }
 0x360   : > { %v7893_v47 = vsel %vm230_vm0, %v7531_v12, %v2611_v61  ;;  %v9045_v12 = vrot.slane %v7233_v21, 7  ;;  %v2878_v61 = vld [vmem:[%s8856_s2 + $0x10] sm:$0xff] }
 0x362   : > { %v2609_v36 = vpop.permute.xlu0 %2608  ;;  %v2423_v0 = vsel %vm469_vm3, %v2351_v58, %v9045_v12 }
 0x363   : > { %v2615_v7 = vpop.permute.xlu1 %2614  ;;  %v7900_v41 = vsel %vm230_vm0, %v2422_v51, %v2609_v36  ;;  %v5231_v51 = vpack.c.bf16 %v2879_v45, %v2878_v61  ;;  %v2880_v36 = vld [vmem:[%s8856_s2 + $0x20] sm:$0xff] }
 0x364   : > { %v7904_v32 = vsel %vm230_vm0, %v7543_v19, %v2615_v7  ;;  %v9046_v19 = vrot.slane %v7108_v23, 7  ;;  %v2881_v7 = vld [vmem:[%s8856_s2 + $0x28] sm:$0xff]  ;;  %v4384_v61 = vld [vmem:[%s8856_s2 + $0xc0] sm:$0xff] }
 0x365   : > { %v5235_v12 = vpack.c.bf16 %v2881_v7, %v2880_v36 }
 0x366   : > { %v2613_v44 = vpop.permute.xlu0 %2612  ;;  %v2424_v46 = vsel %vm469_vm3, %v2352_v8, %v9046_v19 }
 0x367   : > { %v2619_v62 = vpop.permute.xlu1 %2618  ;;  %v7911_v59 = vsel %vm230_vm0, %v2423_v0, %v2613_v44  ;;  %v2882_v0 = vld [vmem:[%s8856_s2 + $0x30] sm:$0xff] }
 0x368   : > { %v7915_v15 = vsel %vm230_vm0, %v7556_v37, %v2619_v62  ;;  %v2408_v37 = vsel %vm469_vm3, %v2336_v54, %v9047_v43  ;;  %v2886_v54 = vld [vmem:[%s8856_s2 + $0x50] sm:$0xff] }
 0x36a   : > { %v2617_v21 = vpop.permute.xlu0 %2616 }
 0x36b   : > { %v2555_v4 = vpop.permute.xlu1 %2554  ;;  %v7922_v50 = vsel %vm230_vm0, %v2424_v46, %v2617_v21 }
 0x36c   : > { %v7926_v3 = vsel %vm230_vm0, %v7562_v13, %v2555_v4 }
 0x36e   : > { %v2553_v42 = vpop.permute.xlu0 %2552 }
 0x36f   : > { %v2703_v23 = vpop.permute.xlu1 %2702  ;;  %v7933_v48 = vsel %vm230_vm0, %v2408_v37, %v2553_v42 }
 0x370   : > { %v7943_v13 = vsel %vm921_vm4, %v7680_v56, %v2703_v23 }
 0x372   : > { %v2701_v2 = vpop.permute.xlu0 %2700 }
 0x373   : > { %v2707_v20 = vpop.permute.xlu1 %2706  ;;  %v7947_v40 = vsel %vm921_vm4, %v7697_v1, %v2701_v2 }
 0x374   : > { %4939 = vmatprep.mubr.msk.f32.mxu1 %vm983_vm5, %v7947_v40  ;;  %v7962_v56 = vsel %vm921_vm4, %v7715_v52, %v2707_v20 }
 0x375   : > { %4940 = vmatmul.mubr.msk.f32.vlgmr.msra.gmra.mrb[0].mxu1 %vm983_vm5, %v7943_v13 }
 0x376   : > { %5230 = vmatpush3.bf16.msra.mxu1 %v7604_v30  ;;  %v2705_v1 = vpop.permute.xlu0 %2704  ;;  %v2883_v30 = vld [vmem:[%s8856_s2 + $0x38] sm:$0xff] }
 0x377   : > { %v2711_v58 = vpop.permute.xlu1 %2710  ;;  %v7966_v38 = vsel %vm921_vm4, %v7729_v35, %v2705_v1  ;;  %5232 = vmatprep.subr.bf16.mxu1 %v5231_v51  ;;  %v5239_v8 = vpack.c.bf16 %v2883_v30, %v2882_v0 }
 0x378   : > { %4942 = vmatprep.mubr.msk.f32.mxu1 %vm983_vm5, %v7966_v38  ;;  %v7980_v52 = vsel %vm921_vm4, %v7733_v11, %v2711_v58  ;;  %v2885_v11 = vld [vmem:[%s8856_s2 + $0x48] sm:$0xff] }
 0x379   : > { %4943 = vmatmul.mubr.msk.f32.gmra.mrb[2].mxu1 %vm983_vm5, %v7962_v56  ;;  %v5243_v4 = vpack.c.bf16 %v2885_v11, %v2884_v27 }
 0x37a   : > { %v2709_v35 = vpop.permute.xlu0 %2708  ;;  %5234 = vmatpush3.bf16.msra.mxu1 %v5231_v51 }
 0x37b   : > { %v2715_v44 = vpop.permute.xlu1 %2714  ;;  %v7984_v62 = vsel %vm921_vm4, %v7747_v17, %v2709_v35  ;;  %5236 = vmatprep.subr.bf16.mxu1 %v5235_v12 }
 0x37c   : > { %4945 = vmatprep.mubr.msk.f32.mxu1 %vm983_vm5, %v7984_v62  ;;  %v7998_v17 = vsel %vm921_vm4, %v7751_v49, %v2715_v44  ;;  %v2887_v49 = vld [vmem:[%s8856_s2 + $0x58] sm:$0xff] }
 0x37d   : > { %4946 = vmatmul.mubr.msk.f32.gmra.mrb[4].mxu1 %vm983_vm5, %v7980_v52  ;;  %v5247_v23 = vpack.c.bf16 %v2887_v49, %v2886_v54 }
 0x37e   : > { %v2713_v19 = vpop.permute.xlu0 %2712  ;;  %5238 = vmatpush3.bf16.msra.mxu1 %v5235_v12 }
 0x37f   : > { %v2719_v46 = vpop.permute.xlu1 %2718  ;;  %v8002_v21 = vsel %vm921_vm4, %v7765_v53, %v2713_v19  ;;  %5240 = vmatprep.subr.bf16.mxu1 %v5239_v8 }
 0x380   : > { %4948 = vmatprep.mubr.msk.f32.mxu1 %vm983_vm5, %v8002_v21  ;;  %v8016_v53 = vsel %vm921_vm4, %v7769_v10, %v2719_v46  ;;  %v4385_v10 = vld [vmem:[%s8856_s2 + $0xc8] sm:$0xff] }
 0x381   : > { %4949 = vmatmul.mubr.msk.f32.gmra.mrb[6].mxu1 %vm983_vm5, %v7998_v17  ;;  %v8040_v51 = vpack.c.bf16 %v4385_v10, %v4384_v61  ;;  %v4387_v10 = vld [vmem:[%s8856_s2 + $0xd8] sm:$0xff] }
 0x382   : > { %v2717_v43 = vpop.permute.xlu0 %2716  ;;  %5242 = vmatpush3.bf16.msra.mxu1 %v5239_v8 }
 0x383   : > { %v2723_v37 = vpop.permute.xlu1 %2722  ;;  %v8020_v42 = vsel %vm921_vm4, %v7785_v57, %v2717_v43  ;;  %5244 = vmatprep.subr.bf16.mxu1 %v5243_v4 }
 0x384   : > { %4951 = vmatprep.mubr.msk.f32.mxu1 %vm983_vm5, %v8020_v42  ;;  %v8034_v57 = vsel %vm921_vm4, %v7789_v26, %v2723_v37 }
 0x385   : > { %4952 = vmatmul.mubr.msk.f32.gmra.mrb[8].mxu1 %vm983_vm5, %v8016_v53 }
 0x386   : > { %v2721_v45 = vpop.permute.xlu0 %2720  ;;  %5246 = vmatpush3.bf16.msra.mxu1 %v5243_v4 }
 0x387   : > { %v2727_v2 = vpop.permute.xlu1 %2726  ;;  %v8038_v20 = vsel %vm921_vm4, %v7803_v25, %v2721_v45  ;;  %5248 = vmatprep.subr.bf16.mxu1 %v5247_v23 }
 0x388   : > { %4954 = vmatprep.mubr.msk.f32.mxu1 %vm983_vm5, %v8038_v20  ;;  %v8048_v26 = vsel %vm921_vm4, %v7808_v28, %v2727_v2 }
 0x389   : > { %4955 = vmatmul.mubr.msk.f32.gmra.mrb[10].mxu1 %vm983_vm5, %v8034_v57 }
 0x38a   : > { %v2725_v36 = vpop.permute.xlu0 %2724  ;;  %5250 = vmatpush3.bf16.msra.mxu1 %v5247_v23 }
 0x38b   : > { %v2731_v7 = vpop.permute.xlu1 %2730  ;;  %v8052_v25 = vsel %vm921_vm4, %v7820_v9, %v2725_v36  ;;  %5252 = vmatprep.subr.bf16.mxu1 %v8040_v51  ;;  %v4388_v36 = vld [vmem:[%s8856_s2 + $0xe0] sm:$0xff] }
 0x38c   : > { %4957 = vmatprep.mubr.msk.f32.mxu1 %vm983_vm5, %v8052_v25  ;;  %v8061_v1 = vsel %vm921_vm4, %v7826_v33, %v2731_v7  ;;  %v4389_v7 = vld [vmem:[%s8856_s2 + $0xe8] sm:$0xff] }
 0x38d   : > { %4958 = vmatmul.mubr.msk.f32.gmra.mrb[12].mxu1 %vm983_vm5, %v8048_v26 }
 0x38e   : > { %v2729_v28 = vpop.permute.xlu0 %2728 }
 0x38f   : > { %v2735_v58 = vpop.permute.xlu1 %2734  ;;  %v8065_v12 = vsel %vm921_vm4, %v7834_v39, %v2729_v28  ;;  %v4391_v28 = vld [vmem:[%s8856_s2 + $0xf8] sm:$0xff] }
 0x390   : > { %4960 = vmatprep.mubr.msk.f32.mxu1 %vm983_vm5, %v8065_v12  ;;  %v8073_v9 = vsel %vm921_vm4, %v7838_v63, %v2735_v58  ;;  %v4393_v58 = vld [vmem:[%s8856_s2 + $0x108] sm:$0xff] }
 0x391   : > { %4961 = vmatmul.mubr.msk.f32.gmra.mrb[14].mxu1 %vm983_vm5, %v8061_v1 }
 0x392   : > { %v2733_v0 = vpop.permute.xlu0 %2732 }
 0x393   : > { %v2739_v30 = vpop.permute.xlu1 %2738  ;;  %v8077_v33 = vsel %vm921_vm4, %v7845_v60, %v2733_v0  ;;  %v4394_v0 = vld [vmem:[%s8856_s2 + $0x110] sm:$0xff] }
 0x394   : > { %4963 = vmatprep.mubr.msk.f32.mxu1 %vm983_vm5, %v8077_v33  ;;  %v8085_v39 = vsel %vm921_vm4, %v7849_v24, %v2739_v30  ;;  %v4395_v30 = vld [vmem:[%s8856_s2 + $0x118] sm:$0xff] }
 0x395   : > { %4964 = vmatmul.mubr.msk.f32.gmra.mrb[16].mxu1 %vm983_vm5, %v8073_v9 }
 0x396   : > { %v2737_v35 = vpop.permute.xlu0 %2736 }
 0x397   : > { %v2743_v44 = vpop.permute.xlu1 %2742  ;;  %v8089_v63 = vsel %vm921_vm4, %v7856_v31, %v2737_v35  ;;  %v5271_v35 = vpack.c.bf16 %v4395_v30, %v4394_v0 }
 0x398   : > { %4966 = vmatprep.mubr.msk.f32.mxu1 %vm983_vm5, %v8089_v63  ;;  %v8097_v60 = vsel %vm921_vm4, %v7860_v55, %v2743_v44 }
 0x399   : > { %4967 = vmatmul.mubr.msk.f32.gmra.mrb[18].mxu1 %vm983_vm5, %v8085_v39 }
 0x39a   : > { %v2741_v8 = vpop.permute.xlu0 %2740 }
 0x39b   : > { %v2747_v27 = vpop.permute.xlu1 %2746  ;;  %v8101_v24 = vsel %vm921_vm4, %v7867_v22, %v2741_v8 }
 0x39c   : > { %4969 = vmatprep.mubr.msk.f32.mxu1 %vm983_vm5, %v8101_v24  ;;  %v8109_v31 = vsel %vm921_vm4, %v7871_v5, %v2747_v27 }
 0x39d   : > { %4970 = vmatmul.mubr.msk.f32.gmra.mrb[20].mxu1 %vm983_vm5, %v8097_v60 }
 0x39e   : > { %v2745_v11 = vpop.permute.xlu0 %2744 }
 0x39f   : > { %v2751_v19 = vpop.permute.xlu1 %2750  ;;  %v8113_v55 = vsel %vm921_vm4, %v7878_v6, %v2745_v11 }
 0x3a0   : > { %4972 = vmatprep.mubr.msk.f32.mxu1 %vm983_vm5, %v8113_v55  ;;  %v8121_v22 = vsel %vm921_vm4, %v7882_v14, %v2751_v19 }
 0x3a1   : > { %4973 = vmatmul.mubr.msk.f32.gmra.mrb[22].mxu1 %vm983_vm5, %v8109_v31 }
 0x3a2   : > { %v2749_v46 = vpop.permute.xlu0 %2748 }
 0x3a3   : > { %v2755_v4 = vpop.permute.xlu1 %2754  ;;  %v8125_v5 = vsel %vm921_vm4, %v7889_v18, %v2749_v46 }
 0x3a4   : > { %4975 = vmatprep.mubr.msk.f32.mxu1 %vm983_vm5, %v8125_v5  ;;  %v8133_v6 = vsel %vm921_vm4, %v7893_v47, %v2755_v4 }
 0x3a5   : > { %4976 = vmatmul.mubr.msk.f32.gmra.mrb[24].mxu1 %vm983_vm5, %v8121_v22 }
 0x3a6   : > { %v2753_v54 = vpop.permute.xlu0 %2752 }
 0x3a7   : > { %v2759_v49 = vpop.permute.xlu1 %2758  ;;  %v8137_v14 = vsel %vm921_vm4, %v7900_v41, %v2753_v54 }
 0x3a8   : > { %4978 = vmatprep.mubr.msk.f32.mxu1 %vm983_vm5, %v8137_v14  ;;  %v8145_v18 = vsel %vm921_vm4, %v7904_v32, %v2759_v49 }
 0x3a9   : > { %4979 = vmatmul.mubr.msk.f32.gmra.mrb[26].mxu1 %vm983_vm5, %v8133_v6 }
 0x3aa   : > { %v2757_v43 = vpop.permute.xlu0 %2756 }
 0x3ab   : > { %v2763_v37 = vpop.permute.xlu1 %2762  ;;  %v8149_v47 = vsel %vm921_vm4, %v7911_v59, %v2757_v43  ;;  %v4386_v59 = vld [vmem:[%s8856_s2 + $0xd0] sm:$0xff] }
 0x3ac   : > { %4981 = vmatprep.mubr.msk.f32.mxu1 %vm983_vm5, %v8149_v47  ;;  %v8157_v41 = vsel %vm921_vm4, %v7915_v15, %v2763_v37  ;;  %v5255_v2 = vpack.c.bf16 %v4387_v10, %v4386_v59 }
 0x3ad   : > { %4982 = vmatmul.mubr.msk.f32.gmra.mrb[28].mxu1 %vm983_vm5, %v8145_v18 }
 0x3ae   : > { %v2761_v23 = vpop.permute.xlu0 %2760 }
 0x3af   : > { %v8161_v32 = vsel %vm921_vm4, %v7922_v50, %v2761_v23  ;;  %v2699_v61 = vpop.permute.xlu1 %2698 }
 0x3b0   : > { %4984 = vmatprep.mubr.msk.f32.mxu1 %vm983_vm5, %v8161_v32  ;;  %v2841_v15 = vsel %vm921_vm4, %v7926_v3, %v2699_v61  ;;  %v5259_v3 = vpack.c.bf16 %v4389_v7, %v4388_v36 }
 0x3b1   : > { %4985 = vmatmul.mubr.msk.f32.gmra.mrb[30].mxu1 %vm983_vm5, %v8157_v41 }
 0x3b2   : > { %v2697_v50 = vpop.permute.xlu0 %2696 }
 0x3b3   : > { %v2840_v45 = vsel %vm921_vm4, %v7933_v48, %v2697_v50  ;;  %v4390_v48 = vld [vmem:[%s8856_s2 + $0xf0] sm:$0xff] }
 0x3b4   : > { %5011 = vmatprep.mubr.msk.f32.mxu1 %vm983_vm5, %v2840_v45 }
 0x3b5   : > { %5012 = vmatmul.mubr.msk.f32.vlgmr.msra.gmra.mrb[0].mxu1 %vm983_vm5, %v2841_v15 }
 0x3b6   : > { %5254 = vmatpush3.bf16.msra.mxu1 %v8040_v51  ;;  %5014 = vmatprep.mubr.msk.f32.mxu1 %vm983_vm5, %v7947_v40  ;;  %v5263_v51 = vpack.c.bf16 %v4391_v28, %v4390_v48  ;;  %v4392_v40 = vld [vmem:[%s8856_s2 + $0x100] sm:$0xff] }
 0x3b7   : > { %5256 = vmatprep.subr.bf16.mxu1 %v5255_v2 }
 0x3b9   : > { %5015 = vmatmul.mubr.msk.f32.gmra.mrb[2].mxu1 %vm983_vm5, %v7943_v13  ;;  %v5267_v13 = vpack.c.bf16 %v4393_v58, %v4392_v40 }
 0x3ba   : > { %5017 = vmatprep.mubr.msk.f32.mxu1 %vm983_vm5, %v7966_v38  ;;  %5258 = vmatpush3.bf16.msra.mxu1 %v5255_v2 }
 0x3bb   : > { %5260 = vmatprep.subr.bf16.mxu1 %v5259_v3 }
 0x3bd   : > { %5018 = vmatmul.mubr.msk.f32.gmra.mrb[4].mxu1 %vm983_vm5, %v7962_v56 }
 0x3be   : > { %5020 = vmatprep.mubr.msk.f32.mxu1 %vm983_vm5, %v7984_v62  ;;  %5262 = vmatpush3.bf16.msra.mxu1 %v5259_v3 }
 0x3bf   : > { %5264 = vmatprep.subr.bf16.mxu1 %v5263_v51 }
 0x3c1   : > { %5021 = vmatmul.mubr.msk.f32.gmra.mrb[6].mxu1 %vm983_vm5, %v7980_v52 }
 0x3c2   : > { %5023 = vmatprep.mubr.msk.f32.mxu1 %vm983_vm5, %v8002_v21  ;;  %5266 = vmatpush3.bf16.msra.mxu1 %v5263_v51 }
 0x3c3   : > { %5268 = vmatprep.subr.bf16.mxu1 %v5267_v13 }
 0x3c5   : > { %5024 = vmatmul.mubr.msk.f32.gmra.mrb[8].mxu1 %vm983_vm5, %v7998_v17 }
 0x3c6   : > { %5026 = vmatprep.mubr.msk.f32.mxu1 %vm983_vm5, %v8020_v42  ;;  %5270 = vmatpush3.bf16.msra.mxu1 %v5267_v13 }
 0x3c7   : > { %5272 = vmatprep.subr.bf16.mxu1 %v5271_v35 }
 0x3c9   : > { %5027 = vmatmul.mubr.msk.f32.gmra.mrb[10].mxu1 %vm983_vm5, %v8016_v53 }
 0x3ca   : > { %5029 = vmatprep.mubr.msk.f32.mxu1 %vm983_vm5, %v8038_v20  ;;  %5274 = vmatpush3.bf16.msra.mxu1 %v5271_v35 }
 0x3cd   : > { %5030 = vmatmul.mubr.msk.f32.gmra.mrb[12].mxu1 %vm983_vm5, %v8034_v57 }
 0x3ce   : > { %5032 = vmatprep.mubr.msk.f32.mxu1 %vm983_vm5, %v8052_v25 }
 0x3d1   : > { %5033 = vmatmul.mubr.msk.f32.gmra.mrb[14].mxu1 %vm983_vm5, %v8048_v26 }
 0x3d2   : > { %5035 = vmatprep.mubr.msk.f32.mxu1 %vm983_vm5, %v8065_v12 }
 0x3d5   : > { %5036 = vmatmul.mubr.msk.f32.gmra.mrb[16].mxu1 %vm983_vm5, %v8061_v1 }
 0x3d6   : > { %5038 = vmatprep.mubr.msk.f32.mxu1 %vm983_vm5, %v8077_v33 }
 0x3d9   : > { %5039 = vmatmul.mubr.msk.f32.gmra.mrb[18].mxu1 %vm983_vm5, %v8073_v9 }
 0x3da   : > { %5041 = vmatprep.mubr.msk.f32.mxu1 %vm983_vm5, %v8089_v63 }
 0x3dd   : > { %5042 = vmatmul.mubr.msk.f32.gmra.mrb[20].mxu1 %vm983_vm5, %v8085_v39 }
 0x3de   : > { %5044 = vmatprep.mubr.msk.f32.mxu1 %vm983_vm5, %v8101_v24 }
 0x3e1   : > { %5045 = vmatmul.mubr.msk.f32.gmra.mrb[22].mxu1 %vm983_vm5, %v8097_v60 }
 0x3e2   : > { %5047 = vmatprep.mubr.msk.f32.mxu1 %vm983_vm5, %v8113_v55 }
 0x3e5   : > { %5048 = vmatmul.mubr.msk.f32.gmra.mrb[24].mxu1 %vm983_vm5, %v8109_v31 }
 0x3e6   : > { %5050 = vmatprep.mubr.msk.f32.mxu1 %vm983_vm5, %v8125_v5 }
 0x3e9   : > { %5051 = vmatmul.mubr.msk.f32.gmra.mrb[26].mxu1 %vm983_vm5, %v8121_v22 }
 0x3ea   : > { %5053 = vmatprep.mubr.msk.f32.mxu1 %vm983_vm5, %v8137_v14 }
 0x3ed   : > { %5054 = vmatmul.mubr.msk.f32.gmra.mrb[28].mxu1 %vm983_vm5, %v8133_v6 }
 0x3ee   : > { %5056 = vmatprep.mubr.msk.f32.mxu1 %vm983_vm5, %v8149_v47 }
 0x3f1   : > { %5057 = vmatmul.mubr.msk.f32.gmra.mrb[30].mxu1 %vm983_vm5, %v8145_v18 }
 0x3f2   : > { %5083 = vmatprep.mubr.msk.f32.mxu1 %vm983_vm5, %v7966_v38  ;;  %v2621_v38 = vpop.permute.xlu0 %2620 }
 0x3f5   : > { %5084 = vmatmul.mubr.msk.f32.vlgmr.msra.gmra.mrb[0].mxu1 %vm983_vm5, %v7962_v56  ;;  %v2332_v56 = vld [vmem:[#allocation2 + $0x220] sm:$0xff] }
 0x3f6   : > { %5086 = vmatprep.mubr.msk.f32.mxu1 %vm983_vm5, %v7984_v62  ;;  %v2353_v62 = vrot.slane %v2332_v56, 7 }
 0x3f9   : > { %5087 = vmatmul.mubr.msk.f32.gmra.mrb[2].mxu1 %vm983_vm5, %v7980_v52  ;;  %v2623_v52 = vpop.permute.xlu1 %2622 }
 0x3fa   : > { %5089 = vmatprep.mubr.msk.f32.mxu1 %vm983_vm5, %v8002_v21  ;;  %v2389_v21 = vrot.slane %v7782_v16, 7 }
 0x3fd   : > { %5090 = vmatmul.mubr.msk.f32.gmra.mrb[4].mxu1 %vm983_vm5, %v7998_v17  ;;  %v2371_v17 = vrot.slane %v7795_v29, 7 }
 0x3fe   : > { %5092 = vmatprep.mubr.msk.f32.mxu1 %vm983_vm5, %v8020_v42 }
 0x3ff   : > { %v2425_v42 = vsel %vm469_vm3, %v2353_v62, %v2371_v17  ;;  %v2407_v29 = vsel %vm469_vm3, %v2371_v17, %v2389_v21 }
 0x400   : > { %v2839_v16 = vsel %vm230_vm0, %v2407_v29, %v2623_v52 }
 0x401   : > { %5093 = vmatmul.mubr.msk.f32.gmra.mrb[6].mxu1 %vm983_vm5, %v8016_v53  ;;  %v2765_v53 = vpop.permute.xlu0 %2764 }
 0x402   : > { %5095 = vmatprep.mubr.msk.f32.mxu1 %vm983_vm5, %v8038_v20  ;;  %v2767_v20 = vpop.permute.xlu1 %2766 }
 0x405   : > { %5096 = vmatmul.mubr.msk.f32.gmra.mrb[8].mxu1 %vm983_vm5, %v8034_v57  ;;  %v2838_v57 = vsel %vm230_vm0, %v2425_v42, %v2621_v38 }
 0x406   : > { %5098 = vmatprep.mubr.msk.f32.mxu1 %vm983_vm5, %v8052_v25  ;;  %v2875_v25 = vsel %vm921_vm4, %v2839_v16, %v2767_v20 }
 0x409   : > { %5099 = vmatmul.mubr.msk.f32.gmra.mrb[10].mxu1 %vm983_vm5, %v8048_v26  ;;  %v2874_v26 = vsel %vm921_vm4, %v2838_v57, %v2765_v53 }
 0x40a   : > { %5101 = vmatprep.mubr.msk.f32.mxu1 %vm983_vm5, %v8065_v12 }
 0x40d   : > { %5102 = vmatmul.mubr.msk.f32.gmra.mrb[12].mxu1 %vm983_vm5, %v8061_v1 }
 0x40e   : > { %5104 = vmatprep.mubr.msk.f32.mxu1 %vm983_vm5, %v8077_v33 }
 0x411   : > { %5105 = vmatmul.mubr.msk.f32.gmra.mrb[14].mxu1 %vm983_vm5, %v8073_v9 }
 0x412   : > { %5107 = vmatprep.mubr.msk.f32.mxu1 %vm983_vm5, %v8089_v63 }
 0x415   : > { %5108 = vmatmul.mubr.msk.f32.gmra.mrb[16].mxu1 %vm983_vm5, %v8085_v39 }
 0x416   : > { %5110 = vmatprep.mubr.msk.f32.mxu1 %vm983_vm5, %v8101_v24 }
 0x419   : > { %5111 = vmatmul.mubr.msk.f32.gmra.mrb[18].mxu1 %vm983_vm5, %v8097_v60 }
 0x41a   : > { %5113 = vmatprep.mubr.msk.f32.mxu1 %vm983_vm5, %v8113_v55 }
 0x41d   : > { %5114 = vmatmul.mubr.msk.f32.gmra.mrb[20].mxu1 %vm983_vm5, %v8109_v31 }
 0x41e   : > { %5116 = vmatprep.mubr.msk.f32.mxu1 %vm983_vm5, %v8125_v5 }
 0x421   : > { %5117 = vmatmul.mubr.msk.f32.gmra.mrb[22].mxu1 %vm983_vm5, %v8121_v22 }
 0x422   : > { %5119 = vmatprep.mubr.msk.f32.mxu1 %vm983_vm5, %v8137_v14 }
 0x425   : > { %5120 = vmatmul.mubr.msk.f32.gmra.mrb[24].mxu1 %vm983_vm5, %v8133_v6 }
 0x426   : > { %5122 = vmatprep.mubr.msk.f32.mxu1 %vm983_vm5, %v8149_v47 }
 0x429   : > { %5123 = vmatmul.mubr.msk.f32.gmra.mrb[26].mxu1 %vm983_vm5, %v8145_v18 }
 0x42a   : > { %5125 = vmatprep.mubr.msk.f32.mxu1 %vm983_vm5, %v8161_v32 }
 0x42d   : > { %5126 = vmatmul.mubr.msk.f32.gmra.mrb[28].mxu1 %vm983_vm5, %v8157_v41 }
 0x42e   : > { %5128 = vmatprep.mubr.msk.f32.mxu1 %vm983_vm5, %v2874_v26 }
 0x431   : > { %5129 = vmatmul.mubr.msk.f32.gmra.mrb[30].mxu1 %vm983_vm5, %v2875_v25 }
 0x4c8   : > { %v8336_v1 = vpop.f32.mrb[0].mxu1 }
 0x4c9   : > { %v3730_v12 = vsel %vm230_vm0, %v8336_v1, 0.0  ;;  %v3799_v9 = vmul.f32 %v8336_v1, %v8336_v1  ;;  %v8342_v33 = vpop.f32.mrb[1].mxu1 }
 0x4ca   : > { %v3729_v39 = vsel %vm230_vm0, %v8342_v33, 0.0  ;;  %v3798_v44 = vmul.f32 %v8342_v33, %v8342_v33 }
 0x4cb   : > { %v3831_v63 = vsel %vm230_vm0, %v3799_v9, 0.0  ;;  %v3731_v60 = vadd.f32 %v3730_v12, %v3729_v39 }
 0x4cc   : > { %v3830_v8 = vsel %vm230_vm0, %v3798_v44, 0.0  ;;  %v8350_v27 = vpop.f32.mrb[2].mxu1 }
 0x4cd   : > { %v3832_v24 = vadd.f32 %v3831_v63, %v3830_v8  ;;  %v8352_v31 = vpop.f32.mrb[3].mxu1  ;;  %v3801_v11 = vmul.f32 %v8350_v27, %v8350_v27  ;;  %v3734_v46 = vsel %vm230_vm0, %v8350_v27, 0.0 }
 0x4ce   : > { %v3732_v19 = vsel %vm230_vm0, %v8352_v31, 0.0  ;;  %v3800_v55 = vmul.f32 %v8352_v31, %v8352_v31 }
 0x4cf   : > { %v3733_v22 = vadd.f32 %v3732_v19, %v3731_v60  ;;  %v3835_v14 = vsel %vm230_vm0, %v3801_v11, 0.0 }
 0x4d0   : > { %v3833_v4 = vsel %vm230_vm0, %v3800_v55, 0.0  ;;  %v8363_v5 = vpop.f32.mrb[4].mxu1 }
 0x4d1   : > { %v3834_v6 = vadd.f32 %v3833_v4, %v3832_v24  ;;  %v8365_v54 = vpop.f32.mrb[5].mxu1  ;;  %v3735_v49 = vadd.f32 %v3734_v46, %v3733_v22  ;;  %v3803_v18 = vmul.f32 %v8363_v5, %v8363_v5  ;;  %v3738_v23 = vsel %vm230_vm0, %v8363_v5, 0.0 }
 0x4d2   : > { %v3736_v43 = vsel %vm230_vm0, %v8365_v54, 0.0  ;;  %v3802_v37 = vmul.f32 %v8365_v54, %v8365_v54 }
 0x4d3   : > { %v3737_v47 = vadd.f32 %v3736_v43, %v3735_v49  ;;  %v3836_v41 = vadd.f32 %v3835_v14, %v3834_v6  ;;  %v3839_v50 = vsel %vm230_vm0, %v3803_v18, 0.0 }
 0x4d4   : > { %v3837_v32 = vsel %vm230_vm0, %v3802_v37, 0.0  ;;  %v8377_v61 = vpop.f32.mrb[6].mxu1 }
 0x4d5   : > { %v3838_v59 = vadd.f32 %v3837_v32, %v3836_v41  ;;  %v8379_v10 = vpop.f32.mrb[7].mxu1  ;;  %v3739_v15 = vadd.f32 %v3738_v23, %v3737_v47  ;;  %v3805_v45 = vmul.f32 %v8377_v61, %v8377_v61  ;;  %v3742_v48 = vsel %vm230_vm0, %v8377_v61, 0.0 }
 0x4d6   : > { %v3740_v2 = vsel %vm230_vm0, %v8379_v10, 0.0  ;;  %v3804_v36 = vmul.f32 %v8379_v10, %v8379_v10 }
 0x4d7   : > { %v3741_v7 = vadd.f32 %v3740_v2, %v3739_v15  ;;  %v3840_v3 = vadd.f32 %v3839_v50, %v3838_v59  ;;  %v3843_v0 = vsel %vm230_vm0, %v3805_v45, 0.0 }
 0x4d8   : > { %v3841_v28 = vsel %vm230_vm0, %v3804_v36, 0.0  ;;  %v8391_v51 = vpop.f32.mrb[8].mxu1 }
 0x4d9   : > { %v3842_v40 = vadd.f32 %v3841_v28, %v3840_v3  ;;  %v8393_v58 = vpop.f32.mrb[9].mxu1  ;;  %v3743_v13 = vadd.f32 %v3742_v48, %v3741_v7  ;;  %v3807_v30 = vmul.f32 %v8391_v51, %v8391_v51  ;;  %v3746_v62 = vsel %vm230_vm0, %v8391_v51, 0.0 }
 0x4da   : > { %v3744_v35 = vsel %vm230_vm0, %v8393_v58, 0.0  ;;  %v3806_v56 = vmul.f32 %v8393_v58, %v8393_v58 }
 0x4db   : > { %v3745_v38 = vadd.f32 %v3744_v35, %v3743_v13  ;;  %v3844_v52 = vadd.f32 %v3843_v0, %v3842_v40  ;;  %v3847_v20 = vsel %vm230_vm0, %v3807_v30, 0.0 }
 0x4dc   : > { %v3845_v17 = vsel %vm230_vm0, %v3806_v56, 0.0  ;;  %v8405_v21 = vpop.f32.mrb[10].mxu1 }
 0x4dd   : > { %v3846_v53 = vadd.f32 %v3845_v17, %v3844_v52  ;;  %v8407_v42 = vpop.f32.mrb[11].mxu1  ;;  %v3747_v57 = vadd.f32 %v3746_v62, %v3745_v38  ;;  %v3809_v26 = vmul.f32 %v8405_v21, %v8405_v21  ;;  %v3750_v9 = vsel %vm230_vm0, %v8405_v21, 0.0 }
 0x4de   : > { %v3748_v29 = vsel %vm230_vm0, %v8407_v42, 0.0  ;;  %v3808_v16 = vmul.f32 %v8407_v42, %v8407_v42 }
 0x4df   : > { %v3749_v25 = vadd.f32 %v3748_v29, %v3747_v57  ;;  %v3848_v12 = vadd.f32 %v3847_v20, %v3846_v53  ;;  %v3851_v24 = vsel %vm230_vm0, %v3809_v26, 0.0 }
 0x4e0   : > { %v3849_v39 = vsel %vm230_vm0, %v3808_v16, 0.0  ;;  %v8419_v44 = vpop.f32.mrb[12].mxu1 }
 0x4e1   : > { %v3850_v63 = vadd.f32 %v3849_v39, %v3848_v12  ;;  %v8421_v60 = vpop.f32.mrb[13].mxu1  ;;  %v3751_v8 = vadd.f32 %v3750_v9, %v3749_v25  ;;  %v3811_v11 = vmul.f32 %v8419_v44, %v8419_v44  ;;  %v3754_v4 = vsel %vm230_vm0, %v8419_v44, 0.0 }
 0x4e2   : > { %v3752_v19 = vsel %vm230_vm0, %v8421_v60, 0.0  ;;  %v3810_v55 = vmul.f32 %v8421_v60, %v8421_v60 }
 0x4e3   : > { %v3753_v22 = vadd.f32 %v3752_v19, %v3751_v8  ;;  %v3852_v46 = vadd.f32 %v3851_v24, %v3850_v63  ;;  %v3855_v37 = vsel %vm230_vm0, %v3811_v11, 0.0 }
 0x4e4   : > { %v3853_v6 = vsel %vm230_vm0, %v3810_v55, 0.0  ;;  %v8433_v49 = vpop.f32.mrb[14].mxu1 }
 0x4e5   : > { %v3854_v14 = vadd.f32 %v3853_v6, %v3852_v46  ;;  %v8435_v18 = vpop.f32.mrb[15].mxu1  ;;  %v3755_v43 = vadd.f32 %v3754_v4, %v3753_v22  ;;  %v3813_v47 = vmul.f32 %v8433_v49, %v8433_v49  ;;  %v3758_v15 = vsel %vm230_vm0, %v8433_v49, 0.0 }
 0x4e6   : > { %v3756_v41 = vsel %vm230_vm0, %v8435_v18, 0.0  ;;  %v3812_v23 = vmul.f32 %v8435_v18, %v8435_v18 }
 0x4e7   : > { %v3757_v32 = vadd.f32 %v3756_v41, %v3755_v43  ;;  %v3856_v59 = vadd.f32 %v3855_v37, %v3854_v14  ;;  %v3859_v3 = vsel %vm230_vm0, %v3813_v47, 0.0 }
 0x4e8   : > { %v3857_v50 = vsel %vm230_vm0, %v3812_v23, 0.0  ;;  %v8447_v45 = vpop.f32.mrb[16].mxu1 }
 0x4e9   : > { %v3858_v2 = vadd.f32 %v3857_v50, %v3856_v59  ;;  %v8449_v36 = vpop.f32.mrb[17].mxu1  ;;  %v3759_v7 = vadd.f32 %v3758_v15, %v3757_v32  ;;  %v3815_v48 = vmul.f32 %v8447_v45, %v8447_v45  ;;  %v3762_v30 = vsel %vm230_vm0, %v8447_v45, 0.0 }
 0x4ea   : > { %v3760_v28 = vsel %vm230_vm0, %v8449_v36, 0.0  ;;  %v3814_v40 = vmul.f32 %v8449_v36, %v8449_v36 }
 0x4eb   : > { %v3761_v13 = vadd.f32 %v3760_v28, %v3759_v7  ;;  %v3860_v0 = vadd.f32 %v3859_v3, %v3858_v2  ;;  %v3863_v17 = vsel %vm230_vm0, %v3815_v48, 0.0 }
 0x4ec   : > { %v3861_v35 = vsel %vm230_vm0, %v3814_v40, 0.0  ;;  %v8461_v56 = vpop.f32.mrb[18].mxu1 }
 0x4ed   : > { %v3862_v38 = vadd.f32 %v3861_v35, %v3860_v0  ;;  %v8463_v52 = vpop.f32.mrb[19].mxu1  ;;  %v3763_v62 = vadd.f32 %v3762_v30, %v3761_v13  ;;  %v3817_v53 = vmul.f32 %v8461_v56, %v8461_v56  ;;  %v3766_v16 = vsel %vm230_vm0, %v8461_v56, 0.0 }
 0x4ee   : > { %v3764_v57 = vsel %vm230_vm0, %v8463_v52, 0.0  ;;  %v3816_v20 = vmul.f32 %v8463_v52, %v8463_v52 }
 0x4ef   : > { %v3765_v26 = vadd.f32 %v3764_v57, %v3763_v62  ;;  %v3864_v29 = vadd.f32 %v3863_v17, %v3862_v38  ;;  %v3867_v8 = vsel %vm230_vm0, %v3817_v53, 0.0 }
 0x4f0   : > { %v3865_v25 = vsel %vm230_vm0, %v3816_v20, 0.0  ;;  %v8475_v12 = vpop.f32.mrb[20].mxu1 }
 0x4f1   : > { %v3866_v9 = vadd.f32 %v3865_v25, %v3864_v29  ;;  %v8477_v39 = vpop.f32.mrb[21].mxu1  ;;  %v3767_v63 = vadd.f32 %v3766_v16, %v3765_v26  ;;  %v3819_v24 = vmul.f32 %v8475_v12, %v8475_v12  ;;  %v3770_v46 = vsel %vm230_vm0, %v8475_v12, 0.0 }
 0x4f2   : > { %v3768_v11 = vsel %vm230_vm0, %v8477_v39, 0.0  ;;  %v3818_v19 = vmul.f32 %v8477_v39, %v8477_v39 }
 0x4f3   : > { %v3769_v55 = vadd.f32 %v3768_v11, %v3767_v63  ;;  %v3868_v22 = vadd.f32 %v3867_v8, %v3866_v9  ;;  %v3871_v47 = vsel %vm230_vm0, %v3819_v24, 0.0 }
 0x4f4   : > { %v3869_v4 = vsel %vm230_vm0, %v3818_v19, 0.0  ;;  %v8489_v6 = vpop.f32.mrb[22].mxu1 }
 0x4f5   : > { %v3870_v14 = vadd.f32 %v3869_v4, %v3868_v22  ;;  %v8491_v43 = vpop.f32.mrb[23].mxu1  ;;  %v3771_v37 = vadd.f32 %v3770_v46, %v3769_v55  ;;  %v3821_v41 = vmul.f32 %v8489_v6, %v8489_v6  ;;  %v3774_v50 = vsel %vm230_vm0, %v8489_v6, 0.0 }
 0x4f6   : > { %v3772_v23 = vsel %vm230_vm0, %v8491_v43, 0.0  ;;  %v3820_v32 = vmul.f32 %v8491_v43, %v8491_v43 }
 0x4f7   : > { %v3773_v59 = vadd.f32 %v3772_v23, %v3771_v37  ;;  %v3872_v15 = vadd.f32 %v3871_v47, %v3870_v14  ;;  %v3875_v40 = vsel %vm230_vm0, %v3821_v41, 0.0 }
 0x4f8   : > { %v3873_v2 = vsel %vm230_vm0, %v3820_v32, 0.0  ;;  %v8503_v7 = vpop.f32.mrb[24].mxu1 }
 0x4f9   : > { %v3874_v3 = vadd.f32 %v3873_v2, %v3872_v15  ;;  %v8505_v48 = vpop.f32.mrb[25].mxu1  ;;  %v3775_v28 = vadd.f32 %v3774_v50, %v3773_v59  ;;  %v3823_v13 = vmul.f32 %v8503_v7, %v8503_v7  ;;  %v3778_v62 = vsel %vm230_vm0, %v8503_v7, 0.0 }
 0x4fa   : > { %v3776_v0 = vsel %vm230_vm0, %v8505_v48, 0.0  ;;  %v3822_v30 = vmul.f32 %v8505_v48, %v8505_v48 }
 0x4fb   : > { %v3777_v35 = vadd.f32 %v3776_v0, %v3775_v28  ;;  %v3876_v38 = vadd.f32 %v3875_v40, %v3874_v3  ;;  %v3879_v29 = vsel %vm230_vm0, %v3823_v13, 0.0 }
 0x4fc   : > { %v3877_v17 = vsel %vm230_vm0, %v3822_v30, 0.0  ;;  %v8517_v53 = vpop.f32.mrb[26].mxu1 }
 0x4fd   : > { %v3878_v57 = vadd.f32 %v3877_v17, %v3876_v38  ;;  %v8519_v20 = vpop.f32.mrb[27].mxu1  ;;  %v3779_v26 = vadd.f32 %v3778_v62, %v3777_v35  ;;  %v3825_v16 = vmul.f32 %v8517_v53, %v8517_v53  ;;  %v3782_v24 = vsel %vm230_vm0, %v8517_v53, 0.0 }
 0x4fe   : > { %v3780_v25 = vsel %vm230_vm0, %v8519_v20, 0.0  ;;  %v3824_v9 = vmul.f32 %v8519_v20, %v8519_v20 }
 0x4ff   : > { %v3781_v63 = vadd.f32 %v3780_v25, %v3779_v26  ;;  %v3880_v8 = vadd.f32 %v3879_v29, %v3878_v57  ;;  %v3883_v4 = vsel %vm230_vm0, %v3825_v16, 0.0 }
 0x500   : > { %v3881_v11 = vsel %vm230_vm0, %v3824_v9, 0.0  ;;  %v8531_v19 = vpop.f32.mrb[28].mxu1 }
 0x501   : > { %v3882_v55 = vadd.f32 %v3881_v11, %v3880_v8  ;;  %v8533_v22 = vpop.f32.mrb[29].mxu1  ;;  %v3783_v46 = vadd.f32 %v3782_v24, %v3781_v63  ;;  %v3827_v14 = vmul.f32 %v8531_v19, %v8531_v19  ;;  %v3786_v32 = vsel %vm230_vm0, %v8531_v19, 0.0 }
 0x502   : > { %v3784_v37 = vsel %vm230_vm0, %v8533_v22, 0.0  ;;  %v3826_v47 = vmul.f32 %v8533_v22, %v8533_v22 }
 0x503   : > { %v3785_v41 = vadd.f32 %v3784_v37, %v3783_v46  ;;  %v3884_v23 = vadd.f32 %v3883_v4, %v3882_v55  ;;  %v3887_v28 = vsel %vm230_vm0, %v3827_v14, 0.0 }
 0x504   : > { %v3885_v59 = vsel %vm230_vm0, %v3826_v47, 0.0  ;;  %v8545_v15 = vpop.f32.mrb[30].mxu1 }
 0x505   : > { %v3886_v50 = vadd.f32 %v3885_v59, %v3884_v23  ;;  %v8547_v2 = vpop.f32.mrb[31].mxu1  ;;  %v3787_v3 = vadd.f32 %v3786_v32, %v3785_v41  ;;  %v3829_v40 = vmul.f32 %v8545_v15, %v8545_v15  ;;  %v3790_v38 = vsel %vm230_vm0, %v8545_v15, 0.0 }
 0x506   : > { %v3788_v13 = vsel %vm230_vm0, %v8547_v2, 0.0  ;;  %v3828_v0 = vmul.f32 %v8547_v2, %v8547_v2 }
 0x507   : > { %v3789_v30 = vadd.f32 %v3788_v13, %v3787_v3  ;;  %v3888_v35 = vadd.f32 %v3887_v28, %v3886_v50  ;;  %v3891_v26 = vsel %vm230_vm0, %v3829_v40, 0.0 }
 0x508   : > { %v3889_v62 = vsel %vm230_vm0, %v3828_v0, 0.0 }
 0x509   : > { %v3791_v17 = vadd.f32 %v3790_v38, %v3789_v30  ;;  %v3890_v57 = vadd.f32 %v3889_v62, %v3888_v35 }
 0x50b   : > { %v3792_v29 = vrot.slane %v3791_v17, 4  ;;  %v3892_v16 = vadd.f32 %v3891_v26, %v3890_v57 }
 0x50d   : > { %v3793_v25 = vadd.f32 %v3792_v29, %v3791_v17  ;;  %v3893_v9 = vrot.slane %v3892_v16, 4 }
 0x50f   : > { %v3794_v63 = vrot.slane %v3793_v25, 2  ;;  %v3894_v8 = vadd.f32 %v3893_v9, %v3892_v16 }
 0x511   : > { %v3795_v24 = vadd.f32 %v3794_v63, %v3793_v25  ;;  %v3895_v11 = vrot.slane %v3894_v8, 2 }
 0x513   : > { %v3796_v55 = vrot.slane %v3795_v24, 1  ;;  %v3896_v46 = vadd.f32 %v3895_v11, %v3894_v8 }
 0x515   : > { %v3797_v4 = vadd.f32 %v3796_v55, %v3795_v24  ;;  %v3897_v14 = vrot.slane %v3896_v46, 1 }
 0x517   : > { %v3898_v37 = vadd.f32 %v3897_v14, %v3896_v46  ;;  %v8560_v47 = vmul.f32 0.00390625, %v3797_v4 }
 0x519   : > { %v3900_v41 = vmul.f32 0.00390625, %v3898_v37  ;;  %v3901_v23 = vmul.f32 %v8560_v47, %v8560_v47  ;;  %v3933_v32 = vsub.f32 %v8547_v2, %v8560_v47  ;;  %v3903_v59 = vsub.f32 %v8342_v33, %v8560_v47 }
 0x51a   : > { %v3904_v50 = vsub.f32 %v8336_v1, %v8560_v47  ;;  %v3905_v3 = vsub.f32 %v8352_v31, %v8560_v47  ;;  %v3906_v28 = vsub.f32 %v8350_v27, %v8560_v47  ;;  %v3907_v40 = vsub.f32 %v8365_v54, %v8560_v47 }
 0x51b   : > { %v3902_v13 = vsub.f32 %v3900_v41, %v3901_v23  ;;  %v3908_v0 = vsub.f32 %v8363_v5, %v8560_v47  ;;  %v3909_v2 = vsub.f32 %v8379_v10, %v8560_v47  ;;  %v3910_v33 = vsub.f32 %v8377_v61, %v8560_v47 }
 0x51c   : > { %v3911_v1 = vsub.f32 %v8393_v58, %v8560_v47  ;;  %v3912_v31 = vsub.f32 %v8391_v51, %v8560_v47  ;;  %v3913_v27 = vsub.f32 %v8407_v42, %v8560_v47  ;;  %v3914_v54 = vsub.f32 %v8405_v21, %v8560_v47 }
 0x51d   : > { %v3935_v30 = vadd.f32 1e-05, %v3902_v13  ;;  %v3915_v5 = vsub.f32 %v8421_v60, %v8560_v47  ;;  %v3916_v10 = vsub.f32 %v8419_v44, %v8560_v47  ;;  %v3917_v61 = vsub.f32 %v8435_v18, %v8560_v47 }
 0x51e   : > { %v3918_v58 = vsub.f32 %v8433_v49, %v8560_v47  ;;  %v3919_v51 = vsub.f32 %v8449_v36, %v8560_v47  ;;  %v3920_v42 = vsub.f32 %v8447_v45, %v8560_v47  ;;  %v3921_v21 = vsub.f32 %v8463_v52, %v8560_v47 }
 0x51f   : > { %5448 = vrsqrt.f32 %v3935_v30  ;;  %v3922_v60 = vsub.f32 %v8461_v56, %v8560_v47  ;;  %v3923_v44 = vsub.f32 %v8477_v39, %v8560_v47  ;;  %v3924_v49 = vsub.f32 %v8475_v12, %v8560_v47 }
 0x520   : > { %v3925_v18 = vsub.f32 %v8491_v43, %v8560_v47  ;;  %v3926_v45 = vsub.f32 %v8489_v6, %v8560_v47  ;;  %v3927_v36 = vsub.f32 %v8505_v48, %v8560_v47  ;;  %v3928_v52 = vsub.f32 %v8503_v7, %v8560_v47 }
 0x521   : > { %v3929_v56 = vsub.f32 %v8519_v20, %v8560_v47  ;;  %v3930_v39 = vsub.f32 %v8517_v53, %v8560_v47  ;;  %v3931_v12 = vsub.f32 %v8533_v22, %v8560_v47  ;;  %v3932_v43 = vsub.f32 %v8531_v19, %v8560_v47  ;;  %v5450_v20 = vld [vmem:[%s8857_s3] sm:$0xf] }
 0x522   : > { %v3934_v6 = vsub.f32 %v8545_v15, %v8560_v47  ;;  %v3971_v48 = vsub.s32 2, %v5727_v34  ;;  %v4007_v7 = vsub.s32 3, %v5727_v34 }
 0x524   : > { %v8633_v35 = vrot.slane %v5450_v20, %v3971_v48  ;;  %v8636_v22 = vrot.slane %v5450_v20, %v4007_v7 }
 0x529   : > { %v5449_v53 = vpop.eup %5448 }
 0x52a   : > { %v3967_v38 = vmul.f32 %v5449_v53, %v3933_v32  ;;  %v3937_v19 = vmul.f32 %v5449_v53, %v3903_v59  ;;  %v3938_v62 = vmul.f32 %v5449_v53, %v3904_v50  ;;  %v3939_v17 = vmul.f32 %v5449_v53, %v3905_v3  ;;  %v9048_v32 = vld [vmem:[#allocation36_spill] sm:$0xff] }
 0x52b   : > { %v3940_v15 = vmul.f32 %v5449_v53, %v3906_v28  ;;  %v3941_v57 = vmul.f32 %v5449_v53, %v3907_v40  ;;  %v3942_v26 = vmul.f32 %v5449_v53, %v3908_v0  ;;  %v3943_v29 = vmul.f32 %v5449_v53, %v3909_v2 }
 0x52c   : > { %v4003_v34 = vmul.f32 %v8633_v35, %v3967_v38  ;;  %v3944_v16 = vmul.f32 %v5449_v53, %v3910_v33  ;;  %v3945_v25 = vmul.f32 %v5449_v53, %v3911_v1  ;;  %v3946_v9 = vmul.f32 %v5449_v53, %v3912_v31 }
 0x52d   : > { %v3947_v63 = vmul.f32 %v5449_v53, %v3913_v27  ;;  %v3948_v8 = vmul.f32 %v5449_v53, %v3914_v54  ;;  %v3949_v24 = vmul.f32 %v5449_v53, %v3915_v5  ;;  %v3950_v11 = vmul.f32 %v5449_v53, %v3916_v10 }
 0x52e   : > { %v4039_v55 = vadd.f32 %v8636_v22, %v4003_v34  ;;  %v3951_v46 = vmul.f32 %v5449_v53, %v3917_v61  ;;  %v3952_v4 = vmul.f32 %v5449_v53, %v3918_v58  ;;  %v3953_v14 = vmul.f32 %v5449_v53, %v3919_v51 }
 0x52f   : > { %v3954_v37 = vmul.f32 %v5449_v53, %v3920_v42  ;;  %v3955_v47 = vmul.f32 %v5449_v53, %v3921_v21  ;;  %v3956_v41 = vmul.f32 %v5449_v53, %v3922_v60  ;;  %v3957_v23 = vmul.f32 %v5449_v53, %v3923_v44 }
 0x530   : > { %v4071_v59 = vadd.f32 %v4039_v55, %v9048_v32  ;;  %v3958_v50 = vmul.f32 %v5449_v53, %v3924_v49  ;;  %v3959_v3 = vmul.f32 %v5449_v53, %v3925_v18  ;;  %v3960_v28 = vmul.f32 %v5449_v53, %v3926_v45 }
 0x531   : > { %v3961_v40 = vmul.f32 %v5449_v53, %v3927_v36  ;;  %v3962_v13 = vmul.f32 %v5449_v53, %v3928_v52  ;;  %v3963_v0 = vmul.f32 %v5449_v53, %v3929_v56  ;;  %v3964_v2 = vmul.f32 %v5449_v53, %v3930_v39 }
 0x532   : > { %4103 = vst.msk [vmem:[%s8643_s20 + $0xf0] sm:$0xff] %vm230_vm0, %v4071_v59  ;;  %v3965_v33 = vmul.f32 %v5449_v53, %v3931_v12  ;;  %v3966_v1 = vmul.f32 %v5449_v53, %v3932_v43  ;;  %v3968_v31 = vmul.f32 %v5449_v53, %v3934_v6  ;;  %v3973_v27 = vmul.f32 %v8633_v35, %v3937_v19 }
 0x533   : > { %v3974_v54 = vmul.f32 %v8633_v35, %v3938_v62  ;;  %v3975_v30 = vmul.f32 %v8633_v35, %v3939_v17  ;;  %v3976_v5 = vmul.f32 %v8633_v35, %v3940_v15  ;;  %v3977_v10 = vmul.f32 %v8633_v35, %v3941_v57 }
 0x534   : > { %v3978_v61 = vmul.f32 %v8633_v35, %v3942_v26  ;;  %v3979_v58 = vmul.f32 %v8633_v35, %v3943_v29  ;;  %v3980_v51 = vmul.f32 %v8633_v35, %v3944_v16  ;;  %v3981_v42 = vmul.f32 %v8633_v35, %v3945_v25 }
 0x535   : > { %v3982_v21 = vmul.f32 %v8633_v35, %v3946_v9  ;;  %v3983_v60 = vmul.f32 %v8633_v35, %v3947_v63  ;;  %v3984_v44 = vmul.f32 %v8633_v35, %v3948_v8  ;;  %v3985_v49 = vmul.f32 %v8633_v35, %v3949_v24 }
 0x536   : > { %v3986_v18 = vmul.f32 %v8633_v35, %v3950_v11  ;;  %v3987_v45 = vmul.f32 %v8633_v35, %v3951_v46  ;;  %v3988_v36 = vmul.f32 %v8633_v35, %v3952_v4  ;;  %v3989_v52 = vmul.f32 %v8633_v35, %v3953_v14 }
 0x537   : > { %v3990_v56 = vmul.f32 %v8633_v35, %v3954_v37  ;;  %v3991_v39 = vmul.f32 %v8633_v35, %v3955_v47  ;;  %v3992_v12 = vmul.f32 %v8633_v35, %v3956_v41  ;;  %v3993_v43 = vmul.f32 %v8633_v35, %v3957_v23 }
 0x538   : > { %v3994_v6 = vmul.f32 %v8633_v35, %v3958_v50  ;;  %v3995_v48 = vmul.f32 %v8633_v35, %v3959_v3  ;;  %v3996_v7 = vmul.f32 %v8633_v35, %v3960_v28  ;;  %v3997_v20 = vmul.f32 %v8633_v35, %v3961_v40 }
 0x539   : > { %v3998_v53 = vmul.f32 %v8633_v35, %v3962_v13  ;;  %v3999_v38 = vmul.f32 %v8633_v35, %v3963_v0  ;;  %v4000_v19 = vmul.f32 %v8633_v35, %v3964_v2  ;;  %v4001_v62 = vmul.f32 %v8633_v35, %v3965_v33 }
 0x53a   : > { %v4002_v17 = vmul.f32 %v8633_v35, %v3966_v1  ;;  %v4004_v15 = vmul.f32 %v8633_v35, %v3968_v31  ;;  %v4009_v57 = vadd.f32 %v8636_v22, %v3973_v27  ;;  %v4010_v26 = vadd.f32 %v8636_v22, %v3974_v54  ;;  %v9049_v31 = vld [vmem:[#allocation7_spill] sm:$0xff]  ;;  %v9050_v54 = vld [vmem:[#allocation9_spill] sm:$0xff] }
 0x53b   : > { %v4011_v29 = vadd.f32 %v8636_v22, %v3975_v30  ;;  %v4012_v34 = vadd.f32 %v8636_v22, %v3976_v5  ;;  %v4013_v16 = vadd.f32 %v8636_v22, %v3977_v10  ;;  %v4014_v25 = vadd.f32 %v8636_v22, %v3978_v61  ;;  %v9051_v5 = vld [vmem:[#allocation10_spill] sm:$0xff] }
 0x53c   : > { %v4015_v9 = vadd.f32 %v8636_v22, %v3979_v58  ;;  %v4016_v63 = vadd.f32 %v8636_v22, %v3980_v51  ;;  %v4017_v8 = vadd.f32 %v8636_v22, %v3981_v42  ;;  %v4018_v35 = vadd.f32 %v8636_v22, %v3982_v21  ;;  %v9052_v61 = vld [vmem:[#allocation6_spill] sm:$0xff]  ;;  %v9053_v51 = vld [vmem:[#allocation11_spill] sm:$0xff]  ;;  %v9054_v21 = vld [vmem:[#allocation8_spill] sm:$0xff] }
 0x53d   : > { %v4019_v24 = vadd.f32 %v8636_v22, %v3983_v60  ;;  %v4020_v11 = vadd.f32 %v8636_v22, %v3984_v44  ;;  %v4021_v55 = vadd.f32 %v8636_v22, %v3985_v49  ;;  %v4022_v46 = vadd.f32 %v8636_v22, %v3986_v18  ;;  %v9055_v44 = vld [vmem:[#allocation13_spill] sm:$0xff]  ;;  %v9056_v18 = vld [vmem:[#allocation12_spill] sm:$0xff] }
 0x53e   : > { %v4023_v4 = vadd.f32 %v8636_v22, %v3987_v45  ;;  %v4024_v14 = vadd.f32 %v8636_v22, %v3988_v36  ;;  %v4025_v37 = vadd.f32 %v8636_v22, %v3989_v52  ;;  %v4026_v47 = vadd.f32 %v8636_v22, %v3990_v56  ;;  %v9057_v45 = vld [vmem:[#allocation14_spill] sm:$0xff]  ;;  %v9058_v52 = vld [vmem:[#allocation15_spill] sm:$0xff] }
 0x53f   : > { %v4027_v41 = vadd.f32 %v8636_v22, %v3991_v39  ;;  %v4028_v23 = vadd.f32 %v8636_v22, %v3992_v12  ;;  %v4029_v32 = vadd.f32 %v8636_v22, %v3993_v43  ;;  %v4030_v59 = vadd.f32 %v8636_v22, %v3994_v6  ;;  %v9059_v39 = vld [vmem:[#allocation16_spill] sm:$0xff]  ;;  %v9060_v43 = vld [vmem:[#allocation17_spill] sm:$0xff] }
 0x540   : > { %v4031_v50 = vadd.f32 %v8636_v22, %v3995_v48  ;;  %v4032_v3 = vadd.f32 %v8636_v22, %v3996_v7  ;;  %v4033_v28 = vadd.f32 %v8636_v22, %v3997_v20  ;;  %v4034_v40 = vadd.f32 %v8636_v22, %v3998_v53  ;;  %v9061_v48 = vld [vmem:[#allocation18_spill] sm:$0xff]  ;;  %v9062_v20 = vld [vmem:[#allocation19_spill] sm:$0xff] }
 0x541   : > { %v4035_v13 = vadd.f32 %v8636_v22, %v3999_v38  ;;  %v4036_v0 = vadd.f32 %v8636_v22, %v4000_v19  ;;  %v4037_v2 = vadd.f32 %v8636_v22, %v4001_v62  ;;  %v4038_v33 = vadd.f32 %v8636_v22, %v4002_v17  ;;  %v9063_v38 = vld [vmem:[#allocation20_spill] sm:$0xff]  ;;  %v9064_v62 = vld [vmem:[#allocation21_spill] sm:$0xff] }
 0x542   : > { %v4040_v1 = vadd.f32 %v8636_v22, %v4004_v15  ;;  %v4041_v27 = vadd.f32 %v4009_v57, %v9049_v31  ;;  %v4042_v30 = vadd.f32 %v4010_v26, %v9050_v54  ;;  %v4043_v10 = vadd.f32 %v4011_v29, %v9051_v5  ;;  %v9065_v15 = vld [vmem:[#allocation22_spill] sm:$0xff]  ;;  %v9066_v26 = vld [vmem:[#allocation23_spill] sm:$0xff]  ;;  %v9079_v31 = vld [vmem:[#allocation37_spill] sm:$0xff] }
 0x543   : > { %v4044_v58 = vadd.f32 %v4012_v34, %v9052_v61  ;;  %v4045_v42 = vadd.f32 %v4013_v16, %v9053_v51  ;;  %v4046_v60 = vadd.f32 %v4014_v25, %v9054_v21  ;;  %v4047_v49 = vadd.f32 %v4015_v9, %v9055_v44  ;;  %v9067_v34 = vld [vmem:[#allocation24_spill] sm:$0xff]  ;;  %v9068_v25 = vld [vmem:[#allocation25_spill] sm:$0xff] }
 0x544   : > { %v4048_v22 = vadd.f32 %v4016_v63, %v9056_v18  ;;  %v4049_v36 = vadd.f32 %v4017_v8, %v9057_v45  ;;  %v4050_v56 = vadd.f32 %v4018_v35, %v9058_v52  ;;  %v4051_v12 = vadd.f32 %v4019_v24, %v9059_v39  ;;  %4073 = vst.msk [vmem:[%s8643_s20] sm:$0xff] %vm230_vm0, %v4041_v27  ;;  %v9069_v63 = vld [vmem:[#allocation26_spill] sm:$0xff]  ;;  %v9070_v35 = vld [vmem:[#allocation27_spill] sm:$0xff] }
 0x545   : > { %4074 = vst.msk [vmem:[%s8643_s20 + $0x8] sm:$0xff] %vm230_vm0, %v4042_v30  ;;  %4075 = vst.msk [vmem:[%s8643_s20 + $0x10] sm:$0xff] %vm230_vm0, %v4043_v10  ;;  %v4052_v6 = vadd.f32 %v4020_v11, %v9060_v43  ;;  %v4053_v7 = vadd.f32 %v4021_v55, %v9061_v48  ;;  %v4054_v53 = vadd.f32 %v4022_v46, %v9062_v20  ;;  %v9071_v11 = vld [vmem:[#allocation28_spill] sm:$0xff]  ;;  %v9072_v46 = vld [vmem:[#allocation29_spill] sm:$0xff] }
 0x546   : > { %v4055_v19 = vadd.f32 %v4023_v4, %v9063_v38  ;;  %4076 = vst.msk [vmem:[%s8643_s20 + $0x18] sm:$0xff] %vm230_vm0, %v4044_v58  ;;  %4077 = vst.msk [vmem:[%s8643_s20 + $0x20] sm:$0xff] %vm230_vm0, %v4045_v42  ;;  %v4056_v17 = vadd.f32 %v4024_v14, %v9064_v62  ;;  %v4057_v57 = vadd.f32 %v4025_v37, %v9065_v15  ;;  %v9073_v14 = vld [vmem:[#allocation30_spill] sm:$0xff] }
 0x547   : > { %4078 = vst.msk [vmem:[%s8643_s20 + $0x28] sm:$0xff] %vm230_vm0, %v4046_v60  ;;  %4079 = vst.msk [vmem:[%s8643_s20 + $0x30] sm:$0xff] %vm230_vm0, %v4047_v49  ;;  %v4058_v29 = vadd.f32 %v4026_v47, %v9066_v26  ;;  %v4059_v16 = vadd.f32 %v4027_v41, %v9067_v34  ;;  %v4060_v9 = vadd.f32 %v4028_v23, %v9068_v25  ;;  %v9074_v47 = vld [vmem:[#allocation31_spill] sm:$0xff]  ;;  %v9075_v23 = vld [vmem:[#allocation32_spill] sm:$0xff] }
 0x548   : > { %4080 = vst.msk [vmem:[%s8643_s20 + $0x38] sm:$0xff] %vm230_vm0, %v4048_v22  ;;  %4081 = vst.msk [vmem:[%s8643_s20 + $0x40] sm:$0xff] %vm230_vm0, %v4049_v36  ;;  %v4061_v8 = vadd.f32 %v4029_v32, %v9069_v63  ;;  %v4062_v24 = vadd.f32 %v4030_v59, %v9070_v35  ;;  %v4063_v55 = vadd.f32 %v4031_v50, %v9071_v11  ;;  %v9076_v59 = vld [vmem:[#allocation33_spill] sm:$0xff] }
 0x549   : > { %4082 = vst.msk [vmem:[%s8643_s20 + $0x48] sm:$0xff] %vm230_vm0, %v4050_v56  ;;  %4083 = vst.msk [vmem:[%s8643_s20 + $0x50] sm:$0xff] %vm230_vm0, %v4051_v12  ;;  %v4064_v4 = vadd.f32 %v4032_v3, %v9072_v46  ;;  %v4065_v37 = vadd.f32 %v4033_v28, %v9073_v14  ;;  %v4066_v41 = vadd.f32 %v4034_v40, %v9074_v47  ;;  %v9077_v3 = vld [vmem:[#allocation34_spill] sm:$0xff]  ;;  %v9078_v40 = vld [vmem:[#allocation35_spill] sm:$0xff] }
 0x54a   : > { %4084 = vst.msk [vmem:[%s8643_s20 + $0x58] sm:$0xff] %vm230_vm0, %v4052_v6  ;;  %4085 = vst.msk [vmem:[%s8643_s20 + $0x60] sm:$0xff] %vm230_vm0, %v4053_v7  ;;  %v4067_v32 = vadd.f32 %v4035_v13, %v9075_v23  ;;  %v4068_v50 = vadd.f32 %v4036_v0, %v9076_v59  ;;  %v4069_v28 = vadd.f32 %v4037_v2, %v9077_v3 }
 0x54b   : > { %4086 = vst.msk [vmem:[%s8643_s20 + $0x68] sm:$0xff] %vm230_vm0, %v4054_v53  ;;  %4087 = vst.msk [vmem:[%s8643_s20 + $0x70] sm:$0xff] %vm230_vm0, %v4055_v19  ;;  %v4070_v13 = vadd.f32 %v4038_v33, %v9078_v40  ;;  %v4072_v27 = vadd.f32 %v4040_v1, %v9079_v31 }
 0x54c   : > { %4088 = vst.msk [vmem:[%s8643_s20 + $0x78] sm:$0xff] %vm230_vm0, %v4056_v17  ;;  %4089 = vst.msk [vmem:[%s8643_s20 + $0x80] sm:$0xff] %vm230_vm0, %v4057_v57 }
 0x54d   : > { %4090 = vst.msk [vmem:[%s8643_s20 + $0x88] sm:$0xff] %vm230_vm0, %v4058_v29  ;;  %4091 = vst.msk [vmem:[%s8643_s20 + $0x90] sm:$0xff] %vm230_vm0, %v4059_v16 }
 0x54e   : > { %4092 = vst.msk [vmem:[%s8643_s20 + $0x98] sm:$0xff] %vm230_vm0, %v4060_v9  ;;  %4093 = vst.msk [vmem:[%s8643_s20 + $0xa0] sm:$0xff] %vm230_vm0, %v4061_v8 }
 0x54f   : > { %4094 = vst.msk [vmem:[%s8643_s20 + $0xa8] sm:$0xff] %vm230_vm0, %v4062_v24  ;;  %4095 = vst.msk [vmem:[%s8643_s20 + $0xb0] sm:$0xff] %vm230_vm0, %v4063_v55 }
 0x550   : > { %4096 = vst.msk [vmem:[%s8643_s20 + $0xb8] sm:$0xff] %vm230_vm0, %v4064_v4  ;;  %4097 = vst.msk [vmem:[%s8643_s20 + $0xc0] sm:$0xff] %vm230_vm0, %v4065_v37 }
 0x551   : > { %4098 = vst.msk [vmem:[%s8643_s20 + $0xc8] sm:$0xff] %vm230_vm0, %v4066_v41  ;;  %4099 = vst.msk [vmem:[%s8643_s20 + $0xd0] sm:$0xff] %vm230_vm0, %v4067_v32 }
 0x552   : > { %4100 = vst.msk [vmem:[%s8643_s20 + $0xd8] sm:$0xff] %vm230_vm0, %v4068_v50  ;;  %4101 = vst.msk [vmem:[%s8643_s20 + $0xe0] sm:$0xff] %vm230_vm0, %v4069_v28 }
 0x553   : > { %4102 = vst.msk [vmem:[%s8643_s20 + $0xe8] sm:$0xff] %vm230_vm0, %v4070_v13  ;;  %4104 = vst.msk [vmem:[%s8643_s20 + $0xf8] sm:$0xff] %vm230_vm0, %v4072_v27 }
 0x554   : > { %5464 = shalt.err (!%p5461_p3)
}
 0x555   : > { %s5465_s8 = scalar_lea.hbm %s8779_s6, 4096  ;;  %s5469_s11 = scalar_lea.hbm %s8858_s4, 8192 }
 0x556   : > { %p5466_p4 = scmp.ne.s32.totalorder %s8779_s6, %s5465_s8  ;;  %p5470_p9 = scmp.lt.u32.totalorder %s8779_s6, %s8858_s4 }
 0x557   : > { %p5471_p10 = scmp.lt.u32.totalorder %s5469_s11, %s5465_s8  ;;  %p5473_p12 = scmp.lt.u32.totalorder %s5465_s8, %s8779_s6 }
 0x558   : > { %p5467_p7 = pnand %p5466_p4, %p5583_p5 }
 0x559   : > { %p5472_p11 = por %p5471_p10, %p5470_p9 }
 0x55a   : > { %p5468_p8 = pneg %p5467_p7 }
 0x55b   : > { %p5474_p13 = por %p5473_p12, %p5472_p11 }
 0x55d   : > { %p5475_p0 = pnand %p5474_p13, %p5468_p8 }
 0x55f   : > { %5478 = shalt.err (!%p5475_p0)
}
 0x560   : > { %s5518_s14 = smov 128   ;;  %s5519_s20 = smov 8  }
 0x561   : > { %5403 = dma.vmem_to_hbm [thread:$0]  (%p5583_p5), %s8781_s23, 4096, %s8779_s6, %s8813_s27, %s5518_s14, %s5518_s14, %s5519_s20  }
 0x562 PF: > { %p5409_p1 = scmp.ge.s32.totalorder %s5513_s18, 2  ;;  %s4134_s22 = sand.u32 1, %s5501_s15  }
 0x563   : > { %s4135_s19 = scalar_lea.sflag [#allocation4], %s4134_s22 }
 0x564   : > { %p5406_p2 = pnand %p5409_p1, %p5587_p6 }
 0x566   : > { %5496 = dma.done.wait (!%p5406_p2), %s4135_s19, 4096  }
 0x567   : > { %5498 = vsyncadd (!%p5406_p2), %s4135_s19, 4294963200  ;;  %p14_p3 = scmp.ge.s32.totalorder %s5570_s21, 4   ;;  %s9080_s15 = smov %s5505_s16 }
 0x568   : > { %s9081_s16 = smov %s5509_s17  ;;  %s9082_s17 = smov %s5581_s24 }
 0x569   : > { %s9083_s18 = smov %s5570_s21  ;;  %16 = sbr.rel (!%p14_p3) target bundleno = 3 (0x3), region = 77 }
 0x570   :  { %4140 = vsyncpa [#allocation4], 1 }
 0x571   :  { %4142 = vsyncpa [#allocation4 + $0x1], 1 }

</bundles_post_ra>
